<compile_context>
chip_gen: v5e
topology: v5e:2x2
jax: 0.10.0
libtpu: 0.0.40
codegen_flags: <defaults>
</compile_context>

<pallas_src>
import functools
import math

import jax
import jax.numpy as jnp
from jax import lax
from jax.experimental import pallas as pl
from jax.experimental.pallas import tpu as pltpu

LN_EPS = 1e-5          # PyTorch nn.LayerNorm default
NEG_INF = -1e30        # finite mask value (avoids NaN for fully-masked rows)


def _fit(dim, pref):
    """Pick a tile size: `pref` when it divides `dim`, else the full dim (always legal)."""
    if dim <= pref or dim % pref != 0:
        return dim
    return pref


# ----------------------------- tiled linear kernels ----------------------------- #

def _matmul_kernel(x_ref, w_ref, *rest, has_bias, activation, nk):
    if has_bias:
        b_ref, o_ref, acc_ref = rest
    else:
        o_ref, acc_ref = rest

    @pl.when(pl.program_id(2) == 0)
    def _init():
        acc_ref[...] = jnp.zeros_like(acc_ref)

    acc_ref[...] += jnp.dot(x_ref[...], w_ref[...],
                            preferred_element_type=jnp.float32)

    @pl.when(pl.program_id(2) == nk - 1)
    def _finalize():
        y = acc_ref[...]
        if has_bias:
            y = y + b_ref[...]
        if activation == "relu":
            y = jnp.maximum(y, 0.0)
        o_ref[...] = y.astype(o_ref.dtype)


def linear(x, w, b=None, activation=None, *, tm=128, tn=256, tk=512):
    """y = act(x @ w [+ b]); tiled over (M, N, K) with a VMEM f32 accumulator."""
    M, K = x.shape
    N = w.shape[1]
    tm, tn, tk = _fit(M, tm), _fit(N, tn), _fit(K, tk)
    nk = K // tk
    in_specs = [pl.BlockSpec((tm, tk), lambda i, j, k: (i, k)),
                pl.BlockSpec((tk, tn), lambda i, j, k: (k, j))]
    args = [x, w]
    if b is not None:
        in_specs.append(pl.BlockSpec((1, tn), lambda i, j, k: (0, j)))
        args.append(b.reshape(1, N))
    return pl.pallas_call(
        functools.partial(_matmul_kernel, has_bias=b is not None,
                          activation=activation, nk=nk),
        grid=(M // tm, N // tn, nk),
        in_specs=in_specs,
        out_specs=pl.BlockSpec((tm, tn), lambda i, j, k: (i, j)),
        out_shape=jax.ShapeDtypeStruct((M, N), jnp.float32),
        scratch_shapes=[pltpu.VMEM((tm, tn), jnp.float32)],
        compiler_params=pltpu.CompilerParams(
            dimension_semantics=("parallel", "parallel", "arbitrary")),
    )(*args)


def _matmul_res_ln_kernel(x_ref, w_ref, res_ref, g_ref, beta_ref, *rest,
                          has_bias, nk):
    if has_bias:
        b_ref, o_ref, acc_ref = rest
    else:
        o_ref, acc_ref = rest

    @pl.when(pl.program_id(1) == 0)
    def _init():
        acc_ref[...] = jnp.zeros_like(acc_ref)

    acc_ref[...] += jnp.dot(x_ref[...], w_ref[...],
                            preferred_element_type=jnp.float32)

    @pl.when(pl.program_id(1) == nk - 1)
    def _finalize():
        y = acc_ref[...]
        if has_bias:
            y = y + b_ref[...]
        z = res_ref[...] + y
        mu = jnp.mean(z, axis=-1, keepdims=True)
        zc = z - mu
        var = jnp.mean(zc * zc, axis=-1, keepdims=True)
        o_ref[...] = (zc * lax.rsqrt(var + LN_EPS) * g_ref[...]
                      + beta_ref[...]).astype(o_ref.dtype)


def linear_residual_layernorm(x, w, residual, gamma, beta, b=None, *, tm=128, tk=512):
    """LayerNorm(residual + x @ w [+ b]); the LN axis (N) is kept un-tiled."""
    M, K = x.shape
    N = w.shape[1]
    tm, tk = _fit(M, tm), _fit(K, tk)
    nk = K // tk
    in_specs = [pl.BlockSpec((tm, tk), lambda i, k: (i, k)),
                pl.BlockSpec((tk, N), lambda i, k: (k, 0)),
                pl.BlockSpec((tm, N), lambda i, k: (i, 0)),
                pl.BlockSpec((1, N), lambda i, k: (0, 0)),
                pl.BlockSpec((1, N), lambda i, k: (0, 0))]
    args = [x, w, residual, gamma.reshape(1, N), beta.reshape(1, N)]
    if b is not None:
        in_specs.append(pl.BlockSpec((1, N), lambda i, k: (0, 0)))
        args.append(b.reshape(1, N))
    return pl.pallas_call(
        functools.partial(_matmul_res_ln_kernel, has_bias=b is not None, nk=nk),
        grid=(M // tm, nk),
        in_specs=in_specs,
        out_specs=pl.BlockSpec((tm, N), lambda i, k: (i, 0)),
        out_shape=jax.ShapeDtypeStruct((M, N), jnp.float32),
        scratch_shapes=[pltpu.VMEM((tm, N), jnp.float32)],
        compiler_params=pltpu.CompilerParams(
            dimension_semantics=("parallel", "arbitrary")),
    )(*args)


def _ln_kernel(x_ref, g_ref, b_ref, o_ref):
    z = x_ref[...]
    mu = jnp.mean(z, axis=-1, keepdims=True)
    zc = z - mu
    var = jnp.mean(zc * zc, axis=-1, keepdims=True)
    o_ref[...] = zc * lax.rsqrt(var + LN_EPS) * g_ref[...] + b_ref[...]


def layernorm(x, g, b, *, tm=256):
    M, D = x.shape
    tm = _fit(M, tm)
    return pl.pallas_call(
        _ln_kernel,
        grid=(M // tm,),
        in_specs=[pl.BlockSpec((tm, D), lambda i: (i, 0)),
                  pl.BlockSpec((1, D), lambda i: (0, 0)),
                  pl.BlockSpec((1, D), lambda i: (0, 0))],
        out_specs=pl.BlockSpec((tm, D), lambda i: (i, 0)),
        out_shape=jax.ShapeDtypeStruct((M, D), jnp.float32),
        compiler_params=pltpu.CompilerParams(dimension_semantics=("parallel",)),
    )(x, g.reshape(1, D), b.reshape(1, D))


# ------------------------- fused attention kernels (per batch) ------------------------- #

def _xl_attn_kernel(qkv_ref, r_ref, rwb_ref, rrb_ref, bias_ref, o_ref,
                    bd_ref, bds_ref, *, nhead, scale):
    # qkv_ref: (1, Q, 3D)  packed [q|k|v]; r_ref: (Q, D) projected positions;
    # rwb/rrb: (1, D) per-head biases packed along lanes; bias_ref: (1, 1, Q) additive pad bias.
    Q = r_ref.shape[0]
    D = r_ref.shape[1]
    Dh = D // nhead

    rows = lax.broadcasted_iota(jnp.int32, (Q, Q), 0)
    cols = lax.broadcasted_iota(jnp.int32, (Q, Q), 1)
    causal = cols > rows                 # == triu(ones, diagonal=1)
    pad_bias = bias_ref[0]               # (1, Q): 0 for valid keys, NEG_INF for padded keys

    dn = (((1,), (1,)), ((), ()))        # a @ b.T (contract the last dims)

    for h in range(nhead):
        lo, hi = h * Dh, (h + 1) * Dh
        qh = qkv_ref[0, :, lo:hi]                        # (Q, Dh)
        kh = qkv_ref[0, :, D + lo:D + hi]                # (Q, Dh)
        vh = qkv_ref[0, :, 2 * D + lo:2 * D + hi]        # (Q, Dh)
        rh = r_ref[:, lo:hi]                             # (Q, Dh)
        rwb = rwb_ref[:, lo:hi]                          # (1, Dh)
        rrb = rrb_ref[:, lo:hi]                          # (1, Dh)

        ac = lax.dot_general((qh + rwb) * scale, kh, dn,
                             preferred_element_type=jnp.float32)        # (Q, Q)
        bd_ref[...] = lax.dot_general((qh + rrb) * scale, rh, dn,
                                      preferred_element_type=jnp.float32)

        # In-VMEM Transformer-XL relative shift: shifted[i, j] = bd[i, j + (Q-1-i)] for j <= i;
        # the j > i region is circular-wrapped garbage removed by the causal mask below.
        # TODO(synk): for long Q replace this unrolled copy with a single
        #             pltpu.roll(bd, shift=1, axis=-1, stride=1, stride_axis=0).
        for i in range(Q):
            amt = Q - 1 - i
            if amt == 0:
                bds_ref[i:i + 1, :] = bd_ref[i:i + 1, :]
            else:
                bds_ref[i:i + 1, :Q - amt] = bd_ref[i:i + 1, amt:]
                bds_ref[i:i + 1, Q - amt:] = bd_ref[i:i + 1, :amt]

        s = ac + bds_ref[...] + pad_bias
        s = jnp.where(causal, NEG_INF, s)
        m = jnp.max(s, axis=-1, keepdims=True)
        p = jnp.exp(s - m)
        denom = jnp.sum(p, axis=-1, keepdims=True)
        pv = jnp.dot(p, vh, preferred_element_type=jnp.float32)          # (Q, Dh)
        o_ref[0, :, lo:hi] = pv * pl.reciprocal(denom, approx=True)


def xl_self_attention(qkv, r, rwb, rrb, pad_bias, nhead):
    B, Q, threeD = qkv.shape
    D = threeD // 3
    scale = 1.0 / math.sqrt(D // nhead)
    return pl.pallas_call(
        functools.partial(_xl_attn_kernel, nhead=nhead, scale=scale),
        grid=(B,),
        in_specs=[
            pl.BlockSpec((1, Q, 3 * D), lambda b: (b, 0, 0)),
            pl.BlockSpec((Q, D), lambda b: (0, 0)),
            pl.BlockSpec((1, D), lambda b: (0, 0)),
            pl.BlockSpec((1, D), lambda b: (0, 0)),
            pl.BlockSpec((1, 1, Q), lambda b: (b, 0, 0)),
        ],
        out_specs=pl.BlockSpec((1, Q, D), lambda b: (b, 0, 0)),
        out_shape=jax.ShapeDtypeStruct((B, Q, D), jnp.float32),
        scratch_shapes=[pltpu.VMEM((Q, Q), jnp.float32),
                        pltpu.VMEM((Q, Q), jnp.float32)],
        compiler_params=pltpu.CompilerParams(dimension_semantics=("parallel",)),
    )(qkv, r, rwb, rrb, pad_bias)


def _cross_attn_kernel(q_ref, kv_ref, o_ref, *, nhead, scale):
    # q_ref: (1, Q, D); kv_ref: (1, M, 2D) packed [k|v]; o_ref: (1, Q, D)
    D = q_ref.shape[-1]
    Dh = D // nhead
    dn = (((1,), (1,)), ((), ()))
    for h in range(nhead):
        lo, hi = h * Dh, (h + 1) * Dh
        qh = q_ref[0, :, lo:hi] * scale                  # (Q, Dh)
        kh = kv_ref[0, :, lo:hi]                         # (M, Dh)
        vh = kv_ref[0, :, D + lo:D + hi]                 # (M, Dh)
        s = lax.dot_general(qh, kh, dn, preferred_element_type=jnp.float32)  # (Q, M)
        m = jnp.max(s, axis=-1, keepdims=True)
        p = jnp.exp(s - m)
        denom = jnp.sum(p, axis=-1, keepdims=True)
        pv = jnp.dot(p, vh, preferred_element_type=jnp.float32)
        o_ref[0, :, lo:hi] = pv * pl.reciprocal(denom, approx=True)


def cross_attention_core(qp, kvp, nhead):
    # TODO(synk): memory_key_padding_mask is not plumbed (the reference call passes None here).
    B, Q, D = qp.shape
    Mm = kvp.shape[1]
    scale = (D // nhead) ** -0.5
    return pl.pallas_call(
        functools.partial(_cross_attn_kernel, nhead=nhead, scale=scale),
        grid=(B,),
        in_specs=[pl.BlockSpec((1, Q, D), lambda b: (b, 0, 0)),
                  pl.BlockSpec((1, Mm, 2 * D), lambda b: (b, 0, 0))],
        out_specs=pl.BlockSpec((1, Q, D), lambda b: (b, 0, 0)),
        out_shape=jax.ShapeDtypeStruct((B, Q, D), jnp.float32),
        compiler_params=pltpu.CompilerParams(dimension_semantics=("parallel",)),
    )(qp, kvp)


# ------------------------------------ glue (JAX) ------------------------------------ #

def self_attention_xl(x, pos_emb, pad_bias, p, nhead):
    """MaskedRelPartialLearnableMultiHeadAttn (post-norm, residual inside).
    x: (B, Q, D); pos_emb: (Q, D); pad_bias: (B, 1, Q) additive key-padding bias."""
    # TODO(synk): exact source of MaskedRelPartialLearnableMultiHeadAttn is not provided;
    # implemented as Transformer-XL RelPartialLearnableMultiHeadAttn + key padding mask.
    B, Q, D = x.shape
    x_flat = x.reshape(B * Q, D)
    qkv = linear(x_flat, p["qkv_w"]).reshape(B, Q, 3 * D)     # fused q/k/v proj, no bias
    r = linear(pos_emb, p["r_w"])                             # (Q, D) projected positions
    attn = xl_self_attention(qkv, r, p["r_w_bias"], p["r_r_bias"], pad_bias, nhead)
    # output projection + residual + LayerNorm fused into one kernel: LN(x + attn @ o_w)
    out = linear_residual_layernorm(attn.reshape(B * Q, D), p["o_w"], x_flat,
                                    p["ln_g"], p["ln_b"])
    return out.reshape(B, Q, D)


def decoder_layer(x, mem_flat, Mm, pos_emb, pad_bias, p, nhead):
    B, Q, D = x.shape
    # --- masked relative self-attention (residual + LN fused into its out-proj kernel)
    x = self_attention_xl(x, pos_emb, pad_bias, p["self_attn"], nhead)
    x_flat = x.reshape(B * Q, D)
    # --- cross attention over the encoder memory + residual + norm2
    cp = p["cross_attn"]
    qp = linear(x_flat, cp["q_w"], cp["q_b"]).reshape(B, Q, D)
    kvp = linear(mem_flat, cp["kv_w"], cp["kv_b"]).reshape(B, Mm, 2 * D)
    attn2 = cross_attention_core(qp, kvp, nhead)
    x_flat = linear_residual_layernorm(attn2.reshape(B * Q, D), cp["out_w"], x_flat,
                                       p["norm2_g"], p["norm2_b"], b=cp["out_b"])
    # --- feed-forward: relu(lin1) then (lin2 + residual + norm3) fused
    h = linear(x_flat, p["lin1_w"], p["lin1_b"], activation="relu")
    x_flat = linear_residual_layernorm(h, p["lin2_w"], x_flat,
                                       p["norm3_g"], p["norm3_b"], b=p["lin2_b"])
    return x_flat.reshape(B, Q, D)


def transformer_xl_decoder(tgt, memory, tgt_key_padding_mask, params, *, nhead, clamp_len):
    """tgt: (B, Q, D), memory: (B, M, D), tgt_key_padding_mask: bool (B, Q)."""
    tgt = tgt.astype(jnp.float32)
    memory = memory.astype(jnp.float32)
    B, Q, D = tgt.shape
    Mm = memory.shape[1]

    # additive key-padding bias (True == padded key == masked out); finite to avoid NaN rows
    pad_bias = jnp.where(tgt_key_padding_mask, NEG_INF, 0.0).astype(jnp.float32)
    pad_bias = pad_bias.reshape(B, 1, Q)

    # PositionalEmbedding(pos_seq = Q-1 .. 0, clamped at clamp_len)
    pos_seq = jnp.arange(Q - 1, -1, -1.0, dtype=jnp.float32)
    if clamp_len > 0:
        pos_seq = jnp.minimum(pos_seq, float(clamp_len))
    inv_freq = 1.0 / (10000.0 ** (jnp.arange(0, D, 2, dtype=jnp.float32) / D))
    sin_inp = pos_seq[:, None] * inv_freq[None, :]
    pos_emb = jnp.concatenate([jnp.sin(sin_inp), jnp.cos(sin_inp)], axis=-1)  # (Q, D)

    mem_flat = memory.reshape(B * Mm, D)
    out = tgt  # dropout == identity (eval)
    for layer_p in params["layers"]:
        out = decoder_layer(out, mem_flat, Mm, pos_emb, pad_bias, layer_p, nhead)

    out_flat = layernorm(out.reshape(B * Q, D), params["norm_g"], params["norm_b"])
    return out_flat.reshape(B, Q, D)


# ------------------------------ parameter construction ------------------------------ #

def init_params(key, d_model, nhead, dim_ff, num_layers):
    keys = iter(jax.random.split(key, num_layers * 16 + 2))

    def w(shape, scale=0.05):
        return jax.random.normal(next(keys), shape, jnp.float32) * scale

    layers = []
    for _ in range(num_layers):
        layers.append({
            "self_attn": {
                "qkv_w": w((d_model, 3 * d_model)),
                "r_w": w((d_model, d_model)),
                "o_w": w((d_model, d_model)),
                "r_w_bias": w((1, d_model)),      # (H, Dh) packed along lanes
                "r_r_bias": w((1, d_model)),
                "ln_g": jnp.ones((d_model,), jnp.float32),
                "ln_b": jnp.zeros((d_model,), jnp.float32),
            },
            "cross_attn": {
                "q_w": w((d_model, d_model)), "q_b": jnp.zeros((d_model,), jnp.float32),
                "kv_w": w((d_model, 2 * d_model)),            # fused [k_w | v_w]
                "kv_b": jnp.zeros((2 * d_model,), jnp.float32),
                "out_w": w((d_model, d_model)), "out_b": jnp.zeros((d_model,), jnp.float32),
            },
            "lin1_w": w((d_model, dim_ff)), "lin1_b": jnp.zeros((dim_ff,), jnp.float32),
            "lin2_w": w((dim_ff, d_model)), "lin2_b": jnp.zeros((d_model,), jnp.float32),
            "norm2_g": jnp.ones((d_model,), jnp.float32),
            "norm2_b": jnp.zeros((d_model,), jnp.float32),
            "norm3_g": jnp.ones((d_model,), jnp.float32),
            "norm3_b": jnp.zeros((d_model,), jnp.float32),
        })
    return {
        "layers": layers,
        "norm_g": jnp.ones((d_model,), jnp.float32),
        "norm_b": jnp.zeros((d_model,), jnp.float32),
    }


# ----------------------------------------- main ----------------------------------------- #

if __name__ == "__main__":
    B, Q, M_MEM = 2, 8, 12
    D_MODEL, NHEAD, DIM_FF, NUM_LAYERS, CLAMP_LEN = 32, 4, 64, 2, 50

    key = jax.random.PRNGKey(0)
    k1, k2, k3 = jax.random.split(key, 3)
    tgt = jax.random.normal(k1, (B, Q, D_MODEL), jnp.float32)
    memory = jax.random.normal(k2, (B, M_MEM, D_MODEL), jnp.float32)
    tgt_key_padding_mask = jnp.zeros((B, Q), dtype=bool)  # no padded positions

    params = init_params(k3, D_MODEL, NHEAD, DIM_FF, NUM_LAYERS)

    fwd = jax.jit(functools.partial(transformer_xl_decoder,
                                    nhead=NHEAD, clamp_len=CLAMP_LEN))
    out = fwd(tgt, memory, tgt_key_padding_mask, params)
    out = jax.block_until_ready(out)

    assert out.shape == (B, Q, D_MODEL)
    assert bool(jnp.all(jnp.isfinite(out)))
    print("KERNEL_OK")
</pallas_src>

<mosaic_0001>
module attributes {stable_mosaic.version = 11 : i64} {
  func.func @_matmul_kernel(%arg0: i32, %arg1: i32, %arg2: i32, %arg3: memref<16x32xf32, #tpu.memory_space<vmem>>, %arg4: memref<32x96xf32, #tpu.memory_space<vmem>>, %arg5: memref<16x96xf32, #tpu.memory_space<vmem>>, %arg6: memref<16x96xf32, #tpu.memory_space<vmem>>) attributes {dimension_semantics = [#tpu.dimension_semantics<parallel>, #tpu.dimension_semantics<parallel>, #tpu.dimension_semantics<arbitrary>], iteration_bounds = array<i64: 1, 1, 1>, scalar_prefetch = 0 : i64, scratch_operands = 1 : i64, tpu.core_type = #tpu.core_type<tc>, window_params = [{transform_indices = @transform_0, window_bounds = array<i64: 16, 32>}, {transform_indices = @transform_1, window_bounds = array<i64: 32, 96>}, {transform_indices = @transform_2, window_bounds = array<i64: 16, 96>}]} {
    %c0_i32 = arith.constant 0 : i32
    %0 = arith.cmpi eq, %arg2, %c0_i32 : i32
    %1 = arith.extui %0 : i1 to i32
    %c0_i32_0 = arith.constant 0 : i32
    %2 = arith.cmpi ne, %1, %c0_i32_0 : i32
    scf.if %2 {
      %cst_10 = arith.constant 0.000000e+00 : f32
      %12 = vector.broadcast %cst_10 : f32 to vector<16x96xf32>
      %c0_11 = arith.constant 0 : index
      %c0_12 = arith.constant 0 : index
      %13 = vector.load %arg6[%c0_11, %c0_12] : memref<16x96xf32, #tpu.memory_space<vmem>>, vector<16x96xf32>
      tpu.vector_store %arg6[%c0_11, %c0_12], %12 {strides = array<i32>} : memref<16x96xf32, #tpu.memory_space<vmem>>, vector<16x96xf32>,
    } else {
    }
    %c0 = arith.constant 0 : index
    %c0_1 = arith.constant 0 : index
    %3 = vector.load %arg6[%c0, %c0_1] : memref<16x96xf32, #tpu.memory_space<vmem>>, vector<16x96xf32>
    %c0_2 = arith.constant 0 : index
    %c0_3 = arith.constant 0 : index
    %4 = vector.load %arg3[%c0_2, %c0_3] : memref<16x32xf32, #tpu.memory_space<vmem>>, vector<16x32xf32>
    %c0_4 = arith.constant 0 : index
    %c0_5 = arith.constant 0 : index
    %5 = vector.load %arg4[%c0_4, %c0_5] : memref<32x96xf32, #tpu.memory_space<vmem>>, vector<32x96xf32>
    %cst = arith.constant dense<0.000000e+00> : vector<16x96xf32>
    %6 = tpu.matmul %4, %5, %cst {dimension_numbers = #tpu.dot_dimension_numbers<[1], [0], [0], [1], [0, 0, 1, 1], [], []>} : vector<16x32xf32>, vector<32x96xf32>, vector<16x96xf32> -> vector<16x96xf32>
    %7 = arith.addf %3, %6 : vector<16x96xf32>
    %c0_6 = arith.constant 0 : index
    %c0_7 = arith.constant 0 : index
    %8 = vector.load %arg6[%c0_6, %c0_7] : memref<16x96xf32, #tpu.memory_space<vmem>>, vector<16x96xf32>
    tpu.vector_store %arg6[%c0_6, %c0_7], %7 {strides = array<i32>} : memref<16x96xf32, #tpu.memory_space<vmem>>, vector<16x96xf32>,
    %c0_i32_8 = arith.constant 0 : i32
    %9 = arith.cmpi eq, %arg2, %c0_i32_8 : i32
    %10 = arith.extui %9 : i1 to i32
    %c0_i32_9 = arith.constant 0 : i32
    %11 = arith.cmpi ne, %10, %c0_i32_9 : i32
    scf.if %11 {
      %c0_10 = arith.constant 0 : index
      %c0_11 = arith.constant 0 : index
      %12 = vector.load %arg6[%c0_10, %c0_11] : memref<16x96xf32, #tpu.memory_space<vmem>>, vector<16x96xf32>
      %c0_12 = arith.constant 0 : index
      %c0_13 = arith.constant 0 : index
      %13 = vector.load %arg5[%c0_12, %c0_13] : memref<16x96xf32, #tpu.memory_space<vmem>>, vector<16x96xf32>
      tpu.vector_store %arg5[%c0_12, %c0_13], %12 {strides = array<i32>} : memref<16x96xf32, #tpu.memory_space<vmem>>, vector<16x96xf32>,
    } else {
    }
    return
  }
  func.func @transform_0(%arg0: i32, %arg1: i32, %arg2: i32) -> (i32, i32) {
    %c0_i32 = arith.constant 0 : i32
    return %arg0, %arg2 : i32, i32
  }
  func.func @transform_1(%arg0: i32, %arg1: i32, %arg2: i32) -> (i32, i32) {
    %c0_i32 = arith.constant 0 : i32
    return %arg2, %arg1 : i32, i32
  }
  func.func @transform_2(%arg0: i32, %arg1: i32, %arg2: i32) -> (i32, i32) {
    %c0_i32 = arith.constant 0 : i32
    return %arg0, %arg1 : i32, i32
  }
}

module attributes {stable_mosaic.version = 11 : i64} {
  func.func @_matmul_kernel(%arg0: i32, %arg1: i32, %arg2: i32, %arg3: memref<8x32xf32, #tpu.memory_space<vmem>>, %arg4: memref<32x32xf32, #tpu.memory_space<vmem>>, %arg5: memref<8x32xf32, #tpu.memory_space<vmem>>, %arg6: memref<8x32xf32, #tpu.memory_space<vmem>>) attributes {dimension_semantics = [#tpu.dimension_semantics<parallel>, #tpu.dimension_semantics<parallel>, #tpu.dimension_semantics<arbitrary>], iteration_bounds = array<i64: 1, 1, 1>, scalar_prefetch = 0 : i64, scratch_operands = 1 : i64, tpu.core_type = #tpu.core_type<tc>, window_params = [{transform_indices = @transform_0, window_bounds = array<i64: 8, 32>}, {transform_indices = @transform_1, window_bounds = array<i64: 32, 32>}, {transform_indices = @transform_2, window_bounds = array<i64: 8, 32>}]} {
    %c0_i32 = arith.constant 0 : i32
    %0 = arith.cmpi eq, %arg2, %c0_i32 : i32
    %1 = arith.extui %0 : i1 to i32
    %c0_i32_0 = arith.constant 0 : i32
    %2 = arith.cmpi ne, %1, %c0_i32_0 : i32
    scf.if %2 {
      %cst_10 = arith.constant 0.000000e+00 : f32
      %12 = vector.broadcast %cst_10 : f32 to vector<8x32xf32>
      %c0_11 = arith.constant 0 : index
      %c0_12 = arith.constant 0 : index
      %13 = vector.load %arg6[%c0_11, %c0_12] : memref<8x32xf32, #tpu.memory_space<vmem>>, vector<8x32xf32>
      tpu.vector_store %arg6[%c0_11, %c0_12], %12 {strides = array<i32>} : memref<8x32xf32, #tpu.memory_space<vmem>>, vector<8x32xf32>,
    } else {
    }
    %c0 = arith.constant 0 : index
    %c0_1 = arith.constant 0 : index
    %3 = vector.load %arg6[%c0, %c0_1] : memref<8x32xf32, #tpu.memory_space<vmem>>, vector<8x32xf32>
    %c0_2 = arith.constant 0 : index
    %c0_3 = arith.constant 0 : index
    %4 = vector.load %arg3[%c0_2, %c0_3] : memref<8x32xf32, #tpu.memory_space<vmem>>, vector<8x32xf32>
    %c0_4 = arith.constant 0 : index
    %c0_5 = arith.constant 0 : index
    %5 = vector.load %arg4[%c0_4, %c0_5] : memref<32x32xf32, #tpu.memory_space<vmem>>, vector<32x32xf32>
    %cst = arith.constant dense<0.000000e+00> : vector<8x32xf32>
    %6 = tpu.matmul %4, %5, %cst {dimension_numbers = #tpu.dot_dimension_numbers<[1], [0], [0], [1], [0, 0, 1, 1], [], []>} : vector<8x32xf32>, vector<32x32xf32>, vector<8x32xf32> -> vector<8x32xf32>
    %7 = arith.addf %3, %6 : vector<8x32xf32>
    %c0_6 = arith.constant 0 : index
    %c0_7 = arith.constant 0 : index
    %8 = vector.load %arg6[%c0_6, %c0_7] : memref<8x32xf32, #tpu.memory_space<vmem>>, vector<8x32xf32>
    tpu.vector_store %arg6[%c0_6, %c0_7], %7 {strides = array<i32>} : memref<8x32xf32, #tpu.memory_space<vmem>>, vector<8x32xf32>,
    %c0_i32_8 = arith.constant 0 : i32
    %9 = arith.cmpi eq, %arg2, %c0_i32_8 : i32
    %10 = arith.extui %9 : i1 to i32
    %c0_i32_9 = arith.constant 0 : i32
    %11 = arith.cmpi ne, %10, %c0_i32_9 : i32
    scf.if %11 {
      %c0_10 = arith.constant 0 : index
      %c0_11 = arith.constant 0 : index
      %12 = vector.load %arg6[%c0_10, %c0_11] : memref<8x32xf32, #tpu.memory_space<vmem>>, vector<8x32xf32>
      %c0_12 = arith.constant 0 : index
      %c0_13 = arith.constant 0 : index
      %13 = vector.load %arg5[%c0_12, %c0_13] : memref<8x32xf32, #tpu.memory_space<vmem>>, vector<8x32xf32>
      tpu.vector_store %arg5[%c0_12, %c0_13], %12 {strides = array<i32>} : memref<8x32xf32, #tpu.memory_space<vmem>>, vector<8x32xf32>,
    } else {
    }
    return
  }
  func.func @transform_0(%arg0: i32, %arg1: i32, %arg2: i32) -> (i32, i32) {
    %c0_i32 = arith.constant 0 : i32
    return %arg0, %arg2 : i32, i32
  }
  func.func @transform_1(%arg0: i32, %arg1: i32, %arg2: i32) -> (i32, i32) {
    %c0_i32 = arith.constant 0 : i32
    return %arg2, %arg1 : i32, i32
  }
  func.func @transform_2(%arg0: i32, %arg1: i32, %arg2: i32) -> (i32, i32) {
    %c0_i32 = arith.constant 0 : i32
    return %arg0, %arg1 : i32, i32
  }
}

module attributes {stable_mosaic.version = 11 : i64} {
  func.func @_matmul_res_ln_kernel(%arg0: i32, %arg1: i32, %arg2: memref<16x32xf32, #tpu.memory_space<vmem>>, %arg3: memref<32x32xf32, #tpu.memory_space<vmem>>, %arg4: memref<16x32xf32, #tpu.memory_space<vmem>>, %arg5: memref<1x32xf32, #tpu.memory_space<vmem>>, %arg6: memref<1x32xf32, #tpu.memory_space<vmem>>, %arg7: memref<16x32xf32, #tpu.memory_space<vmem>>, %arg8: memref<16x32xf32, #tpu.memory_space<vmem>>) attributes {dimension_semantics = [#tpu.dimension_semantics<parallel>, #tpu.dimension_semantics<arbitrary>], iteration_bounds = array<i64: 1, 1>, scalar_prefetch = 0 : i64, scratch_operands = 1 : i64, tpu.core_type = #tpu.core_type<tc>, window_params = [{transform_indices = @transform_0, window_bounds = array<i64: 16, 32>}, {transform_indices = @transform_1, window_bounds = array<i64: 32, 32>}, {transform_indices = @transform_2, window_bounds = array<i64: 16, 32>}, {pipeline_mode = #tpu.pipeline_mode<synchronous>, transform_indices = @transform_3, window_bounds = array<i64: 1, 32>}, {pipeline_mode = #tpu.pipeline_mode<synchronous>, transform_indices = @transform_4, window_bounds = array<i64: 1, 32>}, {transform_indices = @transform_5, window_bounds = array<i64: 16, 32>}]} {
    %c0_i32 = arith.constant 0 : i32
    %0 = arith.cmpi eq, %arg1, %c0_i32 : i32
    %1 = arith.extui %0 : i1 to i32
    %c0_i32_0 = arith.constant 0 : i32
    %2 = arith.cmpi ne, %1, %c0_i32_0 : i32
    scf.if %2 {
      %cst_10 = arith.constant 0.000000e+00 : f32
      %12 = vector.broadcast %cst_10 : f32 to vector<16x32xf32>
      %c0_11 = arith.constant 0 : index
      %c0_12 = arith.constant 0 : index
      %13 = vector.load %arg8[%c0_11, %c0_12] : memref<16x32xf32, #tpu.memory_space<vmem>>, vector<16x32xf32>
      tpu.vector_store %arg8[%c0_11, %c0_12], %12 {strides = array<i32>} : memref<16x32xf32, #tpu.memory_space<vmem>>, vector<16x32xf32>,
    } else {
    }
    %c0 = arith.constant 0 : index
    %c0_1 = arith.constant 0 : index
    %3 = vector.load %arg8[%c0, %c0_1] : memref<16x32xf32, #tpu.memory_space<vmem>>, vector<16x32xf32>
    %c0_2 = arith.constant 0 : index
    %c0_3 = arith.constant 0 : index
    %4 = vector.load %arg2[%c0_2, %c0_3] : memref<16x32xf32, #tpu.memory_space<vmem>>, vector<16x32xf32>
    %c0_4 = arith.constant 0 : index
    %c0_5 = arith.constant 0 : index
    %5 = vector.load %arg3[%c0_4, %c0_5] : memref<32x32xf32, #tpu.memory_space<vmem>>, vector<32x32xf32>
    %cst = arith.constant dense<0.000000e+00> : vector<16x32xf32>
    %6 = tpu.matmul %4, %5, %cst {dimension_numbers = #tpu.dot_dimension_numbers<[1], [0], [0], [1], [0, 0, 1, 1], [], []>} : vector<16x32xf32>, vector<32x32xf32>, vector<16x32xf32> -> vector<16x32xf32>
    %7 = arith.addf %3, %6 : vector<16x32xf32>
    %c0_6 = arith.constant 0 : index
    %c0_7 = arith.constant 0 : index
    %8 = vector.load %arg8[%c0_6, %c0_7] : memref<16x32xf32, #tpu.memory_space<vmem>>, vector<16x32xf32>
    tpu.vector_store %arg8[%c0_6, %c0_7], %7 {strides = array<i32>} : memref<16x32xf32, #tpu.memory_space<vmem>>, vector<16x32xf32>,
    %c0_i32_8 = arith.constant 0 : i32
    %9 = arith.cmpi eq, %arg1, %c0_i32_8 : i32
    %10 = arith.extui %9 : i1 to i32
    %c0_i32_9 = arith.constant 0 : i32
    %11 = arith.cmpi ne, %10, %c0_i32_9 : i32
    scf.if %11 {
      %c0_10 = arith.constant 0 : index
      %c0_11 = arith.constant 0 : index
      %12 = vector.load %arg8[%c0_10, %c0_11] : memref<16x32xf32, #tpu.memory_space<vmem>>, vector<16x32xf32>
      %c0_12 = arith.constant 0 : index
      %c0_13 = arith.constant 0 : index
      %13 = vector.load %arg4[%c0_12, %c0_13] : memref<16x32xf32, #tpu.memory_space<vmem>>, vector<16x32xf32>
      %14 = arith.addf %13, %12 : vector<16x32xf32>
      %cst_14 = arith.constant dense<0.000000e+00> : vector<16xf32>
      %15 = vector.multi_reduction <add>, %14, %cst_14 [1] : vector<16x32xf32> to vector<16xf32>
      %16 = vector.shape_cast %15 : vector<16xf32> to vector<16x1xf32>
      %cst_15 = arith.constant 3.200000e+01 : f32
      %17 = vector.broadcast %cst_15 : f32 to vector<16x1xf32>
      %18 = arith.divf %16, %17 : vector<16x1xf32>
      %19 = vector.broadcast %18 : vector<16x1xf32> to vector<16x32xf32>
      %20 = arith.subf %14, %19 : vector<16x32xf32>
      %21 = arith.mulf %20, %20 : vector<16x32xf32>
      %cst_16 = arith.constant dense<0.000000e+00> : vector<16xf32>
      %22 = vector.multi_reduction <add>, %21, %cst_16 [1] : vector<16x32xf32> to vector<16xf32>
      %23 = vector.shape_cast %22 : vector<16xf32> to vector<16x1xf32>
      %cst_17 = arith.constant 3.200000e+01 : f32
      %24 = vector.broadcast %cst_17 : f32 to vector<16x1xf32>
      %25 = arith.divf %23, %24 : vector<16x1xf32>
      %cst_18 = arith.constant 9.99999974E-6 : f32
      %26 = vector.broadcast %cst_18 : f32 to vector<16x1xf32>
      %27 = arith.addf %25, %26 : vector<16x1xf32>
      %28 = math.rsqrt %27 : vector<16x1xf32>
      %29 = vector.broadcast %28 : vector<16x1xf32> to vector<16x32xf32>
      %30 = arith.mulf %20, %29 : vector<16x32xf32>
      %c0_19 = arith.constant 0 : index
      %c0_20 = arith.constant 0 : index
      %31 = vector.load %arg5[%c0_19, %c0_20] : memref<1x32xf32, #tpu.memory_space<vmem>>, vector<1x32xf32>
      %32 = vector.broadcast %31 : vector<1x32xf32> to vector<16x32xf32>
      %33 = arith.mulf %30, %32 : vector<16x32xf32>
      %c0_21 = arith.constant 0 : index
      %c0_22 = arith.constant 0 : index
      %34 = vector.load %arg6[%c0_21, %c0_22] : memref<1x32xf32, #tpu.memory_space<vmem>>, vector<1x32xf32>
      %35 = vector.broadcast %34 : vector<1x32xf32> to vector<16x32xf32>
      %36 = arith.addf %33, %35 : vector<16x32xf32>
      %c0_23 = arith.constant 0 : index
      %c0_24 = arith.constant 0 : index
      %37 = vector.load %arg7[%c0_23, %c0_24] : memref<16x32xf32, #tpu.memory_space<vmem>>, vector<16x32xf32>
      tpu.vector_store %arg7[%c0_23, %c0_24], %36 {strides = array<i32>} : memref<16x32xf32, #tpu.memory_space<vmem>>, vector<16x32xf32>,
    } else {
    }
    return
  }
  func.func @transform_0(%arg0: i32, %arg1: i32) -> (i32, i32) {
    %c0_i32 = arith.constant 0 : i32
    return %arg0, %arg1 : i32, i32
  }
  func.func @transform_1(%arg0: i32, %arg1: i32) -> (i32, i32) {
    %c0_i32 = arith.constant 0 : i32
    %c0_i32_0 = arith.constant 0 : i32
    return %arg1, %c0_i32 : i32, i32
  }
  func.func @transform_2(%arg0: i32, %arg1: i32) -> (i32, i32) {
    %c0_i32 = arith.constant 0 : i32
    %c0_i32_0 = arith.constant 0 : i32
    return %arg0, %c0_i32 : i32, i32
  }
  func.func @transform_3(%arg0: i32, %arg1: i32) -> (i32, i32) {
    %c0_i32 = arith.constant 0 : i32
    %c0_i32_0 = arith.constant 0 : i32
    %c0_i32_1 = arith.constant 0 : i32
    return %c0_i32, %c0_i32_0 : i32, i32
  }
  func.func @transform_4(%arg0: i32, %arg1: i32) -> (i32, i32) {
    %c0_i32 = arith.constant 0 : i32
    %c0_i32_0 = arith.constant 0 : i32
    %c0_i32_1 = arith.constant 0 : i32
    return %c0_i32, %c0_i32_0 : i32, i32
  }
  func.func @transform_5(%arg0: i32, %arg1: i32) -> (i32, i32) {
    %c0_i32 = arith.constant 0 : i32
    %c0_i32_0 = arith.constant 0 : i32
    return %arg0, %c0_i32 : i32, i32
  }
}

module attributes {stable_mosaic.version = 11 : i64} {
  func.func @_xl_attn_kernel(%arg0: i32, %arg1: memref<1x8x96xf32, #tpu.memory_space<vmem>>, %arg2: memref<8x32xf32, #tpu.memory_space<vmem>>, %arg3: memref<1x32xf32, #tpu.memory_space<vmem>>, %arg4: memref<1x32xf32, #tpu.memory_space<vmem>>, %arg5: memref<1x1x8xf32, #tpu.memory_space<vmem>>, %arg6: memref<1x8x32xf32, #tpu.memory_space<vmem>>, %arg7: memref<8x8xf32, #tpu.memory_space<vmem>>, %arg8: memref<8x8xf32, #tpu.memory_space<vmem>>) attributes {dimension_semantics = [#tpu.dimension_semantics<parallel>], iteration_bounds = array<i64: 2>, scalar_prefetch = 0 : i64, scratch_operands = 2 : i64, tpu.core_type = #tpu.core_type<tc>, window_params = [{transform_indices = @transform_0, window_bounds = array<i64: 1, 8, 96>}, {pipeline_mode = #tpu.pipeline_mode<synchronous>, transform_indices = @transform_1, window_bounds = array<i64: 8, 32>}, {pipeline_mode = #tpu.pipeline_mode<synchronous>, transform_indices = @transform_2, window_bounds = array<i64: 1, 32>}, {pipeline_mode = #tpu.pipeline_mode<synchronous>, transform_indices = @transform_3, window_bounds = array<i64: 1, 32>}, {transform_indices = @transform_4, window_bounds = array<i64: 1, 1, 8>}, {transform_indices = @transform_5, window_bounds = array<i64: 1, 8, 32>}]} {
    %0 = tpu.iota {dimensions = array<i32: 0>} : vector<8x8xi32>
    %1 = tpu.iota {dimensions = array<i32: 1>} : vector<8x8xi32>
    %2 = arith.cmpi sgt, %1, %0 : vector<8x8xi32>
    %c0 = arith.constant 0 : index
    %c0_0 = arith.constant 0 : index
    %c0_1 = arith.constant 0 : index
    %3 = vector.load %arg5[%c0, %c0_0, %c0_1] : memref<1x1x8xf32, #tpu.memory_space<vmem>>, vector<1x1x8xf32>
    %4 = vector.shape_cast %3 : vector<1x1x8xf32> to vector<1x8xf32>
    %c0_2 = arith.constant 0 : index
    %c0_3 = arith.constant 0 : index
    %c0_4 = arith.constant 0 : index
    %5 = vector.load %arg1[%c0_2, %c0_3, %c0_4] : memref<1x8x96xf32, #tpu.memory_space<vmem>>, vector<1x8x8xf32>
    %6 = vector.shape_cast %5 : vector<1x8x8xf32> to vector<8x8xf32>
    %c0_5 = arith.constant 0 : index
    %c0_6 = arith.constant 0 : index
    %c32 = arith.constant 32 : index
    %7 = vector.load %arg1[%c0_5, %c0_6, %c32] : memref<1x8x96xf32, #tpu.memory_space<vmem>>, vector<1x8x8xf32>
    %8 = vector.shape_cast %7 : vector<1x8x8xf32> to vector<8x8xf32>
    %c0_7 = arith.constant 0 : index
    %c0_8 = arith.constant 0 : index
    %c64 = arith.constant 64 : index
    %9 = vector.load %arg1[%c0_7, %c0_8, %c64] : memref<1x8x96xf32, #tpu.memory_space<vmem>>, vector<1x8x8xf32>
    %10 = vector.shape_cast %9 : vector<1x8x8xf32> to vector<8x8xf32>
    %c0_9 = arith.constant 0 : index
    %c0_10 = arith.constant 0 : index
    %11 = vector.load %arg2[%c0_9, %c0_10] : memref<8x32xf32, #tpu.memory_space<vmem>>, vector<8x8xf32>
    %c0_11 = arith.constant 0 : index
    %c0_12 = arith.constant 0 : index
    %12 = vector.load %arg3[%c0_11, %c0_12] : memref<1x32xf32, #tpu.memory_space<vmem>>, vector<1x8xf32>
    %c0_13 = arith.constant 0 : index
    %c0_14 = arith.constant 0 : index
    %13 = vector.load %arg4[%c0_13, %c0_14] : memref<1x32xf32, #tpu.memory_space<vmem>>, vector<1x8xf32>
    %14 = vector.broadcast %12 : vector<1x8xf32> to vector<8x8xf32>
    %15 = arith.addf %6, %14 : vector<8x8xf32>
    %cst = arith.constant 0.353553385 : f32
    %16 = vector.broadcast %cst : f32 to vector<8x8xf32>
    %17 = arith.mulf %15, %16 : vector<8x8xf32>
    %cst_15 = arith.constant dense<0.000000e+00> : vector<8x8xf32>
    %18 = tpu.matmul %17, %8, %cst_15 {dimension_numbers = #tpu.dot_dimension_numbers<[1], [1], [0], [0], [0, 0, 1, 0], [], []>} : vector<8x8xf32>, vector<8x8xf32>, vector<8x8xf32> -> vector<8x8xf32>
    %19 = vector.broadcast %13 : vector<1x8xf32> to vector<8x8xf32>
    %20 = arith.addf %6, %19 : vector<8x8xf32>
    %cst_16 = arith.constant 0.353553385 : f32
    %21 = vector.broadcast %cst_16 : f32 to vector<8x8xf32>
    %22 = arith.mulf %20, %21 : vector<8x8xf32>
    %cst_17 = arith.constant dense<0.000000e+00> : vector<8x8xf32>
    %23 = tpu.matmul %22, %11, %cst_17 {dimension_numbers = #tpu.dot_dimension_numbers<[1], [1], [0], [0], [0, 0, 1, 0], [], []>} : vector<8x8xf32>, vector<8x8xf32>, vector<8x8xf32> -> vector<8x8xf32>
    %c0_18 = arith.constant 0 : index
    %c0_19 = arith.constant 0 : index
    %24 = vector.load %arg7[%c0_18, %c0_19] : memref<8x8xf32, #tpu.memory_space<vmem>>, vector<8x8xf32>
    tpu.vector_store %arg7[%c0_18, %c0_19], %23 {strides = array<i32>} : memref<8x8xf32, #tpu.memory_space<vmem>>, vector<8x8xf32>,
    %c0_20 = arith.constant 0 : index
    %c7 = arith.constant 7 : index
    %25 = vector.load %arg7[%c0_20, %c7] : memref<8x8xf32, #tpu.memory_space<vmem>>, vector<1x1xf32>
    %c0_21 = arith.constant 0 : index
    %c0_22 = arith.constant 0 : index
    %26 = vector.load %arg8[%c0_21, %c0_22] : memref<8x8xf32, #tpu.memory_space<vmem>>, vector<1x1xf32>
    tpu.vector_store %arg8[%c0_21, %c0_22], %25 {strides = array<i32>} : memref<8x8xf32, #tpu.memory_space<vmem>>, vector<1x1xf32>,
    %c0_23 = arith.constant 0 : index
    %c0_24 = arith.constant 0 : index
    %27 = vector.load %arg7[%c0_23, %c0_24] : memref<8x8xf32, #tpu.memory_space<vmem>>, vector<1x7xf32>
    %c0_25 = arith.constant 0 : index
    %c1 = arith.constant 1 : index
    %28 = vector.load %arg8[%c0_25, %c1] : memref<8x8xf32, #tpu.memory_space<vmem>>, vector<1x7xf32>
    tpu.vector_store %arg8[%c0_25, %c1], %27 {strides = array<i32>} : memref<8x8xf32, #tpu.memory_space<vmem>>, vector<1x7xf32>,
    %c1_26 = arith.constant 1 : index
    %c6 = arith.constant 6 : index
    %29 = vector.load %arg7[%c1_26, %c6] : memref<8x8xf32, #tpu.memory_space<vmem>>, vector<1x2xf32>
    %c1_27 = arith.constant 1 : index
    %c0_28 = arith.constant 0 : index
    %30 = vector.load %arg8[%c1_27, %c0_28] : memref<8x8xf32, #tpu.memory_space<vmem>>, vector<1x2xf32>
    tpu.vector_store %arg8[%c1_27, %c0_28], %29 {strides = array<i32>} : memref<8x8xf32, #tpu.memory_space<vmem>>, vector<1x2xf32>,
    %c1_29 = arith.constant 1 : index
    %c0_30 = arith.constant 0 : index
    %31 = vector.load %arg7[%c1_29, %c0_30] : memref<8x8xf32, #tpu.memory_space<vmem>>, vector<1x6xf32>
    %c1_31 = arith.constant 1 : index
    %c2 = arith.constant 2 : index
    %32 = vector.load %arg8[%c1_31, %c2] : memref<8x8xf32, #tpu.memory_space<vmem>>, vector<1x6xf32>
    tpu.vector_store %arg8[%c1_31, %c2], %31 {strides = array<i32>} : memref<8x8xf32, #tpu.memory_space<vmem>>, vector<1x6xf32>,
    %c2_32 = arith.constant 2 : index
    %c5 = arith.constant 5 : index
    %33 = vector.load %arg7[%c2_32, %c5] : memref<8x8xf32, #tpu.memory_space<vmem>>, vector<1x3xf32>
    %c2_33 = arith.constant 2 : index
    %c0_34 = arith.constant 0 : index
    %34 = vector.load %arg8[%c2_33, %c0_34] : memref<8x8xf32, #tpu.memory_space<vmem>>, vector<1x3xf32>
    tpu.vector_store %arg8[%c2_33, %c0_34], %33 {strides = array<i32>} : memref<8x8xf32, #tpu.memory_space<vmem>>, vector<1x3xf32>,
    %c2_35 = arith.constant 2 : index
    %c0_36 = arith.constant 0 : index
    %35 = vector.load %arg7[%c2_35, %c0_36] : memref<8x8xf32, #tpu.memory_space<vmem>>, vector<1x5xf32>
    %c2_37 = arith.constant 2 : index
    %c3 = arith.constant 3 : index
    %36 = vector.load %arg8[%c2_37, %c3] : memref<8x8xf32, #tpu.memory_space<vmem>>, vector<1x5xf32>
    tpu.vector_store %arg8[%c2_37, %c3], %35 {strides = array<i32>} : memref<8x8xf32, #tpu.memory_space<vmem>>, vector<1x5xf32>,
    %c3_38 = arith.constant 3 : index
    %c4 = arith.constant 4 : index
    %37 = vector.load %arg7[%c3_38, %c4] : memref<8x8xf32, #tpu.memory_space<vmem>>, vector<1x4xf32>
    %c3_39 = arith.constant 3 : index
    %c0_40 = arith.constant 0 : index
    %38 = vector.load %arg8[%c3_39, %c0_40] : memref<8x8xf32, #tpu.memory_space<vmem>>, vector<1x4xf32>
    tpu.vector_store %arg8[%c3_39, %c0_40], %37 {strides = array<i32>} : memref<8x8xf32, #tpu.memory_space<vmem>>, vector<1x4xf32>,
    %c3_41 = arith.constant 3 : index
    %c0_42 = arith.constant 0 : index
    %39 = vector.load %arg7[%c3_41, %c0_42] : memref<8x8xf32, #tpu.memory_space<vmem>>, vector<1x4xf32>
    %c3_43 = arith.constant 3 : index
    %c4_44 = arith.constant 4 : index
    %40 = vector.load %arg8[%c3_43, %c4_44] : memref<8x8xf32, #tpu.memory_space<vmem>>, vector<1x4xf32>
    tpu.vector_store %arg8[%c3_43, %c4_44], %39 {strides = array<i32>} : memref<8x8xf32, #tpu.memory_space<vmem>>, vector<1x4xf32>,
    %c4_45 = arith.constant 4 : index
    %c3_46 = arith.constant 3 : index
    %41 = vector.load %arg7[%c4_45, %c3_46] : memref<8x8xf32, #tpu.memory_space<vmem>>, vector<1x5xf32>
    %c4_47 = arith.constant 4 : index
    %c0_48 = arith.constant 0 : index
    %42 = vector.load %arg8[%c4_47, %c0_48] : memref<8x8xf32, #tpu.memory_space<vmem>>, vector<1x5xf32>
    tpu.vector_store %arg8[%c4_47, %c0_48], %41 {strides = array<i32>} : memref<8x8xf32, #tpu.memory_space<vmem>>, vector<1x5xf32>,
    %c4_49 = arith.constant 4 : index
    %c0_50 = arith.constant 0 : index
    %43 = vector.load %arg7[%c4_49, %c0_50] : memref<8x8xf32, #tpu.memory_space<vmem>>, vector<1x3xf32>
    %c4_51 = arith.constant 4 : index
    %c5_52 = arith.constant 5 : index
    %44 = vector.load %arg8[%c4_51, %c5_52] : memref<8x8xf32, #tpu.memory_space<vmem>>, vector<1x3xf32>
    tpu.vector_store %arg8[%c4_51, %c5_52], %43 {strides = array<i32>} : memref<8x8xf32, #tpu.memory_space<vmem>>, vector<1x3xf32>,
    %c5_53 = arith.constant 5 : index
    %c2_54 = arith.constant 2 : index
    %45 = vector.load %arg7[%c5_53, %c2_54] : memref<8x8xf32, #tpu.memory_space<vmem>>, vector<1x6xf32>
    %c5_55 = arith.constant 5 : index
    %c0_56 = arith.constant 0 : index
    %46 = vector.load %arg8[%c5_55, %c0_56] : memref<8x8xf32, #tpu.memory_space<vmem>>, vector<1x6xf32>
    tpu.vector_store %arg8[%c5_55, %c0_56], %45 {strides = array<i32>} : memref<8x8xf32, #tpu.memory_space<vmem>>, vector<1x6xf32>,
    %c5_57 = arith.constant 5 : index
    %c0_58 = arith.constant 0 : index
    %47 = vector.load %arg7[%c5_57, %c0_58] : memref<8x8xf32, #tpu.memory_space<vmem>>, vector<1x2xf32>
    %c5_59 = arith.constant 5 : index
    %c6_60 = arith.constant 6 : index
    %48 = vector.load %arg8[%c5_59, %c6_60] : memref<8x8xf32, #tpu.memory_space<vmem>>, vector<1x2xf32>
    tpu.vector_store %arg8[%c5_59, %c6_60], %47 {strides = array<i32>} : memref<8x8xf32, #tpu.memory_space<vmem>>, vector<1x2xf32>,
    %c6_61 = arith.constant 6 : index
    %c1_62 = arith.constant 1 : index
    %49 = vector.load %arg7[%c6_61, %c1_62] : memref<8x8xf32, #tpu.memory_space<vmem>>, vector<1x7xf32>
    %c6_63 = arith.constant 6 : index
    %c0_64 = arith.constant 0 : index
    %50 = vector.load %arg8[%c6_63, %c0_64] : memref<8x8xf32, #tpu.memory_space<vmem>>, vector<1x7xf32>
    tpu.vector_store %arg8[%c6_63, %c0_64], %49 {strides = array<i32>} : memref<8x8xf32, #tpu.memory_space<vmem>>, vector<1x7xf32>,
    %c6_65 = arith.constant 6 : index
    %c0_66 = arith.constant 0 : index
    %51 = vector.load %arg7[%c6_65, %c0_66] : memref<8x8xf32, #tpu.memory_space<vmem>>, vector<1x1xf32>
    %c6_67 = arith.constant 6 : index
    %c7_68 = arith.constant 7 : index
    %52 = vector.load %arg8[%c6_67, %c7_68] : memref<8x8xf32, #tpu.memory_space<vmem>>, vector<1x1xf32>
    tpu.vector_store %arg8[%c6_67, %c7_68], %51 {strides = array<i32>} : memref<8x8xf32, #tpu.memory_space<vmem>>, vector<1x1xf32>,
    %c7_69 = arith.constant 7 : index
    %c0_70 = arith.constant 0 : index
    %53 = vector.load %arg7[%c7_69, %c0_70] : memref<8x8xf32, #tpu.memory_space<vmem>>, vector<1x8xf32>
    %c7_71 = arith.constant 7 : index
    %c0_72 = arith.constant 0 : index
    %54 = vector.load %arg8[%c7_71, %c0_72] : memref<8x8xf32, #tpu.memory_space<vmem>>, vector<1x8xf32>
    tpu.vector_store %arg8[%c7_71, %c0_72], %53 {strides = array<i32>} : memref<8x8xf32, #tpu.memory_space<vmem>>, vector<1x8xf32>,
    %c0_73 = arith.constant 0 : index
    %c0_74 = arith.constant 0 : index
    %55 = vector.load %arg8[%c0_73, %c0_74] : memref<8x8xf32, #tpu.memory_space<vmem>>, vector<8x8xf32>
    %56 = arith.addf %18, %55 : vector<8x8xf32>
    %57 = vector.broadcast %4 : vector<1x8xf32> to vector<8x8xf32>
    %58 = arith.addf %56, %57 : vector<8x8xf32>
    %cst_75 = arith.constant -1.000000e+30 : f32
    %59 = vector.broadcast %cst_75 : f32 to vector<8x8xf32>
    %60 = arith.select %2, %59, %58 : vector<8x8xi1>, vector<8x8xf32>
    %cst_76 = arith.constant dense<0xFF800000> : vector<8xf32>
    %61 = vector.multi_reduction <maximumf>, %60, %cst_76 [1] : vector<8x8xf32> to vector<8xf32>
    %62 = vector.shape_cast %61 : vector<8xf32> to vector<8x1xf32>
    %63 = vector.broadcast %62 : vector<8x1xf32> to vector<8x8xf32>
    %64 = arith.subf %60, %63 : vector<8x8xf32>
    %65 = math.exp %64 : vector<8x8xf32>
    %cst_77 = arith.constant dense<0.000000e+00> : vector<8xf32>
    %66 = vector.multi_reduction <add>, %65, %cst_77 [1] : vector<8x8xf32> to vector<8xf32>
    %67 = vector.shape_cast %66 : vector<8xf32> to vector<8x1xf32>
    %cst_78 = arith.constant dense<0.000000e+00> : vector<8x8xf32>
    %68 = tpu.matmul %65, %10, %cst_78 {dimension_numbers = #tpu.dot_dimension_numbers<[1], [0], [0], [1], [0, 0, 1, 1], [], []>} : vector<8x8xf32>, vector<8x8xf32>, vector<8x8xf32> -> vector<8x8xf32>
    %69 = tpu.reciprocal %67 {approx = true} : vector<8x1xf32> -> vector<8x1xf32>
    %70 = vector.broadcast %69 : vector<8x1xf32> to vector<8x8xf32>
    %71 = arith.mulf %68, %70 : vector<8x8xf32>
    %c0_79 = arith.constant 0 : index
    %c0_80 = arith.constant 0 : index
    %c0_81 = arith.constant 0 : index
    %72 = vector.load %arg6[%c0_79, %c0_80, %c0_81] : memref<1x8x32xf32, #tpu.memory_space<vmem>>, vector<1x8x8xf32>
    %73 = vector.shape_cast %72 : vector<1x8x8xf32> to vector<8x8xf32>
    %74 = vector.shape_cast %71 : vector<8x8xf32> to vector<1x8x8xf32>
    tpu.vector_store %arg6[%c0_79, %c0_80, %c0_81], %74 {strides = array<i32>} : memref<1x8x32xf32, #tpu.memory_space<vmem>>, vector<1x8x8xf32>,
    %c0_82 = arith.constant 0 : index
    %c0_83 = arith.constant 0 : index
    %c8 = arith.constant 8 : index
    %75 = vector.load %arg1[%c0_82, %c0_83, %c8] : memref<1x8x96xf32, #tpu.memory_space<vmem>>, vector<1x8x8xf32>
    %76 = vector.shape_cast %75 : vector<1x8x8xf32> to vector<8x8xf32>
    %c0_84 = arith.constant 0 : index
    %c0_85 = arith.constant 0 : index
    %c40 = arith.constant 40 : index
    %77 = vector.load %arg1[%c0_84, %c0_85, %c40] : memref<1x8x96xf32, #tpu.memory_space<vmem>>, vector<1x8x8xf32>
    %78 = vector.shape_cast %77 : vector<1x8x8xf32> to vector<8x8xf32>
    %c0_86 = arith.constant 0 : index
    %c0_87 = arith.constant 0 : index
    %c72 = arith.constant 72 : index
    %79 = vector.load %arg1[%c0_86, %c0_87, %c72] : memref<1x8x96xf32, #tpu.memory_space<vmem>>, vector<1x8x8xf32>
    %80 = vector.shape_cast %79 : vector<1x8x8xf32> to vector<8x8xf32>
    %c0_88 = arith.constant 0 : index
    %c8_89 = arith.constant 8 : index
    %81 = vector.load %arg2[%c0_88, %c8_89] : memref<8x32xf32, #tpu.memory_space<vmem>>, vector<8x8xf32>
    %c0_90 = arith.constant 0 : index
    %c8_91 = arith.constant 8 : index
    %82 = vector.load %arg3[%c0_90, %c8_91] : memref<1x32xf32, #tpu.memory_space<vmem>>, vector<1x8xf32>
    %c0_92 = arith.constant 0 : index
    %c8_93 = arith.constant 8 : index
    %83 = vector.load %arg4[%c0_92, %c8_93] : memref<1x32xf32, #tpu.memory_space<vmem>>, vector<1x8xf32>
    %84 = vector.broadcast %82 : vector<1x8xf32> to vector<8x8xf32>
    %85 = arith.addf %76, %84 : vector<8x8xf32>
    %cst_94 = arith.constant 0.353553385 : f32
    %86 = vector.broadcast %cst_94 : f32 to vector<8x8xf32>
    %87 = arith.mulf %85, %86 : vector<8x8xf32>
    %cst_95 = arith.constant dense<0.000000e+00> : vector<8x8xf32>
    %88 = tpu.matmul %87, %78, %cst_95 {dimension_numbers = #tpu.dot_dimension_numbers<[1], [1], [0], [0], [0, 0, 1, 0], [], []>} : vector<8x8xf32>, vector<8x8xf32>, vector<8x8xf32> -> vector<8x8xf32>
    %89 = vector.broadcast %83 : vector<1x8xf32> to vector<8x8xf32>
    %90 = arith.addf %76, %89 : vector<8x8xf32>
    %cst_96 = arith.constant 0.353553385 : f32
    %91 = vector.broadcast %cst_96 : f32 to vector<8x8xf32>
    %92 = arith.mulf %90, %91 : vector<8x8xf32>
    %cst_97 = arith.constant dense<0.000000e+00> : vector<8x8xf32>
    %93 = tpu.matmul %92, %81, %cst_97 {dimension_numbers = #tpu.dot_dimension_numbers<[1], [1], [0], [0], [0, 0, 1, 0], [], []>} : vector<8x8xf32>, vector<8x8xf32>, vector<8x8xf32> -> vector<8x8xf32>
    %c0_98 = arith.constant 0 : index
    %c0_99 = arith.constant 0 : index
    %94 = vector.load %arg7[%c0_98, %c0_99] : memref<8x8xf32, #tpu.memory_space<vmem>>, vector<8x8xf32>
    tpu.vector_store %arg7[%c0_98, %c0_99], %93 {strides = array<i32>} : memref<8x8xf32, #tpu.memory_space<vmem>>, vector<8x8xf32>,
    %c0_100 = arith.constant 0 : index
    %c7_101 = arith.constant 7 : index
    %95 = vector.load %arg7[%c0_100, %c7_101] : memref<8x8xf32, #tpu.memory_space<vmem>>, vector<1x1xf32>
    %c0_102 = arith.constant 0 : index
    %c0_103 = arith.constant 0 : index
    %96 = vector.load %arg8[%c0_102, %c0_103] : memref<8x8xf32, #tpu.memory_space<vmem>>, vector<1x1xf32>
    tpu.vector_store %arg8[%c0_102, %c0_103], %95 {strides = array<i32>} : memref<8x8xf32, #tpu.memory_space<vmem>>, vector<1x1xf32>,
    %c0_104 = arith.constant 0 : index
    %c0_105 = arith.constant 0 : index
    %97 = vector.load %arg7[%c0_104, %c0_105] : memref<8x8xf32, #tpu.memory_space<vmem>>, vector<1x7xf32>
    %c0_106 = arith.constant 0 : index
    %c1_107 = arith.constant 1 : index
    %98 = vector.load %arg8[%c0_106, %c1_107] : memref<8x8xf32, #tpu.memory_space<vmem>>, vector<1x7xf32>
    tpu.vector_store %arg8[%c0_106, %c1_107], %97 {strides = array<i32>} : memref<8x8xf32, #tpu.memory_space<vmem>>, vector<1x7xf32>,
    %c1_108 = arith.constant 1 : index
    %c6_109 = arith.constant 6 : index
    %99 = vector.load %arg7[%c1_108, %c6_109] : memref<8x8xf32, #tpu.memory_space<vmem>>, vector<1x2xf32>
    %c1_110 = arith.constant 1 : index
    %c0_111 = arith.constant 0 : index
    %100 = vector.load %arg8[%c1_110, %c0_111] : memref<8x8xf32, #tpu.memory_space<vmem>>, vector<1x2xf32>
    tpu.vector_store %arg8[%c1_110, %c0_111], %99 {strides = array<i32>} : memref<8x8xf32, #tpu.memory_space<vmem>>, vector<1x2xf32>,
    %c1_112 = arith.constant 1 : index
    %c0_113 = arith.constant 0 : index
    %101 = vector.load %arg7[%c1_112, %c0_113] : memref<8x8xf32, #tpu.memory_space<vmem>>, vector<1x6xf32>
    %c1_114 = arith.constant 1 : index
    %c2_115 = arith.constant 2 : index
    %102 = vector.load %arg8[%c1_114, %c2_115] : memref<8x8xf32, #tpu.memory_space<vmem>>, vector<1x6xf32>
    tpu.vector_store %arg8[%c1_114, %c2_115], %101 {strides = array<i32>} : memref<8x8xf32, #tpu.memory_space<vmem>>, vector<1x6xf32>,
    %c2_116 = arith.constant 2 : index
    %c5_117 = arith.constant 5 : index
    %103 = vector.load %arg7[%c2_116, %c5_117] : memref<8x8xf32, #tpu.memory_space<vmem>>, vector<1x3xf32>
    %c2_118 = arith.constant 2 : index
    %c0_119 = arith.constant 0 : index
    %104 = vector.load %arg8[%c2_118, %c0_119] : memref<8x8xf32, #tpu.memory_space<vmem>>, vector<1x3xf32>
    tpu.vector_store %arg8[%c2_118, %c0_119], %103 {strides = array<i32>} : memref<8x8xf32, #tpu.memory_space<vmem>>, vector<1x3xf32>,
    %c2_120 = arith.constant 2 : index
    %c0_121 = arith.constant 0 : index
    %105 = vector.load %arg7[%c2_120, %c0_121] : memref<8x8xf32, #tpu.memory_space<vmem>>, vector<1x5xf32>
    %c2_122 = arith.constant 2 : index
    %c3_123 = arith.constant 3 : index
    %106 = vector.load %arg8[%c2_122, %c3_123] : memref<8x8xf32, #tpu.memory_space<vmem>>, vector<1x5xf32>
    tpu.vector_store %arg8[%c2_122, %c3_123], %105 {strides = array<i32>} : memref<8x8xf32, #tpu.memory_space<vmem>>, vector<1x5xf32>,
    %c3_124 = arith.constant 3 : index
    %c4_125 = arith.constant 4 : index
    %107 = vector.load %arg7[%c3_124, %c4_125] : memref<8x8xf32, #tpu.memory_space<vmem>>, vector<1x4xf32>
    %c3_126 = arith.constant 3 : index
    %c0_127 = arith.constant 0 : index
    %108 = vector.load %arg8[%c3_126, %c0_127] : memref<8x8xf32, #tpu.memory_space<vmem>>, vector<1x4xf32>
    tpu.vector_store %arg8[%c3_126, %c0_127], %107 {strides = array<i32>} : memref<8x8xf32, #tpu.memory_space<vmem>>, vector<1x4xf32>,
    %c3_128 = arith.constant 3 : index
    %c0_129 = arith.constant 0 : index
    %109 = vector.load %arg7[%c3_128, %c0_129] : memref<8x8xf32, #tpu.memory_space<vmem>>, vector<1x4xf32>
    %c3_130 = arith.constant 3 : index
    %c4_131 = arith.constant 4 : index
    %110 = vector.load %arg8[%c3_130, %c4_131] : memref<8x8xf32, #tpu.memory_space<vmem>>, vector<1x4xf32>
    tpu.vector_store %arg8[%c3_130, %c4_131], %109 {strides = array<i32>} : memref<8x8xf32, #tpu.memory_space<vmem>>, vector<1x4xf32>,
    %c4_132 = arith.constant 4 : index
    %c3_133 = arith.constant 3 : index
    %111 = vector.load %arg7[%c4_132, %c3_133] : memref<8x8xf32, #tpu.memory_space<vmem>>, vector<1x5xf32>
    %c4_134 = arith.constant 4 : index
    %c0_135 = arith.constant 0 : index
    %112 = vector.load %arg8[%c4_134, %c0_135] : memref<8x8xf32, #tpu.memory_space<vmem>>, vector<1x5xf32>
    tpu.vector_store %arg8[%c4_134, %c0_135], %111 {strides = array<i32>} : memref<8x8xf32, #tpu.memory_space<vmem>>, vector<1x5xf32>,
    %c4_136 = arith.constant 4 : index
    %c0_137 = arith.constant 0 : index
    %113 = vector.load %arg7[%c4_136, %c0_137] : memref<8x8xf32, #tpu.memory_space<vmem>>, vector<1x3xf32>
    %c4_138 = arith.constant 4 : index
    %c5_139 = arith.constant 5 : index
    %114 = vector.load %arg8[%c4_138, %c5_139] : memref<8x8xf32, #tpu.memory_space<vmem>>, vector<1x3xf32>
    tpu.vector_store %arg8[%c4_138, %c5_139], %113 {strides = array<i32>} : memref<8x8xf32, #tpu.memory_space<vmem>>, vector<1x3xf32>,
    %c5_140 = arith.constant 5 : index
    %c2_141 = arith.constant 2 : index
    %115 = vector.load %arg7[%c5_140, %c2_141] : memref<8x8xf32, #tpu.memory_space<vmem>>, vector<1x6xf32>
    %c5_142 = arith.constant 5 : index
    %c0_143 = arith.constant 0 : index
    %116 = vector.load %arg8[%c5_142, %c0_143] : memref<8x8xf32, #tpu.memory_space<vmem>>, vector<1x6xf32>
    tpu.vector_store %arg8[%c5_142, %c0_143], %115 {strides = array<i32>} : memref<8x8xf32, #tpu.memory_space<vmem>>, vector<1x6xf32>,
    %c5_144 = arith.constant 5 : index
    %c0_145 = arith.constant 0 : index
    %117 = vector.load %arg7[%c5_144, %c0_145] : memref<8x8xf32, #tpu.memory_space<vmem>>, vector<1x2xf32>
    %c5_146 = arith.constant 5 : index
    %c6_147 = arith.constant 6 : index
    %118 = vector.load %arg8[%c5_146, %c6_147] : memref<8x8xf32, #tpu.memory_space<vmem>>, vector<1x2xf32>
    tpu.vector_store %arg8[%c5_146, %c6_147], %117 {strides = array<i32>} : memref<8x8xf32, #tpu.memory_space<vmem>>, vector<1x2xf32>,
    %c6_148 = arith.constant 6 : index
    %c1_149 = arith.constant 1 : index
    %119 = vector.load %arg7[%c6_148, %c1_149] : memref<8x8xf32, #tpu.memory_space<vmem>>, vector<1x7xf32>
    %c6_150 = arith.constant 6 : index
    %c0_151 = arith.constant 0 : index
    %120 = vector.load %arg8[%c6_150, %c0_151] : memref<8x8xf32, #tpu.memory_space<vmem>>, vector<1x7xf32>
    tpu.vector_store %arg8[%c6_150, %c0_151], %119 {strides = array<i32>} : memref<8x8xf32, #tpu.memory_space<vmem>>, vector<1x7xf32>,
    %c6_152 = arith.constant 6 : index
    %c0_153 = arith.constant 0 : index
    %121 = vector.load %arg7[%c6_152, %c0_153] : memref<8x8xf32, #tpu.memory_space<vmem>>, vector<1x1xf32>
    %c6_154 = arith.constant 6 : index
    %c7_155 = arith.constant 7 : index
    %122 = vector.load %arg8[%c6_154, %c7_155] : memref<8x8xf32, #tpu.memory_space<vmem>>, vector<1x1xf32>
    tpu.vector_store %arg8[%c6_154, %c7_155], %121 {strides = array<i32>} : memref<8x8xf32, #tpu.memory_space<vmem>>, vector<1x1xf32>,
    %c7_156 = arith.constant 7 : index
    %c0_157 = arith.constant 0 : index
    %123 = vector.load %arg7[%c7_156, %c0_157] : memref<8x8xf32, #tpu.memory_space<vmem>>, vector<1x8xf32>
    %c7_158 = arith.constant 7 : index
    %c0_159 = arith.constant 0 : index
    %124 = vector.load %arg8[%c7_158, %c0_159] : memref<8x8xf32, #tpu.memory_space<vmem>>, vector<1x8xf32>
    tpu.vector_store %arg8[%c7_158, %c0_159], %123 {strides = array<i32>} : memref<8x8xf32, #tpu.memory_space<vmem>>, vector<1x8xf32>,
    %c0_160 = arith.constant 0 : index
    %c0_161 = arith.constant 0 : index
    %125 = vector.load %arg8[%c0_160, %c0_161] : memref<8x8xf32, #tpu.memory_space<vmem>>, vector<8x8xf32>
    %126 = arith.addf %88, %125 : vector<8x8xf32>
    %127 = vector.broadcast %4 : vector<1x8xf32> to vector<8x8xf32>
    %128 = arith.addf %126, %127 : vector<8x8xf32>
    %cst_162 = arith.constant -1.000000e+30 : f32
    %129 = vector.broadcast %cst_162 : f32 to vector<8x8xf32>
    %130 = arith.select %2, %129, %128 : vector<8x8xi1>, vector<8x8xf32>
    %cst_163 = arith.constant dense<0xFF800000> : vector<8xf32>
    %131 = vector.multi_reduction <maximumf>, %130, %cst_163 [1] : vector<8x8xf32> to vector<8xf32>
    %132 = vector.shape_cast %131 : vector<8xf32> to vector<8x1xf32>
    %133 = vector.broadcast %132 : vector<8x1xf32> to vector<8x8xf32>
    %134 = arith.subf %130, %133 : vector<8x8xf32>
    %135 = math.exp %134 : vector<8x8xf32>
    %cst_164 = arith.constant dense<0.000000e+00> : vector<8xf32>
    %136 = vector.multi_reduction <add>, %135, %cst_164 [1] : vector<8x8xf32> to vector<8xf32>
    %137 = vector.shape_cast %136 : vector<8xf32> to vector<8x1xf32>
    %cst_165 = arith.constant dense<0.000000e+00> : vector<8x8xf32>
    %138 = tpu.matmul %135, %80, %cst_165 {dimension_numbers = #tpu.dot_dimension_numbers<[1], [0], [0], [1], [0, 0, 1, 1], [], []>} : vector<8x8xf32>, vector<8x8xf32>, vector<8x8xf32> -> vector<8x8xf32>
    %139 = tpu.reciprocal %137 {approx = true} : vector<8x1xf32> -> vector<8x1xf32>
    %140 = vector.broadcast %139 : vector<8x1xf32> to vector<8x8xf32>
    %141 = arith.mulf %138, %140 : vector<8x8xf32>
    %c0_166 = arith.constant 0 : index
    %c0_167 = arith.constant 0 : index
    %c8_168 = arith.constant 8 : index
    %142 = vector.load %arg6[%c0_166, %c0_167, %c8_168] : memref<1x8x32xf32, #tpu.memory_space<vmem>>, vector<1x8x8xf32>
    %143 = vector.shape_cast %142 : vector<1x8x8xf32> to vector<8x8xf32>
    %144 = vector.shape_cast %141 : vector<8x8xf32> to vector<1x8x8xf32>
    tpu.vector_store %arg6[%c0_166, %c0_167, %c8_168], %144 {strides = array<i32>} : memref<1x8x32xf32, #tpu.memory_space<vmem>>, vector<1x8x8xf32>,
    %c0_169 = arith.constant 0 : index
    %c0_170 = arith.constant 0 : index
    %c16 = arith.constant 16 : index
    %145 = vector.load %arg1[%c0_169, %c0_170, %c16] : memref<1x8x96xf32, #tpu.memory_space<vmem>>, vector<1x8x8xf32>
    %146 = vector.shape_cast %145 : vector<1x8x8xf32> to vector<8x8xf32>
    %c0_171 = arith.constant 0 : index
    %c0_172 = arith.constant 0 : index
    %c48 = arith.constant 48 : index
    %147 = vector.load %arg1[%c0_171, %c0_172, %c48] : memref<1x8x96xf32, #tpu.memory_space<vmem>>, vector<1x8x8xf32>
    %148 = vector.shape_cast %147 : vector<1x8x8xf32> to vector<8x8xf32>
    %c0_173 = arith.constant 0 : index
    %c0_174 = arith.constant 0 : index
    %c80 = arith.constant 80 : index
    %149 = vector.load %arg1[%c0_173, %c0_174, %c80] : memref<1x8x96xf32, #tpu.memory_space<vmem>>, vector<1x8x8xf32>
    %150 = vector.shape_cast %149 : vector<1x8x8xf32> to vector<8x8xf32>
    %c0_175 = arith.constant 0 : index
    %c16_176 = arith.constant 16 : index
    %151 = vector.load %arg2[%c0_175, %c16_176] : memref<8x32xf32, #tpu.memory_space<vmem>>, vector<8x8xf32>
    %c0_177 = arith.constant 0 : index
    %c16_178 = arith.constant 16 : index
    %152 = vector.load %arg3[%c0_177, %c16_178] : memref<1x32xf32, #tpu.memory_space<vmem>>, vector<1x8xf32>
    %c0_179 = arith.constant 0 : index
    %c16_180 = arith.constant 16 : index
    %153 = vector.load %arg4[%c0_179, %c16_180] : memref<1x32xf32, #tpu.memory_space<vmem>>, vector<1x8xf32>
    %154 = vector.broadcast %152 : vector<1x8xf32> to vector<8x8xf32>
    %155 = arith.addf %146, %154 : vector<8x8xf32>
    %cst_181 = arith.constant 0.353553385 : f32
    %156 = vector.broadcast %cst_181 : f32 to vector<8x8xf32>
    %157 = arith.mulf %155, %156 : vector<8x8xf32>
    %cst_182 = arith.constant dense<0.000000e+00> : vector<8x8xf32>
    %158 = tpu.matmul %157, %148, %cst_182 {dimension_numbers = #tpu.dot_dimension_numbers<[1], [1], [0], [0], [0, 0, 1, 0], [], []>} : vector<8x8xf32>, vector<8x8xf32>, vector<8x8xf32> -> vector<8x8xf32>
    %159 = vector.broadcast %153 : vector<1x8xf32> to vector<8x8xf32>
    %160 = arith.addf %146, %159 : vector<8x8xf32>
    %cst_183 = arith.constant 0.353553385 : f32
    %161 = vector.broadcast %cst_183 : f32 to vector<8x8xf32>
    %162 = arith.mulf %160, %161 : vector<8x8xf32>
    %cst_184 = arith.constant dense<0.000000e+00> : vector<8x8xf32>
    %163 = tpu.matmul %162, %151, %cst_184 {dimension_numbers = #tpu.dot_dimension_numbers<[1], [1], [0], [0], [0, 0, 1, 0], [], []>} : vector<8x8xf32>, vector<8x8xf32>, vector<8x8xf32> -> vector<8x8xf32>
    %c0_185 = arith.constant 0 : index
    %c0_186 = arith.constant 0 : index
    %164 = vector.load %arg7[%c0_185, %c0_186] : memref<8x8xf32, #tpu.memory_space<vmem>>, vector<8x8xf32>
    tpu.vector_store %arg7[%c0_185, %c0_186], %163 {strides = array<i32>} : memref<8x8xf32, #tpu.memory_space<vmem>>, vector<8x8xf32>,
    %c0_187 = arith.constant 0 : index
    %c7_188 = arith.constant 7 : index
    %165 = vector.load %arg7[%c0_187, %c7_188] : memref<8x8xf32, #tpu.memory_space<vmem>>, vector<1x1xf32>
    %c0_189 = arith.constant 0 : index
    %c0_190 = arith.constant 0 : index
    %166 = vector.load %arg8[%c0_189, %c0_190] : memref<8x8xf32, #tpu.memory_space<vmem>>, vector<1x1xf32>
    tpu.vector_store %arg8[%c0_189, %c0_190], %165 {strides = array<i32>} : memref<8x8xf32, #tpu.memory_space<vmem>>, vector<1x1xf32>,
    %c0_191 = arith.constant 0 : index
    %c0_192 = arith.constant 0 : index
    %167 = vector.load %arg7[%c0_191, %c0_192] : memref<8x8xf32, #tpu.memory_space<vmem>>, vector<1x7xf32>
    %c0_193 = arith.constant 0 : index
    %c1_194 = arith.constant 1 : index
    %168 = vector.load %arg8[%c0_193, %c1_194] : memref<8x8xf32, #tpu.memory_space<vmem>>, vector<1x7xf32>
    tpu.vector_store %arg8[%c0_193, %c1_194], %167 {strides = array<i32>} : memref<8x8xf32, #tpu.memory_space<vmem>>, vector<1x7xf32>,
    %c1_195 = arith.constant 1 : index
    %c6_196 = arith.constant 6 : index
    %169 = vector.load %arg7[%c1_195, %c6_196] : memref<8x8xf32, #tpu.memory_space<vmem>>, vector<1x2xf32>
    %c1_197 = arith.constant 1 : index
    %c0_198 = arith.constant 0 : index
    %170 = vector.load %arg8[%c1_197, %c0_198] : memref<8x8xf32, #tpu.memory_space<vmem>>, vector<1x2xf32>
    tpu.vector_store %arg8[%c1_197, %c0_198], %169 {strides = array<i32>} : memref<8x8xf32, #tpu.memory_space<vmem>>, vector<1x2xf32>,
    %c1_199 = arith.constant 1 : index
    %c0_200 = arith.constant 0 : index
    %171 = vector.load %arg7[%c1_199, %c0_200] : memref<8x8xf32, #tpu.memory_space<vmem>>, vector<1x6xf32>
    %c1_201 = arith.constant 1 : index
    %c2_202 = arith.constant 2 : index
    %172 = vector.load %arg8[%c1_201, %c2_202] : memref<8x8xf32, #tpu.memory_space<vmem>>, vector<1x6xf32>
    tpu.vector_store %arg8[%c1_201, %c2_202], %171 {strides = array<i32>} : memref<8x8xf32, #tpu.memory_space<vmem>>, vector<1x6xf32>,
    %c2_203 = arith.constant 2 : index
    %c5_204 = arith.constant 5 : index
    %173 = vector.load %arg7[%c2_203, %c5_204] : memref<8x8xf32, #tpu.memory_space<vmem>>, vector<1x3xf32>
    %c2_205 = arith.constant 2 : index
    %c0_206 = arith.constant 0 : index
    %174 = vector.load %arg8[%c2_205, %c0_206] : memref<8x8xf32, #tpu.memory_space<vmem>>, vector<1x3xf32>
    tpu.vector_store %arg8[%c2_205, %c0_206], %173 {strides = array<i32>} : memref<8x8xf32, #tpu.memory_space<vmem>>, vector<1x3xf32>,
    %c2_207 = arith.constant 2 : index
    %c0_208 = arith.constant 0 : index
    %175 = vector.load %arg7[%c2_207, %c0_208] : memref<8x8xf32, #tpu.memory_space<vmem>>, vector<1x5xf32>
    %c2_209 = arith.constant 2 : index
    %c3_210 = arith.constant 3 : index
    %176 = vector.load %arg8[%c2_209, %c3_210] : memref<8x8xf32, #tpu.memory_space<vmem>>, vector<1x5xf32>
    tpu.vector_store %arg8[%c2_209, %c3_210], %175 {strides = array<i32>} : memref<8x8xf32, #tpu.memory_space<vmem>>, vector<1x5xf32>,
    %c3_211 = arith.constant 3 : index
    %c4_212 = arith.constant 4 : index
    %177 = vector.load %arg7[%c3_211, %c4_212] : memref<8x8xf32, #tpu.memory_space<vmem>>, vector<1x4xf32>
    %c3_213 = arith.constant 3 : index
    %c0_214 = arith.constant 0 : index
    %178 = vector.load %arg8[%c3_213, %c0_214] : memref<8x8xf32, #tpu.memory_space<vmem>>, vector<1x4xf32>
    tpu.vector_store %arg8[%c3_213, %c0_214], %177 {strides = array<i32>} : memref<8x8xf32, #tpu.memory_space<vmem>>, vector<1x4xf32>,
    %c3_215 = arith.constant 3 : index
    %c0_216 = arith.constant 0 : index
    %179 = vector.load %arg7[%c3_215, %c0_216] : memref<8x8xf32, #tpu.memory_space<vmem>>, vector<1x4xf32>
    %c3_217 = arith.constant 3 : index
    %c4_218 = arith.constant 4 : index
    %180 = vector.load %arg8[%c3_217, %c4_218] : memref<8x8xf32, #tpu.memory_space<vmem>>, vector<1x4xf32>
    tpu.vector_store %arg8[%c3_217, %c4_218], %179 {strides = array<i32>} : memref<8x8xf32, #tpu.memory_space<vmem>>, vector<1x4xf32>,
    %c4_219 = arith.constant 4 : index
    %c3_220 = arith.constant 3 : index
    %181 = vector.load %arg7[%c4_219, %c3_220] : memref<8x8xf32, #tpu.memory_space<vmem>>, vector<1x5xf32>
    %c4_221 = arith.constant 4 : index
    %c0_222 = arith.constant 0 : index
    %182 = vector.load %arg8[%c4_221, %c0_222] : memref<8x8xf32, #tpu.memory_space<vmem>>, vector<1x5xf32>
    tpu.vector_store %arg8[%c4_221, %c0_222], %181 {strides = array<i32>} : memref<8x8xf32, #tpu.memory_space<vmem>>, vector<1x5xf32>,
    %c4_223 = arith.constant 4 : index
    %c0_224 = arith.constant 0 : index
    %183 = vector.load %arg7[%c4_223, %c0_224] : memref<8x8xf32, #tpu.memory_space<vmem>>, vector<1x3xf32>
    %c4_225 = arith.constant 4 : index
    %c5_226 = arith.constant 5 : index
    %184 = vector.load %arg8[%c4_225, %c5_226] : memref<8x8xf32, #tpu.memory_space<vmem>>, vector<1x3xf32>
    tpu.vector_store %arg8[%c4_225, %c5_226], %183 {strides = array<i32>} : memref<8x8xf32, #tpu.memory_space<vmem>>, vector<1x3xf32>,
    %c5_227 = arith.constant 5 : index
    %c2_228 = arith.constant 2 : index
    %185 = vector.load %arg7[%c5_227, %c2_228] : memref<8x8xf32, #tpu.memory_space<vmem>>, vector<1x6xf32>
    %c5_229 = arith.constant 5 : index
    %c0_230 = arith.constant 0 : index
    %186 = vector.load %arg8[%c5_229, %c0_230] : memref<8x8xf32, #tpu.memory_space<vmem>>, vector<1x6xf32>
    tpu.vector_store %arg8[%c5_229, %c0_230], %185 {strides = array<i32>} : memref<8x8xf32, #tpu.memory_space<vmem>>, vector<1x6xf32>,
    %c5_231 = arith.constant 5 : index
    %c0_232 = arith.constant 0 : index
    %187 = vector.load %arg7[%c5_231, %c0_232] : memref<8x8xf32, #tpu.memory_space<vmem>>, vector<1x2xf32>
    %c5_233 = arith.constant 5 : index
    %c6_234 = arith.constant 6 : index
    %188 = vector.load %arg8[%c5_233, %c6_234] : memref<8x8xf32, #tpu.memory_space<vmem>>, vector<1x2xf32>
    tpu.vector_store %arg8[%c5_233, %c6_234], %187 {strides = array<i32>} : memref<8x8xf32, #tpu.memory_space<vmem>>, vector<1x2xf32>,
    %c6_235 = arith.constant 6 : index
    %c1_236 = arith.constant 1 : index
    %189 = vector.load %arg7[%c6_235, %c1_236] : memref<8x8xf32, #tpu.memory_space<vmem>>, vector<1x7xf32>
    %c6_237 = arith.constant 6 : index
    %c0_238 = arith.constant 0 : index
    %190 = vector.load %arg8[%c6_237, %c0_238] : memref<8x8xf32, #tpu.memory_space<vmem>>, vector<1x7xf32>
    tpu.vector_store %arg8[%c6_237, %c0_238], %189 {strides = array<i32>} : memref<8x8xf32, #tpu.memory_space<vmem>>, vector<1x7xf32>,
    %c6_239 = arith.constant 6 : index
    %c0_240 = arith.constant 0 : index
    %191 = vector.load %arg7[%c6_239, %c0_240] : memref<8x8xf32, #tpu.memory_space<vmem>>, vector<1x1xf32>
    %c6_241 = arith.constant 6 : index
    %c7_242 = arith.constant 7 : index
    %192 = vector.load %arg8[%c6_241, %c7_242] : memref<8x8xf32, #tpu.memory_space<vmem>>, vector<1x1xf32>
    tpu.vector_store %arg8[%c6_241, %c7_242], %191 {strides = array<i32>} : memref<8x8xf32, #tpu.memory_space<vmem>>, vector<1x1xf32>,
    %c7_243 = arith.constant 7 : index
    %c0_244 = arith.constant 0 : index
    %193 = vector.load %arg7[%c7_243, %c0_244] : memref<8x8xf32, #tpu.memory_space<vmem>>, vector<1x8xf32>
    %c7_245 = arith.constant 7 : index
    %c0_246 = arith.constant 0 : index
    %194 = vector.load %arg8[%c7_245, %c0_246] : memref<8x8xf32, #tpu.memory_space<vmem>>, vector<1x8xf32>
    tpu.vector_store %arg8[%c7_245, %c0_246], %193 {strides = array<i32>} : memref<8x8xf32, #tpu.memory_space<vmem>>, vector<1x8xf32>,
    %c0_247 = arith.constant 0 : index
    %c0_248 = arith.constant 0 : index
    %195 = vector.load %arg8[%c0_247, %c0_248] : memref<8x8xf32, #tpu.memory_space<vmem>>, vector<8x8xf32>
    %196 = arith.addf %158, %195 : vector<8x8xf32>
    %197 = vector.broadcast %4 : vector<1x8xf32> to vector<8x8xf32>
    %198 = arith.addf %196, %197 : vector<8x8xf32>
    %cst_249 = arith.constant -1.000000e+30 : f32
    %199 = vector.broadcast %cst_249 : f32 to vector<8x8xf32>
    %200 = arith.select %2, %199, %198 : vector<8x8xi1>, vector<8x8xf32>
    %cst_250 = arith.constant dense<0xFF800000> : vector<8xf32>
    %201 = vector.multi_reduction <maximumf>, %200, %cst_250 [1] : vector<8x8xf32> to vector<8xf32>
    %202 = vector.shape_cast %201 : vector<8xf32> to vector<8x1xf32>
    %203 = vector.broadcast %202 : vector<8x1xf32> to vector<8x8xf32>
    %204 = arith.subf %200, %203 : vector<8x8xf32>
    %205 = math.exp %204 : vector<8x8xf32>
    %cst_251 = arith.constant dense<0.000000e+00> : vector<8xf32>
    %206 = vector.multi_reduction <add>, %205, %cst_251 [1] : vector<8x8xf32> to vector<8xf32>
    %207 = vector.shape_cast %206 : vector<8xf32> to vector<8x1xf32>
    %cst_252 = arith.constant dense<0.000000e+00> : vector<8x8xf32>
    %208 = tpu.matmul %205, %150, %cst_252 {dimension_numbers = #tpu.dot_dimension_numbers<[1], [0], [0], [1], [0, 0, 1, 1], [], []>} : vector<8x8xf32>, vector<8x8xf32>, vector<8x8xf32> -> vector<8x8xf32>
    %209 = tpu.reciprocal %207 {approx = true} : vector<8x1xf32> -> vector<8x1xf32>
    %210 = vector.broadcast %209 : vector<8x1xf32> to vector<8x8xf32>
    %211 = arith.mulf %208, %210 : vector<8x8xf32>
    %c0_253 = arith.constant 0 : index
    %c0_254 = arith.constant 0 : index
    %c16_255 = arith.constant 16 : index
    %212 = vector.load %arg6[%c0_253, %c0_254, %c16_255] : memref<1x8x32xf32, #tpu.memory_space<vmem>>, vector<1x8x8xf32>
    %213 = vector.shape_cast %212 : vector<1x8x8xf32> to vector<8x8xf32>
    %214 = vector.shape_cast %211 : vector<8x8xf32> to vector<1x8x8xf32>
    tpu.vector_store %arg6[%c0_253, %c0_254, %c16_255], %214 {strides = array<i32>} : memref<1x8x32xf32, #tpu.memory_space<vmem>>, vector<1x8x8xf32>,
    %c0_256 = arith.constant 0 : index
    %c0_257 = arith.constant 0 : index
    %c24 = arith.constant 24 : index
    %215 = vector.load %arg1[%c0_256, %c0_257, %c24] : memref<1x8x96xf32, #tpu.memory_space<vmem>>, vector<1x8x8xf32>
    %216 = vector.shape_cast %215 : vector<1x8x8xf32> to vector<8x8xf32>
    %c0_258 = arith.constant 0 : index
    %c0_259 = arith.constant 0 : index
    %c56 = arith.constant 56 : index
    %217 = vector.load %arg1[%c0_258, %c0_259, %c56] : memref<1x8x96xf32, #tpu.memory_space<vmem>>, vector<1x8x8xf32>
    %218 = vector.shape_cast %217 : vector<1x8x8xf32> to vector<8x8xf32>
    %c0_260 = arith.constant 0 : index
    %c0_261 = arith.constant 0 : index
    %c88 = arith.constant 88 : index
    %219 = vector.load %arg1[%c0_260, %c0_261, %c88] : memref<1x8x96xf32, #tpu.memory_space<vmem>>, vector<1x8x8xf32>
    %220 = vector.shape_cast %219 : vector<1x8x8xf32> to vector<8x8xf32>
    %c0_262 = arith.constant 0 : index
    %c24_263 = arith.constant 24 : index
    %221 = vector.load %arg2[%c0_262, %c24_263] : memref<8x32xf32, #tpu.memory_space<vmem>>, vector<8x8xf32>
    %c0_264 = arith.constant 0 : index
    %c24_265 = arith.constant 24 : index
    %222 = vector.load %arg3[%c0_264, %c24_265] : memref<1x32xf32, #tpu.memory_space<vmem>>, vector<1x8xf32>
    %c0_266 = arith.constant 0 : index
    %c24_267 = arith.constant 24 : index
    %223 = vector.load %arg4[%c0_266, %c24_267] : memref<1x32xf32, #tpu.memory_space<vmem>>, vector<1x8xf32>
    %224 = vector.broadcast %222 : vector<1x8xf32> to vector<8x8xf32>
    %225 = arith.addf %216, %224 : vector<8x8xf32>
    %cst_268 = arith.constant 0.353553385 : f32
    %226 = vector.broadcast %cst_268 : f32 to vector<8x8xf32>
    %227 = arith.mulf %225, %226 : vector<8x8xf32>
    %cst_269 = arith.constant dense<0.000000e+00> : vector<8x8xf32>
    %228 = tpu.matmul %227, %218, %cst_269 {dimension_numbers = #tpu.dot_dimension_numbers<[1], [1], [0], [0], [0, 0, 1, 0], [], []>} : vector<8x8xf32>, vector<8x8xf32>, vector<8x8xf32> -> vector<8x8xf32>
    %229 = vector.broadcast %223 : vector<1x8xf32> to vector<8x8xf32>
    %230 = arith.addf %216, %229 : vector<8x8xf32>
    %cst_270 = arith.constant 0.353553385 : f32
    %231 = vector.broadcast %cst_270 : f32 to vector<8x8xf32>
    %232 = arith.mulf %230, %231 : vector<8x8xf32>
    %cst_271 = arith.constant dense<0.000000e+00> : vector<8x8xf32>
    %233 = tpu.matmul %232, %221, %cst_271 {dimension_numbers = #tpu.dot_dimension_numbers<[1], [1], [0], [0], [0, 0, 1, 0], [], []>} : vector<8x8xf32>, vector<8x8xf32>, vector<8x8xf32> -> vector<8x8xf32>
    %c0_272 = arith.constant 0 : index
    %c0_273 = arith.constant 0 : index
    %234 = vector.load %arg7[%c0_272, %c0_273] : memref<8x8xf32, #tpu.memory_space<vmem>>, vector<8x8xf32>
    tpu.vector_store %arg7[%c0_272, %c0_273], %233 {strides = array<i32>} : memref<8x8xf32, #tpu.memory_space<vmem>>, vector<8x8xf32>,
    %c0_274 = arith.constant 0 : index
    %c7_275 = arith.constant 7 : index
    %235 = vector.load %arg7[%c0_274, %c7_275] : memref<8x8xf32, #tpu.memory_space<vmem>>, vector<1x1xf32>
    %c0_276 = arith.constant 0 : index
    %c0_277 = arith.constant 0 : index
    %236 = vector.load %arg8[%c0_276, %c0_277] : memref<8x8xf32, #tpu.memory_space<vmem>>, vector<1x1xf32>
    tpu.vector_store %arg8[%c0_276, %c0_277], %235 {strides = array<i32>} : memref<8x8xf32, #tpu.memory_space<vmem>>, vector<1x1xf32>,
    %c0_278 = arith.constant 0 : index
    %c0_279 = arith.constant 0 : index
    %237 = vector.load %arg7[%c0_278, %c0_279] : memref<8x8xf32, #tpu.memory_space<vmem>>, vector<1x7xf32>
    %c0_280 = arith.constant 0 : index
    %c1_281 = arith.constant 1 : index
    %238 = vector.load %arg8[%c0_280, %c1_281] : memref<8x8xf32, #tpu.memory_space<vmem>>, vector<1x7xf32>
    tpu.vector_store %arg8[%c0_280, %c1_281], %237 {strides = array<i32>} : memref<8x8xf32, #tpu.memory_space<vmem>>, vector<1x7xf32>,
    %c1_282 = arith.constant 1 : index
    %c6_283 = arith.constant 6 : index
    %239 = vector.load %arg7[%c1_282, %c6_283] : memref<8x8xf32, #tpu.memory_space<vmem>>, vector<1x2xf32>
    %c1_284 = arith.constant 1 : index
    %c0_285 = arith.constant 0 : index
    %240 = vector.load %arg8[%c1_284, %c0_285] : memref<8x8xf32, #tpu.memory_space<vmem>>, vector<1x2xf32>
    tpu.vector_store %arg8[%c1_284, %c0_285], %239 {strides = array<i32>} : memref<8x8xf32, #tpu.memory_space<vmem>>, vector<1x2xf32>,
    %c1_286 = arith.constant 1 : index
    %c0_287 = arith.constant 0 : index
    %241 = vector.load %arg7[%c1_286, %c0_287] : memref<8x8xf32, #tpu.memory_space<vmem>>, vector<1x6xf32>
    %c1_288 = arith.constant 1 : index
    %c2_289 = arith.constant 2 : index
    %242 = vector.load %arg8[%c1_288, %c2_289] : memref<8x8xf32, #tpu.memory_space<vmem>>, vector<1x6xf32>
    tpu.vector_store %arg8[%c1_288, %c2_289], %241 {strides = array<i32>} : memref<8x8xf32, #tpu.memory_space<vmem>>, vector<1x6xf32>,
    %c2_290 = arith.constant 2 : index
    %c5_291 = arith.constant 5 : index
    %243 = vector.load %arg7[%c2_290, %c5_291] : memref<8x8xf32, #tpu.memory_space<vmem>>, vector<1x3xf32>
    %c2_292 = arith.constant 2 : index
    %c0_293 = arith.constant 0 : index
    %244 = vector.load %arg8[%c2_292, %c0_293] : memref<8x8xf32, #tpu.memory_space<vmem>>, vector<1x3xf32>
    tpu.vector_store %arg8[%c2_292, %c0_293], %243 {strides = array<i32>} : memref<8x8xf32, #tpu.memory_space<vmem>>, vector<1x3xf32>,
    %c2_294 = arith.constant 2 : index
    %c0_295 = arith.constant 0 : index
    %245 = vector.load %arg7[%c2_294, %c0_295] : memref<8x8xf32, #tpu.memory_space<vmem>>, vector<1x5xf32>
    %c2_296 = arith.constant 2 : index
    %c3_297 = arith.constant 3 : index
    %246 = vector.load %arg8[%c2_296, %c3_297] : memref<8x8xf32, #tpu.memory_space<vmem>>, vector<1x5xf32>
    tpu.vector_store %arg8[%c2_296, %c3_297], %245 {strides = array<i32>} : memref<8x8xf32, #tpu.memory_space<vmem>>, vector<1x5xf32>,
    %c3_298 = arith.constant 3 : index
    %c4_299 = arith.constant 4 : index
    %247 = vector.load %arg7[%c3_298, %c4_299] : memref<8x8xf32, #tpu.memory_space<vmem>>, vector<1x4xf32>
    %c3_300 = arith.constant 3 : index
    %c0_301 = arith.constant 0 : index
    %248 = vector.load %arg8[%c3_300, %c0_301] : memref<8x8xf32, #tpu.memory_space<vmem>>, vector<1x4xf32>
    tpu.vector_store %arg8[%c3_300, %c0_301], %247 {strides = array<i32>} : memref<8x8xf32, #tpu.memory_space<vmem>>, vector<1x4xf32>,
    %c3_302 = arith.constant 3 : index
    %c0_303 = arith.constant 0 : index
    %249 = vector.load %arg7[%c3_302, %c0_303] : memref<8x8xf32, #tpu.memory_space<vmem>>, vector<1x4xf32>
    %c3_304 = arith.constant 3 : index
    %c4_305 = arith.constant 4 : index
    %250 = vector.load %arg8[%c3_304, %c4_305] : memref<8x8xf32, #tpu.memory_space<vmem>>, vector<1x4xf32>
    tpu.vector_store %arg8[%c3_304, %c4_305], %249 {strides = array<i32>} : memref<8x8xf32, #tpu.memory_space<vmem>>, vector<1x4xf32>,
    %c4_306 = arith.constant 4 : index
    %c3_307 = arith.constant 3 : index
    %251 = vector.load %arg7[%c4_306, %c3_307] : memref<8x8xf32, #tpu.memory_space<vmem>>, vector<1x5xf32>
    %c4_308 = arith.constant 4 : index
    %c0_309 = arith.constant 0 : index
    %252 = vector.load %arg8[%c4_308, %c0_309] : memref<8x8xf32, #tpu.memory_space<vmem>>, vector<1x5xf32>
    tpu.vector_store %arg8[%c4_308, %c0_309], %251 {strides = array<i32>} : memref<8x8xf32, #tpu.memory_space<vmem>>, vector<1x5xf32>,
    %c4_310 = arith.constant 4 : index
    %c0_311 = arith.constant 0 : index
    %253 = vector.load %arg7[%c4_310, %c0_311] : memref<8x8xf32, #tpu.memory_space<vmem>>, vector<1x3xf32>
    %c4_312 = arith.constant 4 : index
    %c5_313 = arith.constant 5 : index
    %254 = vector.load %arg8[%c4_312, %c5_313] : memref<8x8xf32, #tpu.memory_space<vmem>>, vector<1x3xf32>
    tpu.vector_store %arg8[%c4_312, %c5_313], %253 {strides = array<i32>} : memref<8x8xf32, #tpu.memory_space<vmem>>, vector<1x3xf32>,
    %c5_314 = arith.constant 5 : index
    %c2_315 = arith.constant 2 : index
    %255 = vector.load %arg7[%c5_314, %c2_315] : memref<8x8xf32, #tpu.memory_space<vmem>>, vector<1x6xf32>
    %c5_316 = arith.constant 5 : index
    %c0_317 = arith.constant 0 : index
    %256 = vector.load %arg8[%c5_316, %c0_317] : memref<8x8xf32, #tpu.memory_space<vmem>>, vector<1x6xf32>
    tpu.vector_store %arg8[%c5_316, %c0_317], %255 {strides = array<i32>} : memref<8x8xf32, #tpu.memory_space<vmem>>, vector<1x6xf32>,
    %c5_318 = arith.constant 5 : index
    %c0_319 = arith.constant 0 : index
    %257 = vector.load %arg7[%c5_318, %c0_319] : memref<8x8xf32, #tpu.memory_space<vmem>>, vector<1x2xf32>
    %c5_320 = arith.constant 5 : index
    %c6_321 = arith.constant 6 : index
    %258 = vector.load %arg8[%c5_320, %c6_321] : memref<8x8xf32, #tpu.memory_space<vmem>>, vector<1x2xf32>
    tpu.vector_store %arg8[%c5_320, %c6_321], %257 {strides = array<i32>} : memref<8x8xf32, #tpu.memory_space<vmem>>, vector<1x2xf32>,
    %c6_322 = arith.constant 6 : index
    %c1_323 = arith.constant 1 : index
    %259 = vector.load %arg7[%c6_322, %c1_323] : memref<8x8xf32, #tpu.memory_space<vmem>>, vector<1x7xf32>
    %c6_324 = arith.constant 6 : index
    %c0_325 = arith.constant 0 : index
    %260 = vector.load %arg8[%c6_324, %c0_325] : memref<8x8xf32, #tpu.memory_space<vmem>>, vector<1x7xf32>
    tpu.vector_store %arg8[%c6_324, %c0_325], %259 {strides = array<i32>} : memref<8x8xf32, #tpu.memory_space<vmem>>, vector<1x7xf32>,
    %c6_326 = arith.constant 6 : index
    %c0_327 = arith.constant 0 : index
    %261 = vector.load %arg7[%c6_326, %c0_327] : memref<8x8xf32, #tpu.memory_space<vmem>>, vector<1x1xf32>
    %c6_328 = arith.constant 6 : index
    %c7_329 = arith.constant 7 : index
    %262 = vector.load %arg8[%c6_328, %c7_329] : memref<8x8xf32, #tpu.memory_space<vmem>>, vector<1x1xf32>
    tpu.vector_store %arg8[%c6_328, %c7_329], %261 {strides = array<i32>} : memref<8x8xf32, #tpu.memory_space<vmem>>, vector<1x1xf32>,
    %c7_330 = arith.constant 7 : index
    %c0_331 = arith.constant 0 : index
    %263 = vector.load %arg7[%c7_330, %c0_331] : memref<8x8xf32, #tpu.memory_space<vmem>>, vector<1x8xf32>
    %c7_332 = arith.constant 7 : index
    %c0_333 = arith.constant 0 : index
    %264 = vector.load %arg8[%c7_332, %c0_333] : memref<8x8xf32, #tpu.memory_space<vmem>>, vector<1x8xf32>
    tpu.vector_store %arg8[%c7_332, %c0_333], %263 {strides = array<i32>} : memref<8x8xf32, #tpu.memory_space<vmem>>, vector<1x8xf32>,
    %c0_334 = arith.constant 0 : index
    %c0_335 = arith.constant 0 : index
    %265 = vector.load %arg8[%c0_334, %c0_335] : memref<8x8xf32, #tpu.memory_space<vmem>>, vector<8x8xf32>
    %266 = arith.addf %228, %265 : vector<8x8xf32>
    %267 = vector.broadcast %4 : vector<1x8xf32> to vector<8x8xf32>
    %268 = arith.addf %266, %267 : vector<8x8xf32>
    %cst_336 = arith.constant -1.000000e+30 : f32
    %269 = vector.broadcast %cst_336 : f32 to vector<8x8xf32>
    %270 = arith.select %2, %269, %268 : vector<8x8xi1>, vector<8x8xf32>
    %cst_337 = arith.constant dense<0xFF800000> : vector<8xf32>
    %271 = vector.multi_reduction <maximumf>, %270, %cst_337 [1] : vector<8x8xf32> to vector<8xf32>
    %272 = vector.shape_cast %271 : vector<8xf32> to vector<8x1xf32>
    %273 = vector.broadcast %272 : vector<8x1xf32> to vector<8x8xf32>
    %274 = arith.subf %270, %273 : vector<8x8xf32>
    %275 = math.exp %274 : vector<8x8xf32>
    %cst_338 = arith.constant dense<0.000000e+00> : vector<8xf32>
    %276 = vector.multi_reduction <add>, %275, %cst_338 [1] : vector<8x8xf32> to vector<8xf32>
    %277 = vector.shape_cast %276 : vector<8xf32> to vector<8x1xf32>
    %cst_339 = arith.constant dense<0.000000e+00> : vector<8x8xf32>
    %278 = tpu.matmul %275, %220, %cst_339 {dimension_numbers = #tpu.dot_dimension_numbers<[1], [0], [0], [1], [0, 0, 1, 1], [], []>} : vector<8x8xf32>, vector<8x8xf32>, vector<8x8xf32> -> vector<8x8xf32>
    %279 = tpu.reciprocal %277 {approx = true} : vector<8x1xf32> -> vector<8x1xf32>
    %280 = vector.broadcast %279 : vector<8x1xf32> to vector<8x8xf32>
    %281 = arith.mulf %278, %280 : vector<8x8xf32>
    %c0_340 = arith.constant 0 : index
    %c0_341 = arith.constant 0 : index
    %c24_342 = arith.constant 24 : index
    %282 = vector.load %arg6[%c0_340, %c0_341, %c24_342] : memref<1x8x32xf32, #tpu.memory_space<vmem>>, vector<1x8x8xf32>
    %283 = vector.shape_cast %282 : vector<1x8x8xf32> to vector<8x8xf32>
    %284 = vector.shape_cast %281 : vector<8x8xf32> to vector<1x8x8xf32>
    tpu.vector_store %arg6[%c0_340, %c0_341, %c24_342], %284 {strides = array<i32>} : memref<1x8x32xf32, #tpu.memory_space<vmem>>, vector<1x8x8xf32>,
    return
  }
  func.func @transform_0(%arg0: i32) -> (i32, i32, i32) {
    %c0_i32 = arith.constant 0 : i32
    %c0_i32_0 = arith.constant 0 : i32
    %c0_i32_1 = arith.constant 0 : i32
    return %arg0, %c0_i32, %c0_i32_0 : i32, i32, i32
  }
  func.func @transform_1(%arg0: i32) -> (i32, i32) {
    %c0_i32 = arith.constant 0 : i32
    %c0_i32_0 = arith.constant 0 : i32
    %c0_i32_1 = arith.constant 0 : i32
    return %c0_i32, %c0_i32_0 : i32, i32
  }
  func.func @transform_2(%arg0: i32) -> (i32, i32) {
    %c0_i32 = arith.constant 0 : i32
    %c0_i32_0 = arith.constant 0 : i32
    %c0_i32_1 = arith.constant 0 : i32
    return %c0_i32, %c0_i32_0 : i32, i32
  }
  func.func @transform_3(%arg0: i32) -> (i32, i32) {
    %c0_i32 = arith.constant 0 : i32
    %c0_i32_0 = arith.constant 0 : i32
    %c0_i32_1 = arith.constant 0 : i32
    return %c0_i32, %c0_i32_0 : i32, i32
  }
  func.func @transform_4(%arg0: i32) -> (i32, i32, i32) {
    %c0_i32 = arith.constant 0 : i32
    %c0_i32_0 = arith.constant 0 : i32
    %c0_i32_1 = arith.constant 0 : i32
    return %arg0, %c0_i32, %c0_i32_0 : i32, i32, i32
  }
  func.func @transform_5(%arg0: i32) -> (i32, i32, i32) {
    %c0_i32 = arith.constant 0 : i32
    %c0_i32_0 = arith.constant 0 : i32
    %c0_i32_1 = arith.constant 0 : i32
    return %arg0, %c0_i32, %c0_i32_0 : i32, i32, i32
  }
}

module attributes {stable_mosaic.version = 11 : i64} {
  func.func @_matmul_kernel(%arg0: i32, %arg1: i32, %arg2: i32, %arg3: memref<24x32xf32, #tpu.memory_space<vmem>>, %arg4: memref<32x64xf32, #tpu.memory_space<vmem>>, %arg5: memref<1x64xf32, #tpu.memory_space<vmem>>, %arg6: memref<24x64xf32, #tpu.memory_space<vmem>>, %arg7: memref<24x64xf32, #tpu.memory_space<vmem>>) attributes {dimension_semantics = [#tpu.dimension_semantics<parallel>, #tpu.dimension_semantics<parallel>, #tpu.dimension_semantics<arbitrary>], iteration_bounds = array<i64: 1, 1, 1>, scalar_prefetch = 0 : i64, scratch_operands = 1 : i64, tpu.core_type = #tpu.core_type<tc>, window_params = [{transform_indices = @transform_0, window_bounds = array<i64: 24, 32>}, {transform_indices = @transform_1, window_bounds = array<i64: 32, 64>}, {transform_indices = @transform_2, window_bounds = array<i64: 1, 64>}, {transform_indices = @transform_3, window_bounds = array<i64: 24, 64>}]} {
    %c0_i32 = arith.constant 0 : i32
    %0 = arith.cmpi eq, %arg2, %c0_i32 : i32
    %1 = arith.extui %0 : i1 to i32
    %c0_i32_0 = arith.constant 0 : i32
    %2 = arith.cmpi ne, %1, %c0_i32_0 : i32
    scf.if %2 {
      %cst_10 = arith.constant 0.000000e+00 : f32
      %12 = vector.broadcast %cst_10 : f32 to vector<24x64xf32>
      %c0_11 = arith.constant 0 : index
      %c0_12 = arith.constant 0 : index
      %13 = vector.load %arg7[%c0_11, %c0_12] : memref<24x64xf32, #tpu.memory_space<vmem>>, vector<24x64xf32>
      tpu.vector_store %arg7[%c0_11, %c0_12], %12 {strides = array<i32>} : memref<24x64xf32, #tpu.memory_space<vmem>>, vector<24x64xf32>,
    } else {
    }
    %c0 = arith.constant 0 : index
    %c0_1 = arith.constant 0 : index
    %3 = vector.load %arg7[%c0, %c0_1] : memref<24x64xf32, #tpu.memory_space<vmem>>, vector<24x64xf32>
    %c0_2 = arith.constant 0 : index
    %c0_3 = arith.constant 0 : index
    %4 = vector.load %arg3[%c0_2, %c0_3] : memref<24x32xf32, #tpu.memory_space<vmem>>, vector<24x32xf32>
    %c0_4 = arith.constant 0 : index
    %c0_5 = arith.constant 0 : index
    %5 = vector.load %arg4[%c0_4, %c0_5] : memref<32x64xf32, #tpu.memory_space<vmem>>, vector<32x64xf32>
    %cst = arith.constant dense<0.000000e+00> : vector<24x64xf32>
    %6 = tpu.matmul %4, %5, %cst {dimension_numbers = #tpu.dot_dimension_numbers<[1], [0], [0], [1], [0, 0, 1, 1], [], []>} : vector<24x32xf32>, vector<32x64xf32>, vector<24x64xf32> -> vector<24x64xf32>
    %7 = arith.addf %3, %6 : vector<24x64xf32>
    %c0_6 = arith.constant 0 : index
    %c0_7 = arith.constant 0 : index
    %8 = vector.load %arg7[%c0_6, %c0_7] : memref<24x64xf32, #tpu.memory_space<vmem>>, vector<24x64xf32>
    tpu.vector_store %arg7[%c0_6, %c0_7], %7 {strides = array<i32>} : memref<24x64xf32, #tpu.memory_space<vmem>>, vector<24x64xf32>,
    %c0_i32_8 = arith.constant 0 : i32
    %9 = arith.cmpi eq, %arg2, %c0_i32_8 : i32
    %10 = arith.extui %9 : i1 to i32
    %c0_i32_9 = arith.constant 0 : i32
    %11 = arith.cmpi ne, %10, %c0_i32_9 : i32
    scf.if %11 {
      %c0_10 = arith.constant 0 : index
      %c0_11 = arith.constant 0 : index
      %12 = vector.load %arg7[%c0_10, %c0_11] : memref<24x64xf32, #tpu.memory_space<vmem>>, vector<24x64xf32>
      %c0_12 = arith.constant 0 : index
      %c0_13 = arith.constant 0 : index
      %13 = vector.load %arg5[%c0_12, %c0_13] : memref<1x64xf32, #tpu.memory_space<vmem>>, vector<1x64xf32>
      %14 = vector.broadcast %13 : vector<1x64xf32> to vector<24x64xf32>
      %15 = arith.addf %12, %14 : vector<24x64xf32>
      %c0_14 = arith.constant 0 : index
      %c0_15 = arith.constant 0 : index
      %16 = vector.load %arg6[%c0_14, %c0_15] : memref<24x64xf32, #tpu.memory_space<vmem>>, vector<24x64xf32>
      tpu.vector_store %arg6[%c0_14, %c0_15], %15 {strides = array<i32>} : memref<24x64xf32, #tpu.memory_space<vmem>>, vector<24x64xf32>,
    } else {
    }
    return
  }
  func.func @transform_0(%arg0: i32, %arg1: i32, %arg2: i32) -> (i32, i32) {
    %c0_i32 = arith.constant 0 : i32
    return %arg0, %arg2 : i32, i32
  }
  func.func @transform_1(%arg0: i32, %arg1: i32, %arg2: i32) -> (i32, i32) {
    %c0_i32 = arith.constant 0 : i32
    return %arg2, %arg1 : i32, i32
  }
  func.func @transform_2(%arg0: i32, %arg1: i32, %arg2: i32) -> (i32, i32) {
    %c0_i32 = arith.constant 0 : i32
    %c0_i32_0 = arith.constant 0 : i32
    return %c0_i32, %arg1 : i32, i32
  }
  func.func @transform_3(%arg0: i32, %arg1: i32, %arg2: i32) -> (i32, i32) {
    %c0_i32 = arith.constant 0 : i32
    return %arg0, %arg1 : i32, i32
  }
}

module attributes {stable_mosaic.version = 11 : i64} {
  func.func @_cross_attn_kernel(%arg0: i32, %arg1: memref<1x8x32xf32, #tpu.memory_space<vmem>>, %arg2: memref<1x12x64xf32, #tpu.memory_space<vmem>>, %arg3: memref<1x8x32xf32, #tpu.memory_space<vmem>>) attributes {dimension_semantics = [#tpu.dimension_semantics<parallel>], iteration_bounds = array<i64: 2>, scalar_prefetch = 0 : i64, scratch_operands = 0 : i64, tpu.core_type = #tpu.core_type<tc>, window_params = [{transform_indices = @transform_0, window_bounds = array<i64: 1, 8, 32>}, {transform_indices = @transform_1, window_bounds = array<i64: 1, 12, 64>}, {transform_indices = @transform_2, window_bounds = array<i64: 1, 8, 32>}]} {
    %c0 = arith.constant 0 : index
    %c0_0 = arith.constant 0 : index
    %c0_1 = arith.constant 0 : index
    %0 = vector.load %arg1[%c0, %c0_0, %c0_1] : memref<1x8x32xf32, #tpu.memory_space<vmem>>, vector<1x8x8xf32>
    %1 = vector.shape_cast %0 : vector<1x8x8xf32> to vector<8x8xf32>
    %cst = arith.constant 0.353553385 : f32
    %2 = vector.broadcast %cst : f32 to vector<8x8xf32>
    %3 = arith.mulf %1, %2 : vector<8x8xf32>
    %c0_2 = arith.constant 0 : index
    %c0_3 = arith.constant 0 : index
    %c0_4 = arith.constant 0 : index
    %4 = vector.load %arg2[%c0_2, %c0_3, %c0_4] : memref<1x12x64xf32, #tpu.memory_space<vmem>>, vector<1x12x8xf32>
    %5 = vector.shape_cast %4 : vector<1x12x8xf32> to vector<12x8xf32>
    %c0_5 = arith.constant 0 : index
    %c0_6 = arith.constant 0 : index
    %c32 = arith.constant 32 : index
    %6 = vector.load %arg2[%c0_5, %c0_6, %c32] : memref<1x12x64xf32, #tpu.memory_space<vmem>>, vector<1x12x8xf32>
    %7 = vector.shape_cast %6 : vector<1x12x8xf32> to vector<12x8xf32>
    %cst_7 = arith.constant dense<0.000000e+00> : vector<8x12xf32>
    %8 = tpu.matmul %3, %5, %cst_7 {dimension_numbers = #tpu.dot_dimension_numbers<[1], [1], [0], [0], [0, 0, 1, 0], [], []>} : vector<8x8xf32>, vector<12x8xf32>, vector<8x12xf32> -> vector<8x12xf32>
    %cst_8 = arith.constant dense<0xFF800000> : vector<8xf32>
    %9 = vector.multi_reduction <maximumf>, %8, %cst_8 [1] : vector<8x12xf32> to vector<8xf32>
    %10 = vector.shape_cast %9 : vector<8xf32> to vector<8x1xf32>
    %11 = vector.broadcast %10 : vector<8x1xf32> to vector<8x12xf32>
    %12 = arith.subf %8, %11 : vector<8x12xf32>
    %13 = math.exp %12 : vector<8x12xf32>
    %cst_9 = arith.constant dense<0.000000e+00> : vector<8xf32>
    %14 = vector.multi_reduction <add>, %13, %cst_9 [1] : vector<8x12xf32> to vector<8xf32>
    %15 = vector.shape_cast %14 : vector<8xf32> to vector<8x1xf32>
    %cst_10 = arith.constant dense<0.000000e+00> : vector<8x8xf32>
    %16 = tpu.matmul %13, %7, %cst_10 {dimension_numbers = #tpu.dot_dimension_numbers<[1], [0], [0], [1], [0, 0, 1, 1], [], []>} : vector<8x12xf32>, vector<12x8xf32>, vector<8x8xf32> -> vector<8x8xf32>
    %17 = tpu.reciprocal %15 {approx = true} : vector<8x1xf32> -> vector<8x1xf32>
    %18 = vector.broadcast %17 : vector<8x1xf32> to vector<8x8xf32>
    %19 = arith.mulf %16, %18 : vector<8x8xf32>
    %c0_11 = arith.constant 0 : index
    %c0_12 = arith.constant 0 : index
    %c0_13 = arith.constant 0 : index
    %20 = vector.load %arg3[%c0_11, %c0_12, %c0_13] : memref<1x8x32xf32, #tpu.memory_space<vmem>>, vector<1x8x8xf32>
    %21 = vector.shape_cast %20 : vector<1x8x8xf32> to vector<8x8xf32>
    %22 = vector.shape_cast %19 : vector<8x8xf32> to vector<1x8x8xf32>
    tpu.vector_store %arg3[%c0_11, %c0_12, %c0_13], %22 {strides = array<i32>} : memref<1x8x32xf32, #tpu.memory_space<vmem>>, vector<1x8x8xf32>,
    %c0_14 = arith.constant 0 : index
    %c0_15 = arith.constant 0 : index
    %c8 = arith.constant 8 : index
    %23 = vector.load %arg1[%c0_14, %c0_15, %c8] : memref<1x8x32xf32, #tpu.memory_space<vmem>>, vector<1x8x8xf32>
    %24 = vector.shape_cast %23 : vector<1x8x8xf32> to vector<8x8xf32>
    %cst_16 = arith.constant 0.353553385 : f32
    %25 = vector.broadcast %cst_16 : f32 to vector<8x8xf32>
    %26 = arith.mulf %24, %25 : vector<8x8xf32>
    %c0_17 = arith.constant 0 : index
    %c0_18 = arith.constant 0 : index
    %c8_19 = arith.constant 8 : index
    %27 = vector.load %arg2[%c0_17, %c0_18, %c8_19] : memref<1x12x64xf32, #tpu.memory_space<vmem>>, vector<1x12x8xf32>
    %28 = vector.shape_cast %27 : vector<1x12x8xf32> to vector<12x8xf32>
    %c0_20 = arith.constant 0 : index
    %c0_21 = arith.constant 0 : index
    %c40 = arith.constant 40 : index
    %29 = vector.load %arg2[%c0_20, %c0_21, %c40] : memref<1x12x64xf32, #tpu.memory_space<vmem>>, vector<1x12x8xf32>
    %30 = vector.shape_cast %29 : vector<1x12x8xf32> to vector<12x8xf32>
    %cst_22 = arith.constant dense<0.000000e+00> : vector<8x12xf32>
    %31 = tpu.matmul %26, %28, %cst_22 {dimension_numbers = #tpu.dot_dimension_numbers<[1], [1], [0], [0], [0, 0, 1, 0], [], []>} : vector<8x8xf32>, vector<12x8xf32>, vector<8x12xf32> -> vector<8x12xf32>
    %cst_23 = arith.constant dense<0xFF800000> : vector<8xf32>
    %32 = vector.multi_reduction <maximumf>, %31, %cst_23 [1] : vector<8x12xf32> to vector<8xf32>
    %33 = vector.shape_cast %32 : vector<8xf32> to vector<8x1xf32>
    %34 = vector.broadcast %33 : vector<8x1xf32> to vector<8x12xf32>
    %35 = arith.subf %31, %34 : vector<8x12xf32>
    %36 = math.exp %35 : vector<8x12xf32>
    %cst_24 = arith.constant dense<0.000000e+00> : vector<8xf32>
    %37 = vector.multi_reduction <add>, %36, %cst_24 [1] : vector<8x12xf32> to vector<8xf32>
    %38 = vector.shape_cast %37 : vector<8xf32> to vector<8x1xf32>
    %cst_25 = arith.constant dense<0.000000e+00> : vector<8x8xf32>
    %39 = tpu.matmul %36, %30, %cst_25 {dimension_numbers = #tpu.dot_dimension_numbers<[1], [0], [0], [1], [0, 0, 1, 1], [], []>} : vector<8x12xf32>, vector<12x8xf32>, vector<8x8xf32> -> vector<8x8xf32>
    %40 = tpu.reciprocal %38 {approx = true} : vector<8x1xf32> -> vector<8x1xf32>
    %41 = vector.broadcast %40 : vector<8x1xf32> to vector<8x8xf32>
    %42 = arith.mulf %39, %41 : vector<8x8xf32>
    %c0_26 = arith.constant 0 : index
    %c0_27 = arith.constant 0 : index
    %c8_28 = arith.constant 8 : index
    %43 = vector.load %arg3[%c0_26, %c0_27, %c8_28] : memref<1x8x32xf32, #tpu.memory_space<vmem>>, vector<1x8x8xf32>
    %44 = vector.shape_cast %43 : vector<1x8x8xf32> to vector<8x8xf32>
    %45 = vector.shape_cast %42 : vector<8x8xf32> to vector<1x8x8xf32>
    tpu.vector_store %arg3[%c0_26, %c0_27, %c8_28], %45 {strides = array<i32>} : memref<1x8x32xf32, #tpu.memory_space<vmem>>, vector<1x8x8xf32>,
    %c0_29 = arith.constant 0 : index
    %c0_30 = arith.constant 0 : index
    %c16 = arith.constant 16 : index
    %46 = vector.load %arg1[%c0_29, %c0_30, %c16] : memref<1x8x32xf32, #tpu.memory_space<vmem>>, vector<1x8x8xf32>
    %47 = vector.shape_cast %46 : vector<1x8x8xf32> to vector<8x8xf32>
    %cst_31 = arith.constant 0.353553385 : f32
    %48 = vector.broadcast %cst_31 : f32 to vector<8x8xf32>
    %49 = arith.mulf %47, %48 : vector<8x8xf32>
    %c0_32 = arith.constant 0 : index
    %c0_33 = arith.constant 0 : index
    %c16_34 = arith.constant 16 : index
    %50 = vector.load %arg2[%c0_32, %c0_33, %c16_34] : memref<1x12x64xf32, #tpu.memory_space<vmem>>, vector<1x12x8xf32>
    %51 = vector.shape_cast %50 : vector<1x12x8xf32> to vector<12x8xf32>
    %c0_35 = arith.constant 0 : index
    %c0_36 = arith.constant 0 : index
    %c48 = arith.constant 48 : index
    %52 = vector.load %arg2[%c0_35, %c0_36, %c48] : memref<1x12x64xf32, #tpu.memory_space<vmem>>, vector<1x12x8xf32>
    %53 = vector.shape_cast %52 : vector<1x12x8xf32> to vector<12x8xf32>
    %cst_37 = arith.constant dense<0.000000e+00> : vector<8x12xf32>
    %54 = tpu.matmul %49, %51, %cst_37 {dimension_numbers = #tpu.dot_dimension_numbers<[1], [1], [0], [0], [0, 0, 1, 0], [], []>} : vector<8x8xf32>, vector<12x8xf32>, vector<8x12xf32> -> vector<8x12xf32>
    %cst_38 = arith.constant dense<0xFF800000> : vector<8xf32>
    %55 = vector.multi_reduction <maximumf>, %54, %cst_38 [1] : vector<8x12xf32> to vector<8xf32>
    %56 = vector.shape_cast %55 : vector<8xf32> to vector<8x1xf32>
    %57 = vector.broadcast %56 : vector<8x1xf32> to vector<8x12xf32>
    %58 = arith.subf %54, %57 : vector<8x12xf32>
    %59 = math.exp %58 : vector<8x12xf32>
    %cst_39 = arith.constant dense<0.000000e+00> : vector<8xf32>
    %60 = vector.multi_reduction <add>, %59, %cst_39 [1] : vector<8x12xf32> to vector<8xf32>
    %61 = vector.shape_cast %60 : vector<8xf32> to vector<8x1xf32>
    %cst_40 = arith.constant dense<0.000000e+00> : vector<8x8xf32>
    %62 = tpu.matmul %59, %53, %cst_40 {dimension_numbers = #tpu.dot_dimension_numbers<[1], [0], [0], [1], [0, 0, 1, 1], [], []>} : vector<8x12xf32>, vector<12x8xf32>, vector<8x8xf32> -> vector<8x8xf32>
    %63 = tpu.reciprocal %61 {approx = true} : vector<8x1xf32> -> vector<8x1xf32>
    %64 = vector.broadcast %63 : vector<8x1xf32> to vector<8x8xf32>
    %65 = arith.mulf %62, %64 : vector<8x8xf32>
    %c0_41 = arith.constant 0 : index
    %c0_42 = arith.constant 0 : index
    %c16_43 = arith.constant 16 : index
    %66 = vector.load %arg3[%c0_41, %c0_42, %c16_43] : memref<1x8x32xf32, #tpu.memory_space<vmem>>, vector<1x8x8xf32>
    %67 = vector.shape_cast %66 : vector<1x8x8xf32> to vector<8x8xf32>
    %68 = vector.shape_cast %65 : vector<8x8xf32> to vector<1x8x8xf32>
    tpu.vector_store %arg3[%c0_41, %c0_42, %c16_43], %68 {strides = array<i32>} : memref<1x8x32xf32, #tpu.memory_space<vmem>>, vector<1x8x8xf32>,
    %c0_44 = arith.constant 0 : index
    %c0_45 = arith.constant 0 : index
    %c24 = arith.constant 24 : index
    %69 = vector.load %arg1[%c0_44, %c0_45, %c24] : memref<1x8x32xf32, #tpu.memory_space<vmem>>, vector<1x8x8xf32>
    %70 = vector.shape_cast %69 : vector<1x8x8xf32> to vector<8x8xf32>
    %cst_46 = arith.constant 0.353553385 : f32
    %71 = vector.broadcast %cst_46 : f32 to vector<8x8xf32>
    %72 = arith.mulf %70, %71 : vector<8x8xf32>
    %c0_47 = arith.constant 0 : index
    %c0_48 = arith.constant 0 : index
    %c24_49 = arith.constant 24 : index
    %73 = vector.load %arg2[%c0_47, %c0_48, %c24_49] : memref<1x12x64xf32, #tpu.memory_space<vmem>>, vector<1x12x8xf32>
    %74 = vector.shape_cast %73 : vector<1x12x8xf32> to vector<12x8xf32>
    %c0_50 = arith.constant 0 : index
    %c0_51 = arith.constant 0 : index
    %c56 = arith.constant 56 : index
    %75 = vector.load %arg2[%c0_50, %c0_51, %c56] : memref<1x12x64xf32, #tpu.memory_space<vmem>>, vector<1x12x8xf32>
    %76 = vector.shape_cast %75 : vector<1x12x8xf32> to vector<12x8xf32>
    %cst_52 = arith.constant dense<0.000000e+00> : vector<8x12xf32>
    %77 = tpu.matmul %72, %74, %cst_52 {dimension_numbers = #tpu.dot_dimension_numbers<[1], [1], [0], [0], [0, 0, 1, 0], [], []>} : vector<8x8xf32>, vector<12x8xf32>, vector<8x12xf32> -> vector<8x12xf32>
    %cst_53 = arith.constant dense<0xFF800000> : vector<8xf32>
    %78 = vector.multi_reduction <maximumf>, %77, %cst_53 [1] : vector<8x12xf32> to vector<8xf32>
    %79 = vector.shape_cast %78 : vector<8xf32> to vector<8x1xf32>
    %80 = vector.broadcast %79 : vector<8x1xf32> to vector<8x12xf32>
    %81 = arith.subf %77, %80 : vector<8x12xf32>
    %82 = math.exp %81 : vector<8x12xf32>
    %cst_54 = arith.constant dense<0.000000e+00> : vector<8xf32>
    %83 = vector.multi_reduction <add>, %82, %cst_54 [1] : vector<8x12xf32> to vector<8xf32>
    %84 = vector.shape_cast %83 : vector<8xf32> to vector<8x1xf32>
    %cst_55 = arith.constant dense<0.000000e+00> : vector<8x8xf32>
    %85 = tpu.matmul %82, %76, %cst_55 {dimension_numbers = #tpu.dot_dimension_numbers<[1], [0], [0], [1], [0, 0, 1, 1], [], []>} : vector<8x12xf32>, vector<12x8xf32>, vector<8x8xf32> -> vector<8x8xf32>
    %86 = tpu.reciprocal %84 {approx = true} : vector<8x1xf32> -> vector<8x1xf32>
    %87 = vector.broadcast %86 : vector<8x1xf32> to vector<8x8xf32>
    %88 = arith.mulf %85, %87 : vector<8x8xf32>
    %c0_56 = arith.constant 0 : index
    %c0_57 = arith.constant 0 : index
    %c24_58 = arith.constant 24 : index
    %89 = vector.load %arg3[%c0_56, %c0_57, %c24_58] : memref<1x8x32xf32, #tpu.memory_space<vmem>>, vector<1x8x8xf32>
    %90 = vector.shape_cast %89 : vector<1x8x8xf32> to vector<8x8xf32>
    %91 = vector.shape_cast %88 : vector<8x8xf32> to vector<1x8x8xf32>
    tpu.vector_store %arg3[%c0_56, %c0_57, %c24_58], %91 {strides = array<i32>} : memref<1x8x32xf32, #tpu.memory_space<vmem>>, vector<1x8x8xf32>,
    return
  }
  func.func @transform_0(%arg0: i32) -> (i32, i32, i32) {
    %c0_i32 = arith.constant 0 : i32
    %c0_i32_0 = arith.constant 0 : i32
    %c0_i32_1 = arith.constant 0 : i32
    return %arg0, %c0_i32, %c0_i32_0 : i32, i32, i32
  }
  func.func @transform_1(%arg0: i32) -> (i32, i32, i32) {
    %c0_i32 = arith.constant 0 : i32
    %c0_i32_0 = arith.constant 0 : i32
    %c0_i32_1 = arith.constant 0 : i32
    return %arg0, %c0_i32, %c0_i32_0 : i32, i32, i32
  }
  func.func @transform_2(%arg0: i32) -> (i32, i32, i32) {
    %c0_i32 = arith.constant 0 : i32
    %c0_i32_0 = arith.constant 0 : i32
    %c0_i32_1 = arith.constant 0 : i32
    return %arg0, %c0_i32, %c0_i32_0 : i32, i32, i32
  }
}

module attributes {stable_mosaic.version = 11 : i64} {
  func.func @_matmul_kernel(%arg0: i32, %arg1: i32, %arg2: i32, %arg3: memref<16x32xf32, #tpu.memory_space<vmem>>, %arg4: memref<32x32xf32, #tpu.memory_space<vmem>>, %arg5: memref<1x32xf32, #tpu.memory_space<vmem>>, %arg6: memref<16x32xf32, #tpu.memory_space<vmem>>, %arg7: memref<16x32xf32, #tpu.memory_space<vmem>>) attributes {dimension_semantics = [#tpu.dimension_semantics<parallel>, #tpu.dimension_semantics<parallel>, #tpu.dimension_semantics<arbitrary>], iteration_bounds = array<i64: 1, 1, 1>, scalar_prefetch = 0 : i64, scratch_operands = 1 : i64, tpu.core_type = #tpu.core_type<tc>, window_params = [{transform_indices = @transform_0, window_bounds = array<i64: 16, 32>}, {transform_indices = @transform_1, window_bounds = array<i64: 32, 32>}, {transform_indices = @transform_2, window_bounds = array<i64: 1, 32>}, {transform_indices = @transform_3, window_bounds = array<i64: 16, 32>}]} {
    %c0_i32 = arith.constant 0 : i32
    %0 = arith.cmpi eq, %arg2, %c0_i32 : i32
    %1 = arith.extui %0 : i1 to i32
    %c0_i32_0 = arith.constant 0 : i32
    %2 = arith.cmpi ne, %1, %c0_i32_0 : i32
    scf.if %2 {
      %cst_10 = arith.constant 0.000000e+00 : f32
      %12 = vector.broadcast %cst_10 : f32 to vector<16x32xf32>
      %c0_11 = arith.constant 0 : index
      %c0_12 = arith.constant 0 : index
      %13 = vector.load %arg7[%c0_11, %c0_12] : memref<16x32xf32, #tpu.memory_space<vmem>>, vector<16x32xf32>
      tpu.vector_store %arg7[%c0_11, %c0_12], %12 {strides = array<i32>} : memref<16x32xf32, #tpu.memory_space<vmem>>, vector<16x32xf32>,
    } else {
    }
    %c0 = arith.constant 0 : index
    %c0_1 = arith.constant 0 : index
    %3 = vector.load %arg7[%c0, %c0_1] : memref<16x32xf32, #tpu.memory_space<vmem>>, vector<16x32xf32>
    %c0_2 = arith.constant 0 : index
    %c0_3 = arith.constant 0 : index
    %4 = vector.load %arg3[%c0_2, %c0_3] : memref<16x32xf32, #tpu.memory_space<vmem>>, vector<16x32xf32>
    %c0_4 = arith.constant 0 : index
    %c0_5 = arith.constant 0 : index
    %5 = vector.load %arg4[%c0_4, %c0_5] : memref<32x32xf32, #tpu.memory_space<vmem>>, vector<32x32xf32>
    %cst = arith.constant dense<0.000000e+00> : vector<16x32xf32>
    %6 = tpu.matmul %4, %5, %cst {dimension_numbers = #tpu.dot_dimension_numbers<[1], [0], [0], [1], [0, 0, 1, 1], [], []>} : vector<16x32xf32>, vector<32x32xf32>, vector<16x32xf32> -> vector<16x32xf32>
    %7 = arith.addf %3, %6 : vector<16x32xf32>
    %c0_6 = arith.constant 0 : index
    %c0_7 = arith.constant 0 : index
    %8 = vector.load %arg7[%c0_6, %c0_7] : memref<16x32xf32, #tpu.memory_space<vmem>>, vector<16x32xf32>
    tpu.vector_store %arg7[%c0_6, %c0_7], %7 {strides = array<i32>} : memref<16x32xf32, #tpu.memory_space<vmem>>, vector<16x32xf32>,
    %c0_i32_8 = arith.constant 0 : i32
    %9 = arith.cmpi eq, %arg2, %c0_i32_8 : i32
    %10 = arith.extui %9 : i1 to i32
    %c0_i32_9 = arith.constant 0 : i32
    %11 = arith.cmpi ne, %10, %c0_i32_9 : i32
    scf.if %11 {
      %c0_10 = arith.constant 0 : index
      %c0_11 = arith.constant 0 : index
      %12 = vector.load %arg7[%c0_10, %c0_11] : memref<16x32xf32, #tpu.memory_space<vmem>>, vector<16x32xf32>
      %c0_12 = arith.constant 0 : index
      %c0_13 = arith.constant 0 : index
      %13 = vector.load %arg5[%c0_12, %c0_13] : memref<1x32xf32, #tpu.memory_space<vmem>>, vector<1x32xf32>
      %14 = vector.broadcast %13 : vector<1x32xf32> to vector<16x32xf32>
      %15 = arith.addf %12, %14 : vector<16x32xf32>
      %c0_14 = arith.constant 0 : index
      %c0_15 = arith.constant 0 : index
      %16 = vector.load %arg6[%c0_14, %c0_15] : memref<16x32xf32, #tpu.memory_space<vmem>>, vector<16x32xf32>
      tpu.vector_store %arg6[%c0_14, %c0_15], %15 {strides = array<i32>} : memref<16x32xf32, #tpu.memory_space<vmem>>, vector<16x32xf32>,
    } else {
    }
    return
  }
  func.func @transform_0(%arg0: i32, %arg1: i32, %arg2: i32) -> (i32, i32) {
    %c0_i32 = arith.constant 0 : i32
    return %arg0, %arg2 : i32, i32
  }
  func.func @transform_1(%arg0: i32, %arg1: i32, %arg2: i32) -> (i32, i32) {
    %c0_i32 = arith.constant 0 : i32
    return %arg2, %arg1 : i32, i32
  }
  func.func @transform_2(%arg0: i32, %arg1: i32, %arg2: i32) -> (i32, i32) {
    %c0_i32 = arith.constant 0 : i32
    %c0_i32_0 = arith.constant 0 : i32
    return %c0_i32, %arg1 : i32, i32
  }
  func.func @transform_3(%arg0: i32, %arg1: i32, %arg2: i32) -> (i32, i32) {
    %c0_i32 = arith.constant 0 : i32
    return %arg0, %arg1 : i32, i32
  }
}

module attributes {stable_mosaic.version = 11 : i64} {
  func.func @_matmul_res_ln_kernel(%arg0: i32, %arg1: i32, %arg2: memref<16x32xf32, #tpu.memory_space<vmem>>, %arg3: memref<32x32xf32, #tpu.memory_space<vmem>>, %arg4: memref<16x32xf32, #tpu.memory_space<vmem>>, %arg5: memref<1x32xf32, #tpu.memory_space<vmem>>, %arg6: memref<1x32xf32, #tpu.memory_space<vmem>>, %arg7: memref<1x32xf32, #tpu.memory_space<vmem>>, %arg8: memref<16x32xf32, #tpu.memory_space<vmem>>, %arg9: memref<16x32xf32, #tpu.memory_space<vmem>>) attributes {dimension_semantics = [#tpu.dimension_semantics<parallel>, #tpu.dimension_semantics<arbitrary>], iteration_bounds = array<i64: 1, 1>, scalar_prefetch = 0 : i64, scratch_operands = 1 : i64, tpu.core_type = #tpu.core_type<tc>, window_params = [{transform_indices = @transform_0, window_bounds = array<i64: 16, 32>}, {transform_indices = @transform_1, window_bounds = array<i64: 32, 32>}, {transform_indices = @transform_2, window_bounds = array<i64: 16, 32>}, {pipeline_mode = #tpu.pipeline_mode<synchronous>, transform_indices = @transform_3, window_bounds = array<i64: 1, 32>}, {pipeline_mode = #tpu.pipeline_mode<synchronous>, transform_indices = @transform_4, window_bounds = array<i64: 1, 32>}, {pipeline_mode = #tpu.pipeline_mode<synchronous>, transform_indices = @transform_5, window_bounds = array<i64: 1, 32>}, {transform_indices = @transform_6, window_bounds = array<i64: 16, 32>}]} {
    %c0_i32 = arith.constant 0 : i32
    %0 = arith.cmpi eq, %arg1, %c0_i32 : i32
    %1 = arith.extui %0 : i1 to i32
    %c0_i32_0 = arith.constant 0 : i32
    %2 = arith.cmpi ne, %1, %c0_i32_0 : i32
    scf.if %2 {
      %cst_10 = arith.constant 0.000000e+00 : f32
      %12 = vector.broadcast %cst_10 : f32 to vector<16x32xf32>
      %c0_11 = arith.constant 0 : index
      %c0_12 = arith.constant 0 : index
      %13 = vector.load %arg9[%c0_11, %c0_12] : memref<16x32xf32, #tpu.memory_space<vmem>>, vector<16x32xf32>
      tpu.vector_store %arg9[%c0_11, %c0_12], %12 {strides = array<i32>} : memref<16x32xf32, #tpu.memory_space<vmem>>, vector<16x32xf32>,
    } else {
    }
    %c0 = arith.constant 0 : index
    %c0_1 = arith.constant 0 : index
    %3 = vector.load %arg9[%c0, %c0_1] : memref<16x32xf32, #tpu.memory_space<vmem>>, vector<16x32xf32>
    %c0_2 = arith.constant 0 : index
    %c0_3 = arith.constant 0 : index
    %4 = vector.load %arg2[%c0_2, %c0_3] : memref<16x32xf32, #tpu.memory_space<vmem>>, vector<16x32xf32>
    %c0_4 = arith.constant 0 : index
    %c0_5 = arith.constant 0 : index
    %5 = vector.load %arg3[%c0_4, %c0_5] : memref<32x32xf32, #tpu.memory_space<vmem>>, vector<32x32xf32>
    %cst = arith.constant dense<0.000000e+00> : vector<16x32xf32>
    %6 = tpu.matmul %4, %5, %cst {dimension_numbers = #tpu.dot_dimension_numbers<[1], [0], [0], [1], [0, 0, 1, 1], [], []>} : vector<16x32xf32>, vector<32x32xf32>, vector<16x32xf32> -> vector<16x32xf32>
    %7 = arith.addf %3, %6 : vector<16x32xf32>
    %c0_6 = arith.constant 0 : index
    %c0_7 = arith.constant 0 : index
    %8 = vector.load %arg9[%c0_6, %c0_7] : memref<16x32xf32, #tpu.memory_space<vmem>>, vector<16x32xf32>
    tpu.vector_store %arg9[%c0_6, %c0_7], %7 {strides = array<i32>} : memref<16x32xf32, #tpu.memory_space<vmem>>, vector<16x32xf32>,
    %c0_i32_8 = arith.constant 0 : i32
    %9 = arith.cmpi eq, %arg1, %c0_i32_8 : i32
    %10 = arith.extui %9 : i1 to i32
    %c0_i32_9 = arith.constant 0 : i32
    %11 = arith.cmpi ne, %10, %c0_i32_9 : i32
    scf.if %11 {
      %c0_10 = arith.constant 0 : index
      %c0_11 = arith.constant 0 : index
      %12 = vector.load %arg9[%c0_10, %c0_11] : memref<16x32xf32, #tpu.memory_space<vmem>>, vector<16x32xf32>
      %c0_12 = arith.constant 0 : index
      %c0_13 = arith.constant 0 : index
      %13 = vector.load %arg7[%c0_12, %c0_13] : memref<1x32xf32, #tpu.memory_space<vmem>>, vector<1x32xf32>
      %14 = vector.broadcast %13 : vector<1x32xf32> to vector<16x32xf32>
      %15 = arith.addf %12, %14 : vector<16x32xf32>
      %c0_14 = arith.constant 0 : index
      %c0_15 = arith.constant 0 : index
      %16 = vector.load %arg4[%c0_14, %c0_15] : memref<16x32xf32, #tpu.memory_space<vmem>>, vector<16x32xf32>
      %17 = arith.addf %16, %15 : vector<16x32xf32>
      %cst_16 = arith.constant dense<0.000000e+00> : vector<16xf32>
      %18 = vector.multi_reduction <add>, %17, %cst_16 [1] : vector<16x32xf32> to vector<16xf32>
      %19 = vector.shape_cast %18 : vector<16xf32> to vector<16x1xf32>
      %cst_17 = arith.constant 3.200000e+01 : f32
      %20 = vector.broadcast %cst_17 : f32 to vector<16x1xf32>
      %21 = arith.divf %19, %20 : vector<16x1xf32>
      %22 = vector.broadcast %21 : vector<16x1xf32> to vector<16x32xf32>
      %23 = arith.subf %17, %22 : vector<16x32xf32>
      %24 = arith.mulf %23, %23 : vector<16x32xf32>
      %cst_18 = arith.constant dense<0.000000e+00> : vector<16xf32>
      %25 = vector.multi_reduction <add>, %24, %cst_18 [1] : vector<16x32xf32> to vector<16xf32>
      %26 = vector.shape_cast %25 : vector<16xf32> to vector<16x1xf32>
      %cst_19 = arith.constant 3.200000e+01 : f32
      %27 = vector.broadcast %cst_19 : f32 to vector<16x1xf32>
      %28 = arith.divf %26, %27 : vector<16x1xf32>
      %cst_20 = arith.constant 9.99999974E-6 : f32
      %29 = vector.broadcast %cst_20 : f32 to vector<16x1xf32>
      %30 = arith.addf %28, %29 : vector<16x1xf32>
      %31 = math.rsqrt %30 : vector<16x1xf32>
      %32 = vector.broadcast %31 : vector<16x1xf32> to vector<16x32xf32>
      %33 = arith.mulf %23, %32 : vector<16x32xf32>
      %c0_21 = arith.constant 0 : index
      %c0_22 = arith.constant 0 : index
      %34 = vector.load %arg5[%c0_21, %c0_22] : memref<1x32xf32, #tpu.memory_space<vmem>>, vector<1x32xf32>
      %35 = vector.broadcast %34 : vector<1x32xf32> to vector<16x32xf32>
      %36 = arith.mulf %33, %35 : vector<16x32xf32>
      %c0_23 = arith.constant 0 : index
      %c0_24 = arith.constant 0 : index
      %37 = vector.load %arg6[%c0_23, %c0_24] : memref<1x32xf32, #tpu.memory_space<vmem>>, vector<1x32xf32>
      %38 = vector.broadcast %37 : vector<1x32xf32> to vector<16x32xf32>
      %39 = arith.addf %36, %38 : vector<16x32xf32>
      %c0_25 = arith.constant 0 : index
      %c0_26 = arith.constant 0 : index
      %40 = vector.load %arg8[%c0_25, %c0_26] : memref<16x32xf32, #tpu.memory_space<vmem>>, vector<16x32xf32>
      tpu.vector_store %arg8[%c0_25, %c0_26], %39 {strides = array<i32>} : memref<16x32xf32, #tpu.memory_space<vmem>>, vector<16x32xf32>,
    } else {
    }
    return
  }
  func.func @transform_0(%arg0: i32, %arg1: i32) -> (i32, i32) {
    %c0_i32 = arith.constant 0 : i32
    return %arg0, %arg1 : i32, i32
  }
  func.func @transform_1(%arg0: i32, %arg1: i32) -> (i32, i32) {
    %c0_i32 = arith.constant 0 : i32
    %c0_i32_0 = arith.constant 0 : i32
    return %arg1, %c0_i32 : i32, i32
  }
  func.func @transform_2(%arg0: i32, %arg1: i32) -> (i32, i32) {
    %c0_i32 = arith.constant 0 : i32
    %c0_i32_0 = arith.constant 0 : i32
    return %arg0, %c0_i32 : i32, i32
  }
  func.func @transform_3(%arg0: i32, %arg1: i32) -> (i32, i32) {
    %c0_i32 = arith.constant 0 : i32
    %c0_i32_0 = arith.constant 0 : i32
    %c0_i32_1 = arith.constant 0 : i32
    return %c0_i32, %c0_i32_0 : i32, i32
  }
  func.func @transform_4(%arg0: i32, %arg1: i32) -> (i32, i32) {
    %c0_i32 = arith.constant 0 : i32
    %c0_i32_0 = arith.constant 0 : i32
    %c0_i32_1 = arith.constant 0 : i32
    return %c0_i32, %c0_i32_0 : i32, i32
  }
  func.func @transform_5(%arg0: i32, %arg1: i32) -> (i32, i32) {
    %c0_i32 = arith.constant 0 : i32
    %c0_i32_0 = arith.constant 0 : i32
    %c0_i32_1 = arith.constant 0 : i32
    return %c0_i32, %c0_i32_0 : i32, i32
  }
  func.func @transform_6(%arg0: i32, %arg1: i32) -> (i32, i32) {
    %c0_i32 = arith.constant 0 : i32
    %c0_i32_0 = arith.constant 0 : i32
    return %arg0, %c0_i32 : i32, i32
  }
}

module attributes {stable_mosaic.version = 11 : i64} {
  func.func @_matmul_kernel(%arg0: i32, %arg1: i32, %arg2: i32, %arg3: memref<16x32xf32, #tpu.memory_space<vmem>>, %arg4: memref<32x64xf32, #tpu.memory_space<vmem>>, %arg5: memref<1x64xf32, #tpu.memory_space<vmem>>, %arg6: memref<16x64xf32, #tpu.memory_space<vmem>>, %arg7: memref<16x64xf32, #tpu.memory_space<vmem>>) attributes {dimension_semantics = [#tpu.dimension_semantics<parallel>, #tpu.dimension_semantics<parallel>, #tpu.dimension_semantics<arbitrary>], iteration_bounds = array<i64: 1, 1, 1>, scalar_prefetch = 0 : i64, scratch_operands = 1 : i64, tpu.core_type = #tpu.core_type<tc>, window_params = [{transform_indices = @transform_0, window_bounds = array<i64: 16, 32>}, {transform_indices = @transform_1, window_bounds = array<i64: 32, 64>}, {transform_indices = @transform_2, window_bounds = array<i64: 1, 64>}, {transform_indices = @transform_3, window_bounds = array<i64: 16, 64>}]} {
    %c0_i32 = arith.constant 0 : i32
    %0 = arith.cmpi eq, %arg2, %c0_i32 : i32
    %1 = arith.extui %0 : i1 to i32
    %c0_i32_0 = arith.constant 0 : i32
    %2 = arith.cmpi ne, %1, %c0_i32_0 : i32
    scf.if %2 {
      %cst_10 = arith.constant 0.000000e+00 : f32
      %12 = vector.broadcast %cst_10 : f32 to vector<16x64xf32>
      %c0_11 = arith.constant 0 : index
      %c0_12 = arith.constant 0 : index
      %13 = vector.load %arg7[%c0_11, %c0_12] : memref<16x64xf32, #tpu.memory_space<vmem>>, vector<16x64xf32>
      tpu.vector_store %arg7[%c0_11, %c0_12], %12 {strides = array<i32>} : memref<16x64xf32, #tpu.memory_space<vmem>>, vector<16x64xf32>,
    } else {
    }
    %c0 = arith.constant 0 : index
    %c0_1 = arith.constant 0 : index
    %3 = vector.load %arg7[%c0, %c0_1] : memref<16x64xf32, #tpu.memory_space<vmem>>, vector<16x64xf32>
    %c0_2 = arith.constant 0 : index
    %c0_3 = arith.constant 0 : index
    %4 = vector.load %arg3[%c0_2, %c0_3] : memref<16x32xf32, #tpu.memory_space<vmem>>, vector<16x32xf32>
    %c0_4 = arith.constant 0 : index
    %c0_5 = arith.constant 0 : index
    %5 = vector.load %arg4[%c0_4, %c0_5] : memref<32x64xf32, #tpu.memory_space<vmem>>, vector<32x64xf32>
    %cst = arith.constant dense<0.000000e+00> : vector<16x64xf32>
    %6 = tpu.matmul %4, %5, %cst {dimension_numbers = #tpu.dot_dimension_numbers<[1], [0], [0], [1], [0, 0, 1, 1], [], []>} : vector<16x32xf32>, vector<32x64xf32>, vector<16x64xf32> -> vector<16x64xf32>
    %7 = arith.addf %3, %6 : vector<16x64xf32>
    %c0_6 = arith.constant 0 : index
    %c0_7 = arith.constant 0 : index
    %8 = vector.load %arg7[%c0_6, %c0_7] : memref<16x64xf32, #tpu.memory_space<vmem>>, vector<16x64xf32>
    tpu.vector_store %arg7[%c0_6, %c0_7], %7 {strides = array<i32>} : memref<16x64xf32, #tpu.memory_space<vmem>>, vector<16x64xf32>,
    %c0_i32_8 = arith.constant 0 : i32
    %9 = arith.cmpi eq, %arg2, %c0_i32_8 : i32
    %10 = arith.extui %9 : i1 to i32
    %c0_i32_9 = arith.constant 0 : i32
    %11 = arith.cmpi ne, %10, %c0_i32_9 : i32
    scf.if %11 {
      %c0_10 = arith.constant 0 : index
      %c0_11 = arith.constant 0 : index
      %12 = vector.load %arg7[%c0_10, %c0_11] : memref<16x64xf32, #tpu.memory_space<vmem>>, vector<16x64xf32>
      %c0_12 = arith.constant 0 : index
      %c0_13 = arith.constant 0 : index
      %13 = vector.load %arg5[%c0_12, %c0_13] : memref<1x64xf32, #tpu.memory_space<vmem>>, vector<1x64xf32>
      %14 = vector.broadcast %13 : vector<1x64xf32> to vector<16x64xf32>
      %15 = arith.addf %12, %14 : vector<16x64xf32>
      %cst_14 = arith.constant 0.000000e+00 : f32
      %16 = vector.broadcast %cst_14 : f32 to vector<16x64xf32>
      %17 = arith.maximumf %15, %16 : vector<16x64xf32>
      %c0_15 = arith.constant 0 : index
      %c0_16 = arith.constant 0 : index
      %18 = vector.load %arg6[%c0_15, %c0_16] : memref<16x64xf32, #tpu.memory_space<vmem>>, vector<16x64xf32>
      tpu.vector_store %arg6[%c0_15, %c0_16], %17 {strides = array<i32>} : memref<16x64xf32, #tpu.memory_space<vmem>>, vector<16x64xf32>,
    } else {
    }
    return
  }
  func.func @transform_0(%arg0: i32, %arg1: i32, %arg2: i32) -> (i32, i32) {
    %c0_i32 = arith.constant 0 : i32
    return %arg0, %arg2 : i32, i32
  }
  func.func @transform_1(%arg0: i32, %arg1: i32, %arg2: i32) -> (i32, i32) {
    %c0_i32 = arith.constant 0 : i32
    return %arg2, %arg1 : i32, i32
  }
  func.func @transform_2(%arg0: i32, %arg1: i32, %arg2: i32) -> (i32, i32) {
    %c0_i32 = arith.constant 0 : i32
    %c0_i32_0 = arith.constant 0 : i32
    return %c0_i32, %arg1 : i32, i32
  }
  func.func @transform_3(%arg0: i32, %arg1: i32, %arg2: i32) -> (i32, i32) {
    %c0_i32 = arith.constant 0 : i32
    return %arg0, %arg1 : i32, i32
  }
}

module attributes {stable_mosaic.version = 11 : i64} {
  func.func @_matmul_kernel(%arg0: i32, %arg1: i32, %arg2: i32, %arg3: memref<16x32xf32, #tpu.memory_space<vmem>>, %arg4: memref<32x96xf32, #tpu.memory_space<vmem>>, %arg5: memref<16x96xf32, #tpu.memory_space<vmem>>, %arg6: memref<16x96xf32, #tpu.memory_space<vmem>>) attributes {dimension_semantics = [#tpu.dimension_semantics<parallel>, #tpu.dimension_semantics<parallel>, #tpu.dimension_semantics<arbitrary>], iteration_bounds = array<i64: 1, 1, 1>, scalar_prefetch = 0 : i64, scratch_operands = 1 : i64, tpu.core_type = #tpu.core_type<tc>, window_params = [{transform_indices = @transform_0, window_bounds = array<i64: 16, 32>}, {transform_indices = @transform_1, window_bounds = array<i64: 32, 96>}, {transform_indices = @transform_2, window_bounds = array<i64: 16, 96>}]} {
    %c0_i32 = arith.constant 0 : i32
    %0 = arith.cmpi eq, %arg2, %c0_i32 : i32
    %1 = arith.extui %0 : i1 to i32
    %c0_i32_0 = arith.constant 0 : i32
    %2 = arith.cmpi ne, %1, %c0_i32_0 : i32
    scf.if %2 {
      %cst_10 = arith.constant 0.000000e+00 : f32
      %12 = vector.broadcast %cst_10 : f32 to vector<16x96xf32>
      %c0_11 = arith.constant 0 : index
      %c0_12 = arith.constant 0 : index
      %13 = vector.load %arg6[%c0_11, %c0_12] : memref<16x96xf32, #tpu.memory_space<vmem>>, vector<16x96xf32>
      tpu.vector_store %arg6[%c0_11, %c0_12], %12 {strides = array<i32>} : memref<16x96xf32, #tpu.memory_space<vmem>>, vector<16x96xf32>,
    } else {
    }
    %c0 = arith.constant 0 : index
    %c0_1 = arith.constant 0 : index
    %3 = vector.load %arg6[%c0, %c0_1] : memref<16x96xf32, #tpu.memory_space<vmem>>, vector<16x96xf32>
    %c0_2 = arith.constant 0 : index
    %c0_3 = arith.constant 0 : index
    %4 = vector.load %arg3[%c0_2, %c0_3] : memref<16x32xf32, #tpu.memory_space<vmem>>, vector<16x32xf32>
    %c0_4 = arith.constant 0 : index
    %c0_5 = arith.constant 0 : index
    %5 = vector.load %arg4[%c0_4, %c0_5] : memref<32x96xf32, #tpu.memory_space<vmem>>, vector<32x96xf32>
    %cst = arith.constant dense<0.000000e+00> : vector<16x96xf32>
    %6 = tpu.matmul %4, %5, %cst {dimension_numbers = #tpu.dot_dimension_numbers<[1], [0], [0], [1], [0, 0, 1, 1], [], []>} : vector<16x32xf32>, vector<32x96xf32>, vector<16x96xf32> -> vector<16x96xf32>
    %7 = arith.addf %3, %6 : vector<16x96xf32>
    %c0_6 = arith.constant 0 : index
    %c0_7 = arith.constant 0 : index
    %8 = vector.load %arg6[%c0_6, %c0_7] : memref<16x96xf32, #tpu.memory_space<vmem>>, vector<16x96xf32>
    tpu.vector_store %arg6[%c0_6, %c0_7], %7 {strides = array<i32>} : memref<16x96xf32, #tpu.memory_space<vmem>>, vector<16x96xf32>,
    %c0_i32_8 = arith.constant 0 : i32
    %9 = arith.cmpi eq, %arg2, %c0_i32_8 : i32
    %10 = arith.extui %9 : i1 to i32
    %c0_i32_9 = arith.constant 0 : i32
    %11 = arith.cmpi ne, %10, %c0_i32_9 : i32
    scf.if %11 {
      %c0_10 = arith.constant 0 : index
      %c0_11 = arith.constant 0 : index
      %12 = vector.load %arg6[%c0_10, %c0_11] : memref<16x96xf32, #tpu.memory_space<vmem>>, vector<16x96xf32>
      %c0_12 = arith.constant 0 : index
      %c0_13 = arith.constant 0 : index
      %13 = vector.load %arg5[%c0_12, %c0_13] : memref<16x96xf32, #tpu.memory_space<vmem>>, vector<16x96xf32>
      tpu.vector_store %arg5[%c0_12, %c0_13], %12 {strides = array<i32>} : memref<16x96xf32, #tpu.memory_space<vmem>>, vector<16x96xf32>,
    } else {
    }
    return
  }
  func.func @transform_0(%arg0: i32, %arg1: i32, %arg2: i32) -> (i32, i32) {
    %c0_i32 = arith.constant 0 : i32
    return %arg0, %arg2 : i32, i32
  }
  func.func @transform_1(%arg0: i32, %arg1: i32, %arg2: i32) -> (i32, i32) {
    %c0_i32 = arith.constant 0 : i32
    return %arg2, %arg1 : i32, i32
  }
  func.func @transform_2(%arg0: i32, %arg1: i32, %arg2: i32) -> (i32, i32) {
    %c0_i32 = arith.constant 0 : i32
    return %arg0, %arg1 : i32, i32
  }
}

module attributes {stable_mosaic.version = 11 : i64} {
  func.func @_matmul_res_ln_kernel(%arg0: i32, %arg1: i32, %arg2: memref<16x64xf32, #tpu.memory_space<vmem>>, %arg3: memref<64x32xf32, #tpu.memory_space<vmem>>, %arg4: memref<16x32xf32, #tpu.memory_space<vmem>>, %arg5: memref<1x32xf32, #tpu.memory_space<vmem>>, %arg6: memref<1x32xf32, #tpu.memory_space<vmem>>, %arg7: memref<1x32xf32, #tpu.memory_space<vmem>>, %arg8: memref<16x32xf32, #tpu.memory_space<vmem>>, %arg9: memref<16x32xf32, #tpu.memory_space<vmem>>) attributes {dimension_semantics = [#tpu.dimension_semantics<parallel>, #tpu.dimension_semantics<arbitrary>], iteration_bounds = array<i64: 1, 1>, scalar_prefetch = 0 : i64, scratch_operands = 1 : i64, tpu.core_type = #tpu.core_type<tc>, window_params = [{transform_indices = @transform_0, window_bounds = array<i64: 16, 64>}, {transform_indices = @transform_1, window_bounds = array<i64: 64, 32>}, {transform_indices = @transform_2, window_bounds = array<i64: 16, 32>}, {pipeline_mode = #tpu.pipeline_mode<synchronous>, transform_indices = @transform_3, window_bounds = array<i64: 1, 32>}, {pipeline_mode = #tpu.pipeline_mode<synchronous>, transform_indices = @transform_4, window_bounds = array<i64: 1, 32>}, {pipeline_mode = #tpu.pipeline_mode<synchronous>, transform_indices = @transform_5, window_bounds = array<i64: 1, 32>}, {transform_indices = @transform_6, window_bounds = array<i64: 16, 32>}]} {
    %c0_i32 = arith.constant 0 : i32
    %0 = arith.cmpi eq, %arg1, %c0_i32 : i32
    %1 = arith.extui %0 : i1 to i32
    %c0_i32_0 = arith.constant 0 : i32
    %2 = arith.cmpi ne, %1, %c0_i32_0 : i32
    scf.if %2 {
      %cst_10 = arith.constant 0.000000e+00 : f32
      %12 = vector.broadcast %cst_10 : f32 to vector<16x32xf32>
      %c0_11 = arith.constant 0 : index
      %c0_12 = arith.constant 0 : index
      %13 = vector.load %arg9[%c0_11, %c0_12] : memref<16x32xf32, #tpu.memory_space<vmem>>, vector<16x32xf32>
      tpu.vector_store %arg9[%c0_11, %c0_12], %12 {strides = array<i32>} : memref<16x32xf32, #tpu.memory_space<vmem>>, vector<16x32xf32>,
    } else {
    }
    %c0 = arith.constant 0 : index
    %c0_1 = arith.constant 0 : index
    %3 = vector.load %arg9[%c0, %c0_1] : memref<16x32xf32, #tpu.memory_space<vmem>>, vector<16x32xf32>
    %c0_2 = arith.constant 0 : index
    %c0_3 = arith.constant 0 : index
    %4 = vector.load %arg2[%c0_2, %c0_3] : memref<16x64xf32, #tpu.memory_space<vmem>>, vector<16x64xf32>
    %c0_4 = arith.constant 0 : index
    %c0_5 = arith.constant 0 : index
    %5 = vector.load %arg3[%c0_4, %c0_5] : memref<64x32xf32, #tpu.memory_space<vmem>>, vector<64x32xf32>
    %cst = arith.constant dense<0.000000e+00> : vector<16x32xf32>
    %6 = tpu.matmul %4, %5, %cst {dimension_numbers = #tpu.dot_dimension_numbers<[1], [0], [0], [1], [0, 0, 1, 1], [], []>} : vector<16x64xf32>, vector<64x32xf32>, vector<16x32xf32> -> vector<16x32xf32>
    %7 = arith.addf %3, %6 : vector<16x32xf32>
    %c0_6 = arith.constant 0 : index
    %c0_7 = arith.constant 0 : index
    %8 = vector.load %arg9[%c0_6, %c0_7] : memref<16x32xf32, #tpu.memory_space<vmem>>, vector<16x32xf32>
    tpu.vector_store %arg9[%c0_6, %c0_7], %7 {strides = array<i32>} : memref<16x32xf32, #tpu.memory_space<vmem>>, vector<16x32xf32>,
    %c0_i32_8 = arith.constant 0 : i32
    %9 = arith.cmpi eq, %arg1, %c0_i32_8 : i32
    %10 = arith.extui %9 : i1 to i32
    %c0_i32_9 = arith.constant 0 : i32
    %11 = arith.cmpi ne, %10, %c0_i32_9 : i32
    scf.if %11 {
      %c0_10 = arith.constant 0 : index
      %c0_11 = arith.constant 0 : index
      %12 = vector.load %arg9[%c0_10, %c0_11] : memref<16x32xf32, #tpu.memory_space<vmem>>, vector<16x32xf32>
      %c0_12 = arith.constant 0 : index
      %c0_13 = arith.constant 0 : index
      %13 = vector.load %arg7[%c0_12, %c0_13] : memref<1x32xf32, #tpu.memory_space<vmem>>, vector<1x32xf32>
      %14 = vector.broadcast %13 : vector<1x32xf32> to vector<16x32xf32>
      %15 = arith.addf %12, %14 : vector<16x32xf32>
      %c0_14 = arith.constant 0 : index
      %c0_15 = arith.constant 0 : index
      %16 = vector.load %arg4[%c0_14, %c0_15] : memref<16x32xf32, #tpu.memory_space<vmem>>, vector<16x32xf32>
      %17 = arith.addf %16, %15 : vector<16x32xf32>
      %cst_16 = arith.constant dense<0.000000e+00> : vector<16xf32>
      %18 = vector.multi_reduction <add>, %17, %cst_16 [1] : vector<16x32xf32> to vector<16xf32>
      %19 = vector.shape_cast %18 : vector<16xf32> to vector<16x1xf32>
      %cst_17 = arith.constant 3.200000e+01 : f32
      %20 = vector.broadcast %cst_17 : f32 to vector<16x1xf32>
      %21 = arith.divf %19, %20 : vector<16x1xf32>
      %22 = vector.broadcast %21 : vector<16x1xf32> to vector<16x32xf32>
      %23 = arith.subf %17, %22 : vector<16x32xf32>
      %24 = arith.mulf %23, %23 : vector<16x32xf32>
      %cst_18 = arith.constant dense<0.000000e+00> : vector<16xf32>
      %25 = vector.multi_reduction <add>, %24, %cst_18 [1] : vector<16x32xf32> to vector<16xf32>
      %26 = vector.shape_cast %25 : vector<16xf32> to vector<16x1xf32>
      %cst_19 = arith.constant 3.200000e+01 : f32
      %27 = vector.broadcast %cst_19 : f32 to vector<16x1xf32>
      %28 = arith.divf %26, %27 : vector<16x1xf32>
      %cst_20 = arith.constant 9.99999974E-6 : f32
      %29 = vector.broadcast %cst_20 : f32 to vector<16x1xf32>
      %30 = arith.addf %28, %29 : vector<16x1xf32>
      %31 = math.rsqrt %30 : vector<16x1xf32>
      %32 = vector.broadcast %31 : vector<16x1xf32> to vector<16x32xf32>
      %33 = arith.mulf %23, %32 : vector<16x32xf32>
      %c0_21 = arith.constant 0 : index
      %c0_22 = arith.constant 0 : index
      %34 = vector.load %arg5[%c0_21, %c0_22] : memref<1x32xf32, #tpu.memory_space<vmem>>, vector<1x32xf32>
      %35 = vector.broadcast %34 : vector<1x32xf32> to vector<16x32xf32>
      %36 = arith.mulf %33, %35 : vector<16x32xf32>
      %c0_23 = arith.constant 0 : index
      %c0_24 = arith.constant 0 : index
      %37 = vector.load %arg6[%c0_23, %c0_24] : memref<1x32xf32, #tpu.memory_space<vmem>>, vector<1x32xf32>
      %38 = vector.broadcast %37 : vector<1x32xf32> to vector<16x32xf32>
      %39 = arith.addf %36, %38 : vector<16x32xf32>
      %c0_25 = arith.constant 0 : index
      %c0_26 = arith.constant 0 : index
      %40 = vector.load %arg8[%c0_25, %c0_26] : memref<16x32xf32, #tpu.memory_space<vmem>>, vector<16x32xf32>
      tpu.vector_store %arg8[%c0_25, %c0_26], %39 {strides = array<i32>} : memref<16x32xf32, #tpu.memory_space<vmem>>, vector<16x32xf32>,
    } else {
    }
    return
  }
  func.func @transform_0(%arg0: i32, %arg1: i32) -> (i32, i32) {
    %c0_i32 = arith.constant 0 : i32
    return %arg0, %arg1 : i32, i32
  }
  func.func @transform_1(%arg0: i32, %arg1: i32) -> (i32, i32) {
    %c0_i32 = arith.constant 0 : i32
    %c0_i32_0 = arith.constant 0 : i32
    return %arg1, %c0_i32 : i32, i32
  }
  func.func @transform_2(%arg0: i32, %arg1: i32) -> (i32, i32) {
    %c0_i32 = arith.constant 0 : i32
    %c0_i32_0 = arith.constant 0 : i32
    return %arg0, %c0_i32 : i32, i32
  }
  func.func @transform_3(%arg0: i32, %arg1: i32) -> (i32, i32) {
    %c0_i32 = arith.constant 0 : i32
    %c0_i32_0 = arith.constant 0 : i32
    %c0_i32_1 = arith.constant 0 : i32
    return %c0_i32, %c0_i32_0 : i32, i32
  }
  func.func @transform_4(%arg0: i32, %arg1: i32) -> (i32, i32) {
    %c0_i32 = arith.constant 0 : i32
    %c0_i32_0 = arith.constant 0 : i32
    %c0_i32_1 = arith.constant 0 : i32
    return %c0_i32, %c0_i32_0 : i32, i32
  }
  func.func @transform_5(%arg0: i32, %arg1: i32) -> (i32, i32) {
    %c0_i32 = arith.constant 0 : i32
    %c0_i32_0 = arith.constant 0 : i32
    %c0_i32_1 = arith.constant 0 : i32
    return %c0_i32, %c0_i32_0 : i32, i32
  }
  func.func @transform_6(%arg0: i32, %arg1: i32) -> (i32, i32) {
    %c0_i32 = arith.constant 0 : i32
    %c0_i32_0 = arith.constant 0 : i32
    return %arg0, %c0_i32 : i32, i32
  }
}

module attributes {stable_mosaic.version = 11 : i64} {
  func.func @_matmul_kernel(%arg0: i32, %arg1: i32, %arg2: i32, %arg3: memref<16x32xf32, #tpu.memory_space<vmem>>, %arg4: memref<32x32xf32, #tpu.memory_space<vmem>>, %arg5: memref<1x32xf32, #tpu.memory_space<vmem>>, %arg6: memref<16x32xf32, #tpu.memory_space<vmem>>, %arg7: memref<16x32xf32, #tpu.memory_space<vmem>>) attributes {dimension_semantics = [#tpu.dimension_semantics<parallel>, #tpu.dimension_semantics<parallel>, #tpu.dimension_semantics<arbitrary>], iteration_bounds = array<i64: 1, 1, 1>, scalar_prefetch = 0 : i64, scratch_operands = 1 : i64, tpu.core_type = #tpu.core_type<tc>, window_params = [{transform_indices = @transform_0, window_bounds = array<i64: 16, 32>}, {transform_indices = @transform_1, window_bounds = array<i64: 32, 32>}, {transform_indices = @transform_2, window_bounds = array<i64: 1, 32>}, {transform_indices = @transform_3, window_bounds = array<i64: 16, 32>}]} {
    %c0_i32 = arith.constant 0 : i32
    %0 = arith.cmpi eq, %arg2, %c0_i32 : i32
    %1 = arith.extui %0 : i1 to i32
    %c0_i32_0 = arith.constant 0 : i32
    %2 = arith.cmpi ne, %1, %c0_i32_0 : i32
    scf.if %2 {
      %cst_10 = arith.constant 0.000000e+00 : f32
      %12 = vector.broadcast %cst_10 : f32 to vector<16x32xf32>
      %c0_11 = arith.constant 0 : index
      %c0_12 = arith.constant 0 : index
      %13 = vector.load %arg7[%c0_11, %c0_12] : memref<16x32xf32, #tpu.memory_space<vmem>>, vector<16x32xf32>
      tpu.vector_store %arg7[%c0_11, %c0_12], %12 {strides = array<i32>} : memref<16x32xf32, #tpu.memory_space<vmem>>, vector<16x32xf32>,
    } else {
    }
    %c0 = arith.constant 0 : index
    %c0_1 = arith.constant 0 : index
    %3 = vector.load %arg7[%c0, %c0_1] : memref<16x32xf32, #tpu.memory_space<vmem>>, vector<16x32xf32>
    %c0_2 = arith.constant 0 : index
    %c0_3 = arith.constant 0 : index
    %4 = vector.load %arg3[%c0_2, %c0_3] : memref<16x32xf32, #tpu.memory_space<vmem>>, vector<16x32xf32>
    %c0_4 = arith.constant 0 : index
    %c0_5 = arith.constant 0 : index
    %5 = vector.load %arg4[%c0_4, %c0_5] : memref<32x32xf32, #tpu.memory_space<vmem>>, vector<32x32xf32>
    %cst = arith.constant dense<0.000000e+00> : vector<16x32xf32>
    %6 = tpu.matmul %4, %5, %cst {dimension_numbers = #tpu.dot_dimension_numbers<[1], [0], [0], [1], [0, 0, 1, 1], [], []>} : vector<16x32xf32>, vector<32x32xf32>, vector<16x32xf32> -> vector<16x32xf32>
    %7 = arith.addf %3, %6 : vector<16x32xf32>
    %c0_6 = arith.constant 0 : index
    %c0_7 = arith.constant 0 : index
    %8 = vector.load %arg7[%c0_6, %c0_7] : memref<16x32xf32, #tpu.memory_space<vmem>>, vector<16x32xf32>
    tpu.vector_store %arg7[%c0_6, %c0_7], %7 {strides = array<i32>} : memref<16x32xf32, #tpu.memory_space<vmem>>, vector<16x32xf32>,
    %c0_i32_8 = arith.constant 0 : i32
    %9 = arith.cmpi eq, %arg2, %c0_i32_8 : i32
    %10 = arith.extui %9 : i1 to i32
    %c0_i32_9 = arith.constant 0 : i32
    %11 = arith.cmpi ne, %10, %c0_i32_9 : i32
    scf.if %11 {
      %c0_10 = arith.constant 0 : index
      %c0_11 = arith.constant 0 : index
      %12 = vector.load %arg7[%c0_10, %c0_11] : memref<16x32xf32, #tpu.memory_space<vmem>>, vector<16x32xf32>
      %c0_12 = arith.constant 0 : index
      %c0_13 = arith.constant 0 : index
      %13 = vector.load %arg5[%c0_12, %c0_13] : memref<1x32xf32, #tpu.memory_space<vmem>>, vector<1x32xf32>
      %14 = vector.broadcast %13 : vector<1x32xf32> to vector<16x32xf32>
      %15 = arith.addf %12, %14 : vector<16x32xf32>
      %c0_14 = arith.constant 0 : index
      %c0_15 = arith.constant 0 : index
      %16 = vector.load %arg6[%c0_14, %c0_15] : memref<16x32xf32, #tpu.memory_space<vmem>>, vector<16x32xf32>
      tpu.vector_store %arg6[%c0_14, %c0_15], %15 {strides = array<i32>} : memref<16x32xf32, #tpu.memory_space<vmem>>, vector<16x32xf32>,
    } else {
    }
    return
  }
  func.func @transform_0(%arg0: i32, %arg1: i32, %arg2: i32) -> (i32, i32) {
    %c0_i32 = arith.constant 0 : i32
    return %arg0, %arg2 : i32, i32
  }
  func.func @transform_1(%arg0: i32, %arg1: i32, %arg2: i32) -> (i32, i32) {
    %c0_i32 = arith.constant 0 : i32
    return %arg2, %arg1 : i32, i32
  }
  func.func @transform_2(%arg0: i32, %arg1: i32, %arg2: i32) -> (i32, i32) {
    %c0_i32 = arith.constant 0 : i32
    %c0_i32_0 = arith.constant 0 : i32
    return %c0_i32, %arg1 : i32, i32
  }
  func.func @transform_3(%arg0: i32, %arg1: i32, %arg2: i32) -> (i32, i32) {
    %c0_i32 = arith.constant 0 : i32
    return %arg0, %arg1 : i32, i32
  }
}

module attributes {stable_mosaic.version = 11 : i64} {
  func.func @_matmul_res_ln_kernel(%arg0: i32, %arg1: i32, %arg2: memref<16x32xf32, #tpu.memory_space<vmem>>, %arg3: memref<32x32xf32, #tpu.memory_space<vmem>>, %arg4: memref<16x32xf32, #tpu.memory_space<vmem>>, %arg5: memref<1x32xf32, #tpu.memory_space<vmem>>, %arg6: memref<1x32xf32, #tpu.memory_space<vmem>>, %arg7: memref<16x32xf32, #tpu.memory_space<vmem>>, %arg8: memref<16x32xf32, #tpu.memory_space<vmem>>) attributes {dimension_semantics = [#tpu.dimension_semantics<parallel>, #tpu.dimension_semantics<arbitrary>], iteration_bounds = array<i64: 1, 1>, scalar_prefetch = 0 : i64, scratch_operands = 1 : i64, tpu.core_type = #tpu.core_type<tc>, window_params = [{transform_indices = @transform_0, window_bounds = array<i64: 16, 32>}, {transform_indices = @transform_1, window_bounds = array<i64: 32, 32>}, {transform_indices = @transform_2, window_bounds = array<i64: 16, 32>}, {pipeline_mode = #tpu.pipeline_mode<synchronous>, transform_indices = @transform_3, window_bounds = array<i64: 1, 32>}, {pipeline_mode = #tpu.pipeline_mode<synchronous>, transform_indices = @transform_4, window_bounds = array<i64: 1, 32>}, {transform_indices = @transform_5, window_bounds = array<i64: 16, 32>}]} {
    %c0_i32 = arith.constant 0 : i32
    %0 = arith.cmpi eq, %arg1, %c0_i32 : i32
    %1 = arith.extui %0 : i1 to i32
    %c0_i32_0 = arith.constant 0 : i32
    %2 = arith.cmpi ne, %1, %c0_i32_0 : i32
    scf.if %2 {
      %cst_10 = arith.constant 0.000000e+00 : f32
      %12 = vector.broadcast %cst_10 : f32 to vector<16x32xf32>
      %c0_11 = arith.constant 0 : index
      %c0_12 = arith.constant 0 : index
      %13 = vector.load %arg8[%c0_11, %c0_12] : memref<16x32xf32, #tpu.memory_space<vmem>>, vector<16x32xf32>
      tpu.vector_store %arg8[%c0_11, %c0_12], %12 {strides = array<i32>} : memref<16x32xf32, #tpu.memory_space<vmem>>, vector<16x32xf32>,
    } else {
    }
    %c0 = arith.constant 0 : index
    %c0_1 = arith.constant 0 : index
    %3 = vector.load %arg8[%c0, %c0_1] : memref<16x32xf32, #tpu.memory_space<vmem>>, vector<16x32xf32>
    %c0_2 = arith.constant 0 : index
    %c0_3 = arith.constant 0 : index
    %4 = vector.load %arg2[%c0_2, %c0_3] : memref<16x32xf32, #tpu.memory_space<vmem>>, vector<16x32xf32>
    %c0_4 = arith.constant 0 : index
    %c0_5 = arith.constant 0 : index
    %5 = vector.load %arg3[%c0_4, %c0_5] : memref<32x32xf32, #tpu.memory_space<vmem>>, vector<32x32xf32>
    %cst = arith.constant dense<0.000000e+00> : vector<16x32xf32>
    %6 = tpu.matmul %4, %5, %cst {dimension_numbers = #tpu.dot_dimension_numbers<[1], [0], [0], [1], [0, 0, 1, 1], [], []>} : vector<16x32xf32>, vector<32x32xf32>, vector<16x32xf32> -> vector<16x32xf32>
    %7 = arith.addf %3, %6 : vector<16x32xf32>
    %c0_6 = arith.constant 0 : index
    %c0_7 = arith.constant 0 : index
    %8 = vector.load %arg8[%c0_6, %c0_7] : memref<16x32xf32, #tpu.memory_space<vmem>>, vector<16x32xf32>
    tpu.vector_store %arg8[%c0_6, %c0_7], %7 {strides = array<i32>} : memref<16x32xf32, #tpu.memory_space<vmem>>, vector<16x32xf32>,
    %c0_i32_8 = arith.constant 0 : i32
    %9 = arith.cmpi eq, %arg1, %c0_i32_8 : i32
    %10 = arith.extui %9 : i1 to i32
    %c0_i32_9 = arith.constant 0 : i32
    %11 = arith.cmpi ne, %10, %c0_i32_9 : i32
    scf.if %11 {
      %c0_10 = arith.constant 0 : index
      %c0_11 = arith.constant 0 : index
      %12 = vector.load %arg8[%c0_10, %c0_11] : memref<16x32xf32, #tpu.memory_space<vmem>>, vector<16x32xf32>
      %c0_12 = arith.constant 0 : index
      %c0_13 = arith.constant 0 : index
      %13 = vector.load %arg4[%c0_12, %c0_13] : memref<16x32xf32, #tpu.memory_space<vmem>>, vector<16x32xf32>
      %14 = arith.addf %13, %12 : vector<16x32xf32>
      %cst_14 = arith.constant dense<0.000000e+00> : vector<16xf32>
      %15 = vector.multi_reduction <add>, %14, %cst_14 [1] : vector<16x32xf32> to vector<16xf32>
      %16 = vector.shape_cast %15 : vector<16xf32> to vector<16x1xf32>
      %cst_15 = arith.constant 3.200000e+01 : f32
      %17 = vector.broadcast %cst_15 : f32 to vector<16x1xf32>
      %18 = arith.divf %16, %17 : vector<16x1xf32>
      %19 = vector.broadcast %18 : vector<16x1xf32> to vector<16x32xf32>
      %20 = arith.subf %14, %19 : vector<16x32xf32>
      %21 = arith.mulf %20, %20 : vector<16x32xf32>
      %cst_16 = arith.constant dense<0.000000e+00> : vector<16xf32>
      %22 = vector.multi_reduction <add>, %21, %cst_16 [1] : vector<16x32xf32> to vector<16xf32>
      %23 = vector.shape_cast %22 : vector<16xf32> to vector<16x1xf32>
      %cst_17 = arith.constant 3.200000e+01 : f32
      %24 = vector.broadcast %cst_17 : f32 to vector<16x1xf32>
      %25 = arith.divf %23, %24 : vector<16x1xf32>
      %cst_18 = arith.constant 9.99999974E-6 : f32
      %26 = vector.broadcast %cst_18 : f32 to vector<16x1xf32>
      %27 = arith.addf %25, %26 : vector<16x1xf32>
      %28 = math.rsqrt %27 : vector<16x1xf32>
      %29 = vector.broadcast %28 : vector<16x1xf32> to vector<16x32xf32>
      %30 = arith.mulf %20, %29 : vector<16x32xf32>
      %c0_19 = arith.constant 0 : index
      %c0_20 = arith.constant 0 : index
      %31 = vector.load %arg5[%c0_19, %c0_20] : memref<1x32xf32, #tpu.memory_space<vmem>>, vector<1x32xf32>
      %32 = vector.broadcast %31 : vector<1x32xf32> to vector<16x32xf32>
      %33 = arith.mulf %30, %32 : vector<16x32xf32>
      %c0_21 = arith.constant 0 : index
      %c0_22 = arith.constant 0 : index
      %34 = vector.load %arg6[%c0_21, %c0_22] : memref<1x32xf32, #tpu.memory_space<vmem>>, vector<1x32xf32>
      %35 = vector.broadcast %34 : vector<1x32xf32> to vector<16x32xf32>
      %36 = arith.addf %33, %35 : vector<16x32xf32>
      %c0_23 = arith.constant 0 : index
      %c0_24 = arith.constant 0 : index
      %37 = vector.load %arg7[%c0_23, %c0_24] : memref<16x32xf32, #tpu.memory_space<vmem>>, vector<16x32xf32>
      tpu.vector_store %arg7[%c0_23, %c0_24], %36 {strides = array<i32>} : memref<16x32xf32, #tpu.memory_space<vmem>>, vector<16x32xf32>,
    } else {
    }
    return
  }
  func.func @transform_0(%arg0: i32, %arg1: i32) -> (i32, i32) {
    %c0_i32 = arith.constant 0 : i32
    return %arg0, %arg1 : i32, i32
  }
  func.func @transform_1(%arg0: i32, %arg1: i32) -> (i32, i32) {
    %c0_i32 = arith.constant 0 : i32
    %c0_i32_0 = arith.constant 0 : i32
    return %arg1, %c0_i32 : i32, i32
  }
  func.func @transform_2(%arg0: i32, %arg1: i32) -> (i32, i32) {
    %c0_i32 = arith.constant 0 : i32
    %c0_i32_0 = arith.constant 0 : i32
    return %arg0, %c0_i32 : i32, i32
  }
  func.func @transform_3(%arg0: i32, %arg1: i32) -> (i32, i32) {
    %c0_i32 = arith.constant 0 : i32
    %c0_i32_0 = arith.constant 0 : i32
    %c0_i32_1 = arith.constant 0 : i32
    return %c0_i32, %c0_i32_0 : i32, i32
  }
  func.func @transform_4(%arg0: i32, %arg1: i32) -> (i32, i32) {
    %c0_i32 = arith.constant 0 : i32
    %c0_i32_0 = arith.constant 0 : i32
    %c0_i32_1 = arith.constant 0 : i32
    return %c0_i32, %c0_i32_0 : i32, i32
  }
  func.func @transform_5(%arg0: i32, %arg1: i32) -> (i32, i32) {
    %c0_i32 = arith.constant 0 : i32
    %c0_i32_0 = arith.constant 0 : i32
    return %arg0, %c0_i32 : i32, i32
  }
}

module attributes {stable_mosaic.version = 11 : i64} {
  func.func @_matmul_kernel(%arg0: i32, %arg1: i32, %arg2: i32, %arg3: memref<24x32xf32, #tpu.memory_space<vmem>>, %arg4: memref<32x64xf32, #tpu.memory_space<vmem>>, %arg5: memref<1x64xf32, #tpu.memory_space<vmem>>, %arg6: memref<24x64xf32, #tpu.memory_space<vmem>>, %arg7: memref<24x64xf32, #tpu.memory_space<vmem>>) attributes {dimension_semantics = [#tpu.dimension_semantics<parallel>, #tpu.dimension_semantics<parallel>, #tpu.dimension_semantics<arbitrary>], iteration_bounds = array<i64: 1, 1, 1>, scalar_prefetch = 0 : i64, scratch_operands = 1 : i64, tpu.core_type = #tpu.core_type<tc>, window_params = [{transform_indices = @transform_0, window_bounds = array<i64: 24, 32>}, {transform_indices = @transform_1, window_bounds = array<i64: 32, 64>}, {transform_indices = @transform_2, window_bounds = array<i64: 1, 64>}, {transform_indices = @transform_3, window_bounds = array<i64: 24, 64>}]} {
    %c0_i32 = arith.constant 0 : i32
    %0 = arith.cmpi eq, %arg2, %c0_i32 : i32
    %1 = arith.extui %0 : i1 to i32
    %c0_i32_0 = arith.constant 0 : i32
    %2 = arith.cmpi ne, %1, %c0_i32_0 : i32
    scf.if %2 {
      %cst_10 = arith.constant 0.000000e+00 : f32
      %12 = vector.broadcast %cst_10 : f32 to vector<24x64xf32>
      %c0_11 = arith.constant 0 : index
      %c0_12 = arith.constant 0 : index
      %13 = vector.load %arg7[%c0_11, %c0_12] : memref<24x64xf32, #tpu.memory_space<vmem>>, vector<24x64xf32>
      tpu.vector_store %arg7[%c0_11, %c0_12], %12 {strides = array<i32>} : memref<24x64xf32, #tpu.memory_space<vmem>>, vector<24x64xf32>,
    } else {
    }
    %c0 = arith.constant 0 : index
    %c0_1 = arith.constant 0 : index
    %3 = vector.load %arg7[%c0, %c0_1] : memref<24x64xf32, #tpu.memory_space<vmem>>, vector<24x64xf32>
    %c0_2 = arith.constant 0 : index
    %c0_3 = arith.constant 0 : index
    %4 = vector.load %arg3[%c0_2, %c0_3] : memref<24x32xf32, #tpu.memory_space<vmem>>, vector<24x32xf32>
    %c0_4 = arith.constant 0 : index
    %c0_5 = arith.constant 0 : index
    %5 = vector.load %arg4[%c0_4, %c0_5] : memref<32x64xf32, #tpu.memory_space<vmem>>, vector<32x64xf32>
    %cst = arith.constant dense<0.000000e+00> : vector<24x64xf32>
    %6 = tpu.matmul %4, %5, %cst {dimension_numbers = #tpu.dot_dimension_numbers<[1], [0], [0], [1], [0, 0, 1, 1], [], []>} : vector<24x32xf32>, vector<32x64xf32>, vector<24x64xf32> -> vector<24x64xf32>
    %7 = arith.addf %3, %6 : vector<24x64xf32>
    %c0_6 = arith.constant 0 : index
    %c0_7 = arith.constant 0 : index
    %8 = vector.load %arg7[%c0_6, %c0_7] : memref<24x64xf32, #tpu.memory_space<vmem>>, vector<24x64xf32>
    tpu.vector_store %arg7[%c0_6, %c0_7], %7 {strides = array<i32>} : memref<24x64xf32, #tpu.memory_space<vmem>>, vector<24x64xf32>,
    %c0_i32_8 = arith.constant 0 : i32
    %9 = arith.cmpi eq, %arg2, %c0_i32_8 : i32
    %10 = arith.extui %9 : i1 to i32
    %c0_i32_9 = arith.constant 0 : i32
    %11 = arith.cmpi ne, %10, %c0_i32_9 : i32
    scf.if %11 {
      %c0_10 = arith.constant 0 : index
      %c0_11 = arith.constant 0 : index
      %12 = vector.load %arg7[%c0_10, %c0_11] : memref<24x64xf32, #tpu.memory_space<vmem>>, vector<24x64xf32>
      %c0_12 = arith.constant 0 : index
      %c0_13 = arith.constant 0 : index
      %13 = vector.load %arg5[%c0_12, %c0_13] : memref<1x64xf32, #tpu.memory_space<vmem>>, vector<1x64xf32>
      %14 = vector.broadcast %13 : vector<1x64xf32> to vector<24x64xf32>
      %15 = arith.addf %12, %14 : vector<24x64xf32>
      %c0_14 = arith.constant 0 : index
      %c0_15 = arith.constant 0 : index
      %16 = vector.load %arg6[%c0_14, %c0_15] : memref<24x64xf32, #tpu.memory_space<vmem>>, vector<24x64xf32>
      tpu.vector_store %arg6[%c0_14, %c0_15], %15 {strides = array<i32>} : memref<24x64xf32, #tpu.memory_space<vmem>>, vector<24x64xf32>,
    } else {
    }
    return
  }
  func.func @transform_0(%arg0: i32, %arg1: i32, %arg2: i32) -> (i32, i32) {
    %c0_i32 = arith.constant 0 : i32
    return %arg0, %arg2 : i32, i32
  }
  func.func @transform_1(%arg0: i32, %arg1: i32, %arg2: i32) -> (i32, i32) {
    %c0_i32 = arith.constant 0 : i32
    return %arg2, %arg1 : i32, i32
  }
  func.func @transform_2(%arg0: i32, %arg1: i32, %arg2: i32) -> (i32, i32) {
    %c0_i32 = arith.constant 0 : i32
    %c0_i32_0 = arith.constant 0 : i32
    return %c0_i32, %arg1 : i32, i32
  }
  func.func @transform_3(%arg0: i32, %arg1: i32, %arg2: i32) -> (i32, i32) {
    %c0_i32 = arith.constant 0 : i32
    return %arg0, %arg1 : i32, i32
  }
}

module attributes {stable_mosaic.version = 11 : i64} {
  func.func @_matmul_kernel(%arg0: i32, %arg1: i32, %arg2: i32, %arg3: memref<16x32xf32, #tpu.memory_space<vmem>>, %arg4: memref<32x64xf32, #tpu.memory_space<vmem>>, %arg5: memref<1x64xf32, #tpu.memory_space<vmem>>, %arg6: memref<16x64xf32, #tpu.memory_space<vmem>>, %arg7: memref<16x64xf32, #tpu.memory_space<vmem>>) attributes {dimension_semantics = [#tpu.dimension_semantics<parallel>, #tpu.dimension_semantics<parallel>, #tpu.dimension_semantics<arbitrary>], iteration_bounds = array<i64: 1, 1, 1>, scalar_prefetch = 0 : i64, scratch_operands = 1 : i64, tpu.core_type = #tpu.core_type<tc>, window_params = [{transform_indices = @transform_0, window_bounds = array<i64: 16, 32>}, {transform_indices = @transform_1, window_bounds = array<i64: 32, 64>}, {transform_indices = @transform_2, window_bounds = array<i64: 1, 64>}, {transform_indices = @transform_3, window_bounds = array<i64: 16, 64>}]} {
    %c0_i32 = arith.constant 0 : i32
    %0 = arith.cmpi eq, %arg2, %c0_i32 : i32
    %1 = arith.extui %0 : i1 to i32
    %c0_i32_0 = arith.constant 0 : i32
    %2 = arith.cmpi ne, %1, %c0_i32_0 : i32
    scf.if %2 {
      %cst_10 = arith.constant 0.000000e+00 : f32
      %12 = vector.broadcast %cst_10 : f32 to vector<16x64xf32>
      %c0_11 = arith.constant 0 : index
      %c0_12 = arith.constant 0 : index
      %13 = vector.load %arg7[%c0_11, %c0_12] : memref<16x64xf32, #tpu.memory_space<vmem>>, vector<16x64xf32>
      tpu.vector_store %arg7[%c0_11, %c0_12], %12 {strides = array<i32>} : memref<16x64xf32, #tpu.memory_space<vmem>>, vector<16x64xf32>,
    } else {
    }
    %c0 = arith.constant 0 : index
    %c0_1 = arith.constant 0 : index
    %3 = vector.load %arg7[%c0, %c0_1] : memref<16x64xf32, #tpu.memory_space<vmem>>, vector<16x64xf32>
    %c0_2 = arith.constant 0 : index
    %c0_3 = arith.constant 0 : index
    %4 = vector.load %arg3[%c0_2, %c0_3] : memref<16x32xf32, #tpu.memory_space<vmem>>, vector<16x32xf32>
    %c0_4 = arith.constant 0 : index
    %c0_5 = arith.constant 0 : index
    %5 = vector.load %arg4[%c0_4, %c0_5] : memref<32x64xf32, #tpu.memory_space<vmem>>, vector<32x64xf32>
    %cst = arith.constant dense<0.000000e+00> : vector<16x64xf32>
    %6 = tpu.matmul %4, %5, %cst {dimension_numbers = #tpu.dot_dimension_numbers<[1], [0], [0], [1], [0, 0, 1, 1], [], []>} : vector<16x32xf32>, vector<32x64xf32>, vector<16x64xf32> -> vector<16x64xf32>
    %7 = arith.addf %3, %6 : vector<16x64xf32>
    %c0_6 = arith.constant 0 : index
    %c0_7 = arith.constant 0 : index
    %8 = vector.load %arg7[%c0_6, %c0_7] : memref<16x64xf32, #tpu.memory_space<vmem>>, vector<16x64xf32>
    tpu.vector_store %arg7[%c0_6, %c0_7], %7 {strides = array<i32>} : memref<16x64xf32, #tpu.memory_space<vmem>>, vector<16x64xf32>,
    %c0_i32_8 = arith.constant 0 : i32
    %9 = arith.cmpi eq, %arg2, %c0_i32_8 : i32
    %10 = arith.extui %9 : i1 to i32
    %c0_i32_9 = arith.constant 0 : i32
    %11 = arith.cmpi ne, %10, %c0_i32_9 : i32
    scf.if %11 {
      %c0_10 = arith.constant 0 : index
      %c0_11 = arith.constant 0 : index
      %12 = vector.load %arg7[%c0_10, %c0_11] : memref<16x64xf32, #tpu.memory_space<vmem>>, vector<16x64xf32>
      %c0_12 = arith.constant 0 : index
      %c0_13 = arith.constant 0 : index
      %13 = vector.load %arg5[%c0_12, %c0_13] : memref<1x64xf32, #tpu.memory_space<vmem>>, vector<1x64xf32>
      %14 = vector.broadcast %13 : vector<1x64xf32> to vector<16x64xf32>
      %15 = arith.addf %12, %14 : vector<16x64xf32>
      %cst_14 = arith.constant 0.000000e+00 : f32
      %16 = vector.broadcast %cst_14 : f32 to vector<16x64xf32>
      %17 = arith.maximumf %15, %16 : vector<16x64xf32>
      %c0_15 = arith.constant 0 : index
      %c0_16 = arith.constant 0 : index
      %18 = vector.load %arg6[%c0_15, %c0_16] : memref<16x64xf32, #tpu.memory_space<vmem>>, vector<16x64xf32>
      tpu.vector_store %arg6[%c0_15, %c0_16], %17 {strides = array<i32>} : memref<16x64xf32, #tpu.memory_space<vmem>>, vector<16x64xf32>,
    } else {
    }
    return
  }
  func.func @transform_0(%arg0: i32, %arg1: i32, %arg2: i32) -> (i32, i32) {
    %c0_i32 = arith.constant 0 : i32
    return %arg0, %arg2 : i32, i32
  }
  func.func @transform_1(%arg0: i32, %arg1: i32, %arg2: i32) -> (i32, i32) {
    %c0_i32 = arith.constant 0 : i32
    return %arg2, %arg1 : i32, i32
  }
  func.func @transform_2(%arg0: i32, %arg1: i32, %arg2: i32) -> (i32, i32) {
    %c0_i32 = arith.constant 0 : i32
    %c0_i32_0 = arith.constant 0 : i32
    return %c0_i32, %arg1 : i32, i32
  }
  func.func @transform_3(%arg0: i32, %arg1: i32, %arg2: i32) -> (i32, i32) {
    %c0_i32 = arith.constant 0 : i32
    return %arg0, %arg1 : i32, i32
  }
}

module attributes {stable_mosaic.version = 11 : i64} {
  func.func @_ln_kernel(%arg0: i32, %arg1: memref<16x32xf32, #tpu.memory_space<vmem>>, %arg2: memref<1x32xf32, #tpu.memory_space<vmem>>, %arg3: memref<1x32xf32, #tpu.memory_space<vmem>>, %arg4: memref<16x32xf32, #tpu.memory_space<vmem>>) attributes {dimension_semantics = [#tpu.dimension_semantics<parallel>], iteration_bounds = array<i64: 1>, scalar_prefetch = 0 : i64, scratch_operands = 0 : i64, tpu.core_type = #tpu.core_type<tc>, window_params = [{transform_indices = @transform_0, window_bounds = array<i64: 16, 32>}, {pipeline_mode = #tpu.pipeline_mode<synchronous>, transform_indices = @transform_1, window_bounds = array<i64: 1, 32>}, {pipeline_mode = #tpu.pipeline_mode<synchronous>, transform_indices = @transform_2, window_bounds = array<i64: 1, 32>}, {transform_indices = @transform_3, window_bounds = array<i64: 16, 32>}]} {
    %c0 = arith.constant 0 : index
    %c0_0 = arith.constant 0 : index
    %0 = vector.load %arg1[%c0, %c0_0] : memref<16x32xf32, #tpu.memory_space<vmem>>, vector<16x32xf32>
    %cst = arith.constant dense<0.000000e+00> : vector<16xf32>
    %1 = vector.multi_reduction <add>, %0, %cst [1] : vector<16x32xf32> to vector<16xf32>
    %2 = vector.shape_cast %1 : vector<16xf32> to vector<16x1xf32>
    %cst_1 = arith.constant 3.200000e+01 : f32
    %3 = vector.broadcast %cst_1 : f32 to vector<16x1xf32>
    %4 = arith.divf %2, %3 : vector<16x1xf32>
    %5 = vector.broadcast %4 : vector<16x1xf32> to vector<16x32xf32>
    %6 = arith.subf %0, %5 : vector<16x32xf32>
    %7 = arith.mulf %6, %6 : vector<16x32xf32>
    %cst_2 = arith.constant dense<0.000000e+00> : vector<16xf32>
    %8 = vector.multi_reduction <add>, %7, %cst_2 [1] : vector<16x32xf32> to vector<16xf32>
    %9 = vector.shape_cast %8 : vector<16xf32> to vector<16x1xf32>
    %cst_3 = arith.constant 3.200000e+01 : f32
    %10 = vector.broadcast %cst_3 : f32 to vector<16x1xf32>
    %11 = arith.divf %9, %10 : vector<16x1xf32>
    %cst_4 = arith.constant 9.99999974E-6 : f32
    %12 = vector.broadcast %cst_4 : f32 to vector<16x1xf32>
    %13 = arith.addf %11, %12 : vector<16x1xf32>
    %14 = math.rsqrt %13 : vector<16x1xf32>
    %15 = vector.broadcast %14 : vector<16x1xf32> to vector<16x32xf32>
    %16 = arith.mulf %6, %15 : vector<16x32xf32>
    %c0_5 = arith.constant 0 : index
    %c0_6 = arith.constant 0 : index
    %17 = vector.load %arg2[%c0_5, %c0_6] : memref<1x32xf32, #tpu.memory_space<vmem>>, vector<1x32xf32>
    %18 = vector.broadcast %17 : vector<1x32xf32> to vector<16x32xf32>
    %19 = arith.mulf %16, %18 : vector<16x32xf32>
    %c0_7 = arith.constant 0 : index
    %c0_8 = arith.constant 0 : index
    %20 = vector.load %arg3[%c0_7, %c0_8] : memref<1x32xf32, #tpu.memory_space<vmem>>, vector<1x32xf32>
    %21 = vector.broadcast %20 : vector<1x32xf32> to vector<16x32xf32>
    %22 = arith.addf %19, %21 : vector<16x32xf32>
    %c0_9 = arith.constant 0 : index
    %c0_10 = arith.constant 0 : index
    %23 = vector.load %arg4[%c0_9, %c0_10] : memref<16x32xf32, #tpu.memory_space<vmem>>, vector<16x32xf32>
    tpu.vector_store %arg4[%c0_9, %c0_10], %22 {strides = array<i32>} : memref<16x32xf32, #tpu.memory_space<vmem>>, vector<16x32xf32>,
    return
  }
  func.func @transform_0(%arg0: i32) -> (i32, i32) {
    %c0_i32 = arith.constant 0 : i32
    %c0_i32_0 = arith.constant 0 : i32
    return %arg0, %c0_i32 : i32, i32
  }
  func.func @transform_1(%arg0: i32) -> (i32, i32) {
    %c0_i32 = arith.constant 0 : i32
    %c0_i32_0 = arith.constant 0 : i32
    %c0_i32_1 = arith.constant 0 : i32
    return %c0_i32, %c0_i32_0 : i32, i32
  }
  func.func @transform_2(%arg0: i32) -> (i32, i32) {
    %c0_i32 = arith.constant 0 : i32
    %c0_i32_0 = arith.constant 0 : i32
    %c0_i32_1 = arith.constant 0 : i32
    return %c0_i32, %c0_i32_0 : i32, i32
  }
  func.func @transform_3(%arg0: i32) -> (i32, i32) {
    %c0_i32 = arith.constant 0 : i32
    %c0_i32_0 = arith.constant 0 : i32
    return %arg0, %c0_i32 : i32, i32
  }
}

</mosaic_0001>

<bundles_post_ra>
// kernel: transformer_xl_decoder.22
= control target key start
LH: loop header
LB: loop body
LE: loop exit
PB: predicated region body
PF: predicated region fallthrough
CT: control target
= control target key end

     0   :  { %vm15_vm0 = vcmask 261120   ;;  %v60_v2 = vmov 0.0   ;;  %s98_s1 = inlined_call_operand.vmem [shape: f32[32,32], index: 1, kind: input, shape index: {}]   ;;  %s99_s0 = inlined_call_operand.vmem [shape: f32[8,32], index: 0, kind: input, shape index: {}]   ;;  %s100_s2 = inlined_call_operand.vmem [shape: f32[8,32], index: 2, kind: output, shape index: {}]  }
   0x1   :  { %v22_v0 = vld [vmem:[%s98_s1 + $0x18] sm:$0xff]  ;;  %v21_v1 = vld [vmem:[%s98_s1 + $0x10] sm:$0xff]  ;;  %16 = vst.msk [vmem:[#allocation2] sm:$0xff] %vm15_vm0, %v60_v2  ;;  %v20_v3 = vld [vmem:[%s98_s1 + $0x8] sm:$0xff] }
   0x2   :  { %39 = vmatpush.msra.mxu0 %v22_v0  ;;  %v19_v4 = vld [vmem:[%s98_s1] sm:$0xff] }
   0x3   :  { %v18_v5 = vld [vmem:[%s99_s0] sm:$0xff] }
   0x4   :  { %40 = vmatpush.msra.mxu0 %v21_v1 }
   0x6   :  { %41 = vmatpush.msra.mxu0 %v20_v3 }
   0x8   :  { %42 = vmatpush.msra.mxu0 %v19_v4  ;;  %v17_v6 = vld [vmem:[#allocation2] sm:$0xff] }
   0x9   :  { %58 = vmatmul.msk.f32.vlgmr.msra.gmra.mxu0 %vm15_vm0, %v18_v5 }
  0x86   :  { %v44_v7 = vpop.f32.mrf.mxu0 }
  0x87   :  { %v47_v8 = vadd.f32 %v44_v7, %v17_v6 }
  0x89   :  { %48 = vst.msk [vmem:[#allocation2] sm:$0xff] %vm15_vm0, %v47_v8 }
  0x90   :  { %v52_v9 = vld [vmem:[#allocation2] sm:$0xff] }
  0x91   :  { %53 = vst.msk [vmem:[%s100_s2] sm:$0xff] %vm15_vm0, %v52_v9 }

// kernel: transformer_xl_decoder.21
= control target key start
LH: loop header
LB: loop body
LE: loop exit
PB: predicated region body
PF: predicated region fallthrough
CT: control target
= control target key end

     0   :  { %7 = vsyncpa [#allocation4], 0  ;;  %s125_s12 = smov [#allocation3]   ;;  %s126_s14 = smov 128   ;;  %s171_s0 = inlined_call_operand.hbm [shape: f32[16,32], index: 0, kind: input, shape index: {}]   ;;  %s172_s1 = inlined_call_operand.vmem [shape: f32[32,96], index: 1, kind: input, shape index: {}]   ;;  %s173_s2 = inlined_call_operand.vmem [shape: f32[16,96], index: 2, kind: output, shape index: {}]  }
   0x1   :  { %s12_s11 = sshll.u32 %s171_s0, 4  ;;  %s14_s13 = sshll.u32 %s125_s12, 4  ;;  %s13_s11 = int_to_ptr.hbm [resolvable:$true] %s12_s11  ;;  %s15_s13 = int_to_ptr.vmem [resolvable:$true] %s14_s13 }
   0x2   :  { %s127_s15 = smov 8  }
   0x3   :  { %20 = dma.hbm_to_vmem [thread:$0]  %s13_s11, 256, %s15_s13, [#allocation4], %s126_s14, %s126_s14, %s127_s15  }
   0x4   :  { %123 = dma.done.wait [#allocation4], 256  }
   0x5   :  { %124 = vsyncadd [#allocation4], 4294967040  ;;  %vm31_vm0 = vcmask 785408   ;;  %v128_v0 = vmov 0.0   ;;  %v41_v1 = vld [vmem:[%s172_s1 + $0x18] sm:$0xff]  ;;  %v40_v2 = vld [vmem:[%s172_s1 + $0x10] sm:$0xff] }
   0x6   :  { %32 = vst.msk [vmem:[#allocation2] sm:$0xff] %vm31_vm0, %v128_v0  ;;  %61 = vmatpush.msra.mxu0 %v41_v1  ;;  %91 = vmatpush.msra.mxu1 %v41_v1  ;;  %v39_v3 = vld [vmem:[%s172_s1 + $0x8] sm:$0xff]  ;;  %v38_v4 = vld [vmem:[%s172_s1] sm:$0xff]  ;;  %v36_v5 = vld [vmem:[#allocation3] sm:$0xff]  ;;  %vm42_vm1 = vcmask 261120  }
   0x7   :  { %33 = vst.msk [vmem:[#allocation2 + $0x8] sm:$0xff] %vm31_vm0, %v128_v0  ;;  %v37_v6 = vld [vmem:[#allocation3 + $0x8] sm:$0xff] }
   0x8   :  { %62 = vmatpush.msra.mxu0 %v40_v2  ;;  %92 = vmatpush.msra.mxu1 %v40_v2 }
   0xa   :  { %63 = vmatpush.msra.mxu0 %v39_v3  ;;  %93 = vmatpush.msra.mxu1 %v39_v3 }
   0xc   :  { %64 = vmatpush.msra.mxu0 %v38_v4  ;;  %94 = vmatpush.msra.mxu1 %v38_v4 }
   0xd   :  { %89 = vmatmul.msk.f32.vlgmr.msra.gmra.mxu0 %vm42_vm1, %v36_v5  ;;  %90 = vmatmul.msk.f32.vlgmr.msra.gmra.mxu1 %vm42_vm1, %v37_v6  ;;  %v34_v7 = vld [vmem:[#allocation2] sm:$0xff] }
   0xe   :  { %v35_v8 = vld [vmem:[#allocation2 + $0x8] sm:$0xff] }
  0x8a   :  { %v66_v9 = vpop.f32.mrf.mxu0  ;;  %v69_v10 = vpop.f32.mrf.mxu1 }
  0x8b   :  { %v72_v11 = vadd.f32 %v66_v9, %v34_v7  ;;  %v73_v12 = vadd.f32 %v69_v10, %v35_v8 }
  0x8d   :  { %75 = vst.msk [vmem:[#allocation2] sm:$0xff] %vm31_vm0, %v72_v11 }
  0x8e   :  { %76 = vst.msk [vmem:[#allocation2 + $0x8] sm:$0xff] %vm31_vm0, %v73_v12 }
  0x94   :  { %v80_v13 = vld [vmem:[#allocation2] sm:$0xff] }
  0x95   :  { %82 = vst.msk [vmem:[%s173_s2] sm:$0xff] %vm31_vm0, %v80_v13  ;;  %v81_v14 = vld [vmem:[#allocation2 + $0x8] sm:$0xff] }
  0x96   :  { %83 = vst.msk [vmem:[%s173_s2 + $0x8] sm:$0xff] %vm31_vm0, %v81_v14 }
  0x97   :  { %88 = vsyncpa [#allocation4], 1 }

// kernel: transformer_xl_decoder.24
= control target key start
LH: loop header
LB: loop body
LE: loop exit
PB: predicated region body
PF: predicated region fallthrough
CT: control target
= control target key end

     0   :  { %10 = vsyncpa [#allocation4], 0  ;;  %s325_s0 = inlined_call_operand.vmem [shape: f32[16,32], index: 0, kind: input, shape index: {}]   ;;  %s326_s1 = inlined_call_operand.hbm [shape: f32[32,32], index: 1, kind: input, shape index: {}]   ;;  %s327_s2 = inlined_call_operand.hbm [shape: f32[16,32], index: 2, kind: input, shape index: {}]   ;;  %s328_s3 = inlined_call_operand.vmem [shape: f32[1,32], index: 3, kind: input, shape index: {}]   ;;  %s329_s4 = inlined_call_operand.vmem [shape: f32[1,32], index: 4, kind: input, shape index: {}]   ;;  %s330_s5 = inlined_call_operand.vmem [shape: f32[16,32], index: 5, kind: output, shape index: {}]  }
   0x1   :  { %s18_s20 = sshll.u32 %s326_s1, 4  ;;  %s19_s20 = int_to_ptr.hbm [resolvable:$true] %s18_s20 }
   0x2   :  { %11 = vsyncpa [#allocation6], 0  ;;  %s253_s21 = smov [#allocation3]   ;;  %s31_s25 = sshll.u32 %s327_s2, 4  ;;  %s32_s25 = int_to_ptr.hbm [resolvable:$true] %s31_s25 }
   0x3   :  { %s20_s22 = sshll.u32 %s253_s21, 4  ;;  %s254_s26 = smov 128   ;;  %s21_s22 = int_to_ptr.vmem [resolvable:$true] %s20_s22 }
   0x4   :  { %s255_s27 = smov 8   ;;  %s256_s28 = smov [#allocation5]  }
   0x5   :  { %26 = dma.hbm_to_vmem [thread:$0]  %s19_s20, 512, %s21_s22, [#allocation4], %s254_s26, %s254_s26, %s255_s27  }
   0x6   :  { %s33_s29 = sshll.u32 %s256_s28, 4  ;;  %s34_s29 = int_to_ptr.vmem [resolvable:$true] %s33_s29 }
   0x7   :  { %39 = dma.hbm_to_vmem [thread:$0]  %s32_s25, 256, %s34_s29, [#allocation6], %s254_s26, %s254_s26, %s255_s27  }
   0x8   :  { %249 = dma.done.wait [#allocation4], 512  }
   0x9   :  { %250 = vsyncadd [#allocation4], 4294966784 }
   0xa   :  { %251 = dma.done.wait [#allocation6], 256  }
   0xb   :  { %252 = vsyncadd [#allocation6], 4294967040  ;;  %vm56_vm0 = vcmask 261120   ;;  %v257_v0 = vmov 0.0   ;;  %v66_v1 = vld [vmem:[#allocation3 + $0x18] sm:$0xff]  ;;  %v65_v2 = vld [vmem:[#allocation3 + $0x10] sm:$0xff] }
   0xc   :  { %57 = vst.msk [vmem:[#allocation2] sm:$0xff] %vm56_vm0, %v257_v0  ;;  %86 = vmatpush.msra.mxu0 %v66_v1  ;;  %183 = vmatpush.msra.mxu1 %v66_v1  ;;  %v64_v3 = vld [vmem:[#allocation3 + $0x8] sm:$0xff]  ;;  %v63_v4 = vld [vmem:[#allocation3] sm:$0xff]  ;;  %v61_v5 = vld [vmem:[%s325_s0] sm:$0xff]  ;;  %v258_v21 = vmov 32.0  }
   0xd   :  { %58 = vst.msk [vmem:[#allocation2 + $0x8] sm:$0xff] %vm56_vm0, %v257_v0  ;;  %v62_v6 = vld [vmem:[%s325_s0 + $0x8] sm:$0xff]  ;;  %v106_v13 = vld [vmem:[#allocation5] sm:$0xff]  ;;  %v107_v17 = vld [vmem:[#allocation5 + $0x8] sm:$0xff]  ;;  %195 = vrcp.f32 %v258_v21 }
   0xe   :  { %87 = vmatpush.msra.mxu0 %v65_v2  ;;  %184 = vmatpush.msra.mxu1 %v65_v2  ;;  %v193_v52 = vld [vmem:[%s328_s3] ss:$0 sm:$0xff] }
   0xf   :  { %v194_v55 = vld [vmem:[%s329_s4] ss:$0 sm:$0xff] }
  0x10   :  { %88 = vmatpush.msra.mxu0 %v64_v3  ;;  %185 = vmatpush.msra.mxu1 %v64_v3 }
  0x12   :  { %89 = vmatpush.msra.mxu0 %v63_v4  ;;  %186 = vmatpush.msra.mxu1 %v63_v4 }
  0x13   :  { %181 = vmatmul.msk.f32.vlgmr.msra.gmra.mxu0 %vm56_vm0, %v61_v5  ;;  %182 = vmatmul.msk.f32.vlgmr.msra.gmra.mxu1 %vm56_vm0, %v62_v6  ;;  %v59_v7 = vld [vmem:[#allocation2] sm:$0xff]  ;;  %v196_v22 = vpop.eup %195 }
  0x14   :  { %v60_v8 = vld [vmem:[#allocation2 + $0x8] sm:$0xff]  ;;  %v117_v23 = vmul.f32 32.0, %v196_v22  ;;  %vm121_vm1 = vweird.f32 %v196_v22 }
  0x16   :  { %v118_v24 = vsub.f32 1.0, %v117_v23 }
  0x18   :  { %v119_v25 = vmul.f32 %v196_v22, %v118_v24 }
  0x1a   :  { %v120_v26 = vadd.f32 %v196_v22, %v119_v25 }
  0x1c   :  { %v122_v27 = vsel %vm121_vm1, %v196_v22, %v120_v26 }
  0x90   :  { %v91_v9 = vpop.f32.mrf.mxu0  ;;  %v94_v10 = vpop.f32.mrf.mxu1 }
  0x91   :  { %v97_v11 = vadd.f32 %v91_v9, %v59_v7  ;;  %v98_v12 = vadd.f32 %v94_v10, %v60_v8 }
  0x93   :  { %99 = vst.msk [vmem:[#allocation2] sm:$0xff] %vm56_vm0, %v97_v11 }
  0x94   :  { %100 = vst.msk [vmem:[#allocation2 + $0x8] sm:$0xff] %vm56_vm0, %v98_v12 }
  0x9a   :  { %v104_v14 = vld [vmem:[#allocation2] sm:$0xff] }
  0x9b   :  { %v108_v15 = vadd.f32 %v106_v13, %v104_v14  ;;  %v105_v16 = vld [vmem:[#allocation2 + $0x8] sm:$0xff] }
  0x9c   :  { %v109_v19 = vadd.f32 %v107_v17, %v105_v16 }
  0x9d   :  { %v110_v18 = vsel %vm56_vm0, %v108_v15, 0.0 }
  0x9e   :  { %111 = vadd.xlane.f32.xlu0 %v110_v18  ;;  %v113_v20 = vsel %vm56_vm0, %v109_v19, 0.0 }
  0xa6   :  { %114 = vadd.xlane.f32.xlu0 %v113_v20 }
 0x111   :  { %v112_v28 = vpop.xlane.xlu0 %111 }
 0x112   :  { %v123_v29 = vmul.f32 %v122_v27, %v112_v28 }
 0x114   :  { %v125_v30 = vsub.f32 %v108_v15, %v123_v29 }
 0x116   :  { %v127_v31 = vmul.f32 %v125_v30, %v125_v30 }
 0x118   :  { %v129_v32 = vsel %vm56_vm0, %v127_v31, 0.0 }
 0x119   :  { %130 = vadd.xlane.f32.xlu1 %v129_v32  ;;  %v115_v33 = vpop.xlane.xlu0 %114 }
 0x11a   :  { %v124_v34 = vmul.f32 %v122_v27, %v115_v33 }
 0x11c   :  { %v126_v35 = vsub.f32 %v109_v19, %v124_v34 }
 0x11e   :  { %v128_v36 = vmul.f32 %v126_v35, %v126_v35 }
 0x120   :  { %v132_v37 = vsel %vm56_vm0, %v128_v36, 0.0 }
 0x121   :  { %133 = vadd.xlane.f32.xlu1 %v132_v37 }
 0x18c   :  { %v131_v38 = vpop.xlane.xlu1 %130 }
 0x18d   :  { %v135_v39 = vmul.f32 %v131_v38, %v122_v27 }
 0x18f   :  { %v137_v40 = vadd.f32 1e-05, %v135_v39 }
 0x191   :  { %197 = vrsqrt.f32 %v137_v40  ;;  %vm145_vm3 = vweird.f32 %v137_v40 }
 0x194   :  { %v134_v41 = vpop.xlane.xlu1 %133 }
 0x195   :  { %v136_v42 = vmul.f32 %v134_v41, %v122_v27 }
 0x197   :  { %v198_v43 = vpop.eup %197  ;;  %v138_v44 = vadd.f32 1e-05, %v136_v42 }
 0x198   :  { %v140_v45 = vmul.f32 %v198_v43, %v137_v40  ;;  %vm146_vm2 = vweird.f32 %v198_v43 }
 0x199   :  { %199 = vrsqrt.f32 %v138_v44  ;;  %vm147_vm4 = vmor %vm145_vm3, %vm146_vm2  ;;  %vm155_vm6 = vweird.f32 %v138_v44 }
 0x19a   :  { %v141_v46 = vmul.f32 %v198_v43, %v140_v45 }
 0x19c   :  { %v142_v47 = vmul.f32 0.5, %v141_v46 }
 0x19e   :  { %v143_v48 = vsub.f32 1.5, %v142_v47 }
 0x19f   :  { %v200_v49 = vpop.eup %199 }
 0x1a0   :  { %v144_v50 = vmul.f32 %v198_v43, %v143_v48  ;;  %v150_v51 = vmul.f32 %v200_v49, %v138_v44  ;;  %vm156_vm5 = vweird.f32 %v200_v49 }
 0x1a1   :  { %vm157_vm7 = vmor %vm155_vm6, %vm156_vm5 }
 0x1a2   :  { %v148_v53 = vsel %vm147_vm4, %v198_v43, %v144_v50  ;;  %v151_v54 = vmul.f32 %v200_v49, %v150_v51 }
 0x1a3   :  { %v159_v56 = vmul.f32 %v148_v53, %v125_v30 }
 0x1a4   :  { %v152_v57 = vmul.f32 0.5, %v151_v54 }
 0x1a5   :  { %v165_v58 = vmul.f32 %v193_v52, %v159_v56 }
 0x1a6   :  { %v153_v59 = vsub.f32 1.5, %v152_v57 }
 0x1a7   :  { %v171_v60 = vadd.f32 %v194_v55, %v165_v58 }
 0x1a8   :  { %v154_v61 = vmul.f32 %v200_v49, %v153_v59 }
 0x1a9   :  { %173 = vst.msk [vmem:[%s330_s5] sm:$0xff] %vm56_vm0, %v171_v60 }
 0x1aa   :  { %v158_v62 = vsel %vm157_vm7, %v200_v49, %v154_v61 }
 0x1ab   :  { %v160_v63 = vmul.f32 %v158_v62, %v126_v35 }
 0x1ad   :  { %v166_v0 = vmul.f32 %v193_v52, %v160_v63 }
 0x1af   :  { %v172_v1 = vadd.f32 %v194_v55, %v166_v0 }
 0x1b1   :  { %174 = vst.msk [vmem:[%s330_s5 + $0x8] sm:$0xff] %vm56_vm0, %v172_v1 }
 0x1b2   :  { %179 = vsyncpa [#allocation4], 1 }
 0x1b3   :  { %180 = vsyncpa [#allocation6], 1 }

// kernel: transformer_xl_decoder.26
= control target key start
LH: loop header
LB: loop body
LE: loop exit
PB: predicated region body
PF: predicated region fallthrough
CT: control target
= control target key end

     0   :  { %vm18_vm0 = vcmask 523264   ;;  %v108_v2 = vmov 0.0   ;;  %vm32_vm1 = vcmask 261120   ;;  %s171_s1 = inlined_call_operand.vmem [shape: f32[32,64], index: 1, kind: input, shape index: {}]   ;;  %s172_s2 = inlined_call_operand.vmem [shape: f32[1,64], index: 2, kind: input, shape index: {}]   ;;  %s173_s0 = inlined_call_operand.vmem [shape: f32[24,32], index: 0, kind: input, shape index: {}]   ;;  %s174_s3 = inlined_call_operand.vmem [shape: f32[24,64], index: 3, kind: output, shape index: {}]  }
   0x1   :  { %v31_v0 = vld [vmem:[%s171_s1 + $0x18] sm:$0xff]  ;;  %v30_v1 = vld [vmem:[%s171_s1 + $0x10] sm:$0xff]  ;;  %19 = vst.msk [vmem:[#allocation2] sm:$0xff] %vm18_vm0, %v108_v2  ;;  %v29_v3 = vld [vmem:[%s171_s1 + $0x8] sm:$0xff] }
   0x2   :  { %99 = vmatpush.msra.mxu2 %v31_v0  ;;  %54 = vmatpush.msra.mxu0 %v31_v0  ;;  %20 = vst.msk [vmem:[#allocation2 + $0x8] sm:$0xff] %vm18_vm0, %v108_v2  ;;  %v28_v4 = vld [vmem:[%s171_s1] sm:$0xff]  ;;  %v27_v5 = vld [vmem:[%s173_s0 + $0x10] sm:$0xff]  ;;  %v26_v7 = vld [vmem:[%s173_s0 + $0x8] sm:$0xff] }
   0x3   :  { %98 = vmatpush.msra.mxu1 %v31_v0  ;;  %21 = vst.msk [vmem:[#allocation2 + $0x10] sm:$0xff] %vm18_vm0, %v108_v2  ;;  %v25_v6 = vld [vmem:[%s173_s0] sm:$0xff] }
   0x4   :  { %101 = vmatpush.msra.mxu2 %v30_v1  ;;  %55 = vmatpush.msra.mxu0 %v30_v1  ;;  %v107_v17 = vld [vmem:[%s172_s2] ss:$0 sm:$0xff] }
   0x5   :  { %100 = vmatpush.msra.mxu1 %v30_v1 }
   0x6   :  { %103 = vmatpush.msra.mxu2 %v29_v3  ;;  %56 = vmatpush.msra.mxu0 %v29_v3 }
   0x7   :  { %102 = vmatpush.msra.mxu1 %v29_v3 }
   0x8   :  { %105 = vmatpush.msra.mxu2 %v28_v4  ;;  %57 = vmatpush.msra.mxu0 %v28_v4  ;;  %v22_v8 = vld [vmem:[#allocation2] sm:$0xff] }
   0x9   :  { %97 = vmatmul.msk.f32.vlgmr.msra.gmra.mxu2 %vm32_vm1, %v27_v5  ;;  %104 = vmatpush.msra.mxu1 %v28_v4  ;;  %v23_v9 = vld [vmem:[#allocation2 + $0x8] sm:$0xff] }
   0xa   :  { %95 = vmatmul.msk.f32.vlgmr.msra.gmra.mxu0 %vm32_vm1, %v25_v6  ;;  %96 = vmatmul.msk.f32.vlgmr.msra.gmra.mxu1 %vm32_vm1, %v26_v7  ;;  %v24_v14 = vld [vmem:[#allocation2 + $0x10] sm:$0xff] }
  0x87   :  { %v59_v10 = vpop.f32.mrf.mxu0  ;;  %v62_v11 = vpop.f32.mrf.mxu1 }
  0x88   :  { %v68_v12 = vadd.f32 %v59_v10, %v22_v8  ;;  %v69_v13 = vadd.f32 %v62_v11, %v23_v9 }
  0x8a   :  { %72 = vst.msk [vmem:[#allocation2] sm:$0xff] %vm18_vm0, %v68_v12 }
  0x8b   :  { %73 = vst.msk [vmem:[#allocation2 + $0x8] sm:$0xff] %vm18_vm0, %v69_v13 }
  0x8c   :  { %v65_v15 = vpop.f32.mrf.mxu2 }
  0x8d   :  { %v70_v16 = vadd.f32 %v65_v15, %v24_v14 }
  0x8f   :  { %74 = vst.msk [vmem:[#allocation2 + $0x10] sm:$0xff] %vm18_vm0, %v70_v16 }
  0x91   :  { %v78_v18 = vld [vmem:[#allocation2] sm:$0xff] }
  0x92   :  { %v85_v19 = vadd.f32 %v107_v17, %v78_v18  ;;  %v79_v20 = vld [vmem:[#allocation2 + $0x8] sm:$0xff] }
  0x93   :  { %v86_v21 = vadd.f32 %v107_v17, %v79_v20 }
  0x94   :  { %88 = vst.msk [vmem:[%s174_s3] sm:$0xff] %vm18_vm0, %v85_v19 }
  0x95   :  { %89 = vst.msk [vmem:[%s174_s3 + $0x8] sm:$0xff] %vm18_vm0, %v86_v21 }
  0x96   :  { %v80_v22 = vld [vmem:[#allocation2 + $0x10] sm:$0xff] }
  0x97   :  { %v87_v23 = vadd.f32 %v107_v17, %v80_v22 }
  0x99   :  { %90 = vst.msk [vmem:[%s174_s3 + $0x10] sm:$0xff] %vm18_vm0, %v87_v23 }

// kernel: transformer_xl_decoder.25
= control target key start
LH: loop header
LB: loop body
LE: loop exit
PB: predicated region body
PF: predicated region fallthrough
CT: control target
= control target key end

     0   :  { %8 = vsyncpa [#allocation4], 0  ;;  %s134_s15 = smov [#allocation3]   ;;  %s135_s17 = smov 128   ;;  %s184_s0 = inlined_call_operand.vmem [shape: f32[16,32], index: 0, kind: input, shape index: {}]   ;;  %s185_s1 = inlined_call_operand.hbm [shape: f32[32,32], index: 1, kind: input, shape index: {}]   ;;  %s186_s2 = inlined_call_operand.vmem [shape: f32[1,32], index: 2, kind: input, shape index: {}]   ;;  %s187_s3 = inlined_call_operand.vmem [shape: f32[16,32], index: 3, kind: output, shape index: {}]  }
   0x1   :  { %s15_s14 = sshll.u32 %s185_s1, 4  ;;  %s17_s16 = sshll.u32 %s134_s15, 4  ;;  %s16_s14 = int_to_ptr.hbm [resolvable:$true] %s15_s14  ;;  %s18_s16 = int_to_ptr.vmem [resolvable:$true] %s17_s16 }
   0x2   :  { %s136_s18 = smov 8  }
   0x3   :  { %23 = dma.hbm_to_vmem [thread:$0]  %s16_s14, 512, %s18_s16, [#allocation4], %s135_s17, %s135_s17, %s136_s18  }
   0x4   :  { %132 = dma.done.wait [#allocation4], 512  }
   0x5   :  { %133 = vsyncadd [#allocation4], 4294966784  ;;  %vm34_vm0 = vcmask 261120   ;;  %v137_v0 = vmov 0.0   ;;  %v44_v1 = vld [vmem:[#allocation3 + $0x18] sm:$0xff]  ;;  %v43_v2 = vld [vmem:[#allocation3 + $0x10] sm:$0xff] }
   0x6   :  { %35 = vst.msk [vmem:[#allocation2] sm:$0xff] %vm34_vm0, %v137_v0  ;;  %64 = vmatpush.msra.mxu0 %v44_v1  ;;  %99 = vmatpush.msra.mxu1 %v44_v1  ;;  %v42_v3 = vld [vmem:[#allocation3 + $0x8] sm:$0xff]  ;;  %v41_v4 = vld [vmem:[#allocation3] sm:$0xff]  ;;  %v39_v5 = vld [vmem:[%s184_s0] sm:$0xff] }
   0x7   :  { %36 = vst.msk [vmem:[#allocation2 + $0x8] sm:$0xff] %vm34_vm0, %v137_v0  ;;  %v40_v6 = vld [vmem:[%s184_s0 + $0x8] sm:$0xff]  ;;  %v107_v13 = vld [vmem:[%s186_s2] ss:$0 sm:$0xff] }
   0x8   :  { %65 = vmatpush.msra.mxu0 %v43_v2  ;;  %100 = vmatpush.msra.mxu1 %v43_v2 }
   0xa   :  { %66 = vmatpush.msra.mxu0 %v42_v3  ;;  %101 = vmatpush.msra.mxu1 %v42_v3 }
   0xc   :  { %67 = vmatpush.msra.mxu0 %v41_v4  ;;  %102 = vmatpush.msra.mxu1 %v41_v4 }
   0xd   :  { %97 = vmatmul.msk.f32.vlgmr.msra.gmra.mxu0 %vm34_vm0, %v39_v5  ;;  %98 = vmatmul.msk.f32.vlgmr.msra.gmra.mxu1 %vm34_vm0, %v40_v6  ;;  %v37_v7 = vld [vmem:[#allocation2] sm:$0xff] }
   0xe   :  { %v38_v8 = vld [vmem:[#allocation2 + $0x8] sm:$0xff] }
  0x8a   :  { %v69_v9 = vpop.f32.mrf.mxu0  ;;  %v72_v10 = vpop.f32.mrf.mxu1 }
  0x8b   :  { %v75_v11 = vadd.f32 %v69_v9, %v37_v7  ;;  %v76_v12 = vadd.f32 %v72_v10, %v38_v8 }
  0x8d   :  { %77 = vst.msk [vmem:[#allocation2] sm:$0xff] %vm34_vm0, %v75_v11 }
  0x8e   :  { %78 = vst.msk [vmem:[#allocation2 + $0x8] sm:$0xff] %vm34_vm0, %v76_v12 }
  0x94   :  { %v82_v14 = vld [vmem:[#allocation2] sm:$0xff] }
  0x95   :  { %v88_v15 = vadd.f32 %v107_v13, %v82_v14  ;;  %v83_v16 = vld [vmem:[#allocation2 + $0x8] sm:$0xff] }
  0x96   :  { %v89_v17 = vadd.f32 %v107_v13, %v83_v16 }
  0x97   :  { %90 = vst.msk [vmem:[%s187_s3] sm:$0xff] %vm34_vm0, %v88_v15 }
  0x98   :  { %91 = vst.msk [vmem:[%s187_s3 + $0x8] sm:$0xff] %vm34_vm0, %v89_v17 }
  0x99   :  { %96 = vsyncpa [#allocation4], 1 }

// kernel: transformer_xl_decoder.23
= control target key start
LH: loop header
LB: loop body
LE: loop exit
PB: predicated region body
PF: predicated region fallthrough
CT: control target
= control target key end

     0   :  { %s1294_s18 = smov 0   ;;  %s1574_s0 = inlined_call_operand.vmem [shape: f32[2,8,96], index: 0, kind: input, shape index: {}]   ;;  %s1575_s1 = inlined_call_operand.vmem [shape: f32[8,32], index: 1, kind: input, shape index: {}]   ;;  %s1576_s2 = inlined_call_operand.vmem [shape: f32[1,32], index: 2, kind: input, shape index: {}]   ;;  %s1577_s3 = inlined_call_operand.vmem [shape: f32[1,32], index: 3, kind: input, shape index: {}]   ;;  %s1578_s4 = inlined_call_operand.vmem [shape: f32[2,1,8], index: 4, kind: input, shape index: {}]   ;;  %s1579_s5 = inlined_call_operand.vmem [shape: f32[2,8,32], index: 5, kind: output, shape index: {}]  }
   0x1 LB: > { %s1138_s19 = sadd.s32 4294967295, %s1234_s18   ;;  %p1142_p0 = scmp.ge.s32.totalorder %s1234_s18, 1  ;;  %s1234_s18 = sphi %s1294_s18, %s15_s18  }
   0x2   : > { %p194_p1 = scmp.lt.s32.totalorder %s1234_s18, 3 }
   0x4   : > { %p195_p2 = pnand %p1142_p0, %p194_p1 }
   0x5   : > { %p223_p3 = scmp.lt.s32.totalorder (!%p195_p2), %s1138_s19, 1  ;;  %s1236_s28 = smov (!%p195_p2), 96  }
   0x6   : > { %198 = sbr.rel (%p195_p2) target bundleno = 1432 (0x598), region = 40  ;;  %s1237_s6 = smov (!%p195_p2), 124  }
   0x7   : > { %s1238_s7 = smov (!%p195_p2), 122   ;;  %s1239_s8 = smov (!%p195_p2), 121  }
   0x8   : > { %s1240_s9 = smov (!%p195_p2), 125   ;;  %s1241_s10 = smov (!%p195_p2), 123  }
   0x9   : > { %s1242_s11 = smov (!%p195_p2), 126   ;;  %s1243_s12 = smov (!%p195_p2), 127  }
   0xa   : > { %s1244_s13 = smov (!%p195_p2), 1   ;;  %s1245_s14 = smov (!%p195_p2), 2  }
   0xb   : > { %v1305_v0 = vld [vmem:[%s1575_s1] sm:$0xff]  ;;  %vm254_vm0 = vcmask 64512   ;;  %s1590_s19 = smov (!%p223_p3, %s1138_s19), 1  ;;  %vm381_vm1 = vcmask 57344   ;;  %s1246_s15 = smov 3   ;;  %vm329_vm2 = vcmask 24576   ;;  %v234_v46 = vlaneseq }
   0xc   : > { %1145 = vmatpush.xpose.msk.msra.mxu0 %vm254_vm0, %v1305_v0  ;;  %v1203_v1 = vld [vmem:[%s1577_s3] ss:$0 sm:$0xff]  ;;  %s1143_s24 = sshll.u32 %s1590_s19, 3  ;;  %s1247_s16 = smov 4   ;;  %vm343_vm3 = vcmask 32768   ;;  %vm301_vm4 = vcmask 8192  }
   0xd   : > { %s226_s27 = scalar_lea.vmem %s1574_s0, %s1143_s24  ;;  %v1204_v7 = vld [vmem:[%s1576_s2] ss:$0 sm:$0xff]  ;;  %s1248_s17 = smov 5   ;;  %vm336_vm5 = vcmask 57376   ;;  %vm287_vm6 = vcmask 0   ;;  %vm294_vm7 = vcmask 57352  }
   0xe   : > { %v1320_v2 = vld [vmem:[%s226_s27] sm:$0xff]  ;;  %s229_s22 = scalar_lea.vmem %s1578_s4, %s1590_s19  ;;  %s1249_s26 = smov 6   ;;  %vm315_vm8 = vcmask 16384   ;;  %vm357_vm9 = vcmask 40960   ;;  %vm371_vm10 = vcmask 49152   ;;  %vm1580_vm11 = vcmask 57400  }
   0xf   : > { %v252_v3 = vadd.f32 %v1203_v1, %v1320_v2  ;;  %385 = vrot.lane.b32.xlu0 %v1320_v2, %s1236_s28  ;;  %v247_v8 = vadd.f32 %v1204_v7, %v1320_v2  ;;  %v1205_v23 = vld [vmem:[%s1577_s3] ss:$0 sm:$0xff]  ;;  %s1250_s27 = smov 7   ;;  %s1251_s28 = smov 120   ;;  %vm308_vm12 = vcmask 57360   ;;  %vm1581_vm13 = vcmask 57368  }
  0x10   : > { %v467_v26 = vadd.f32 %v1205_v23, %v1320_v2  ;;  %s1252_s29 = smov 64   ;;  %s1253_s30 = smov 88   ;;  %v1207_v36 = vld [vmem:[%s1576_s2] ss:$0 sm:$0xff]  ;;  %vm1582_vm14 = vcmask 57384   ;;  %vm364_vm15 = vcmask 57392  }
  0x11   : > { %v253_v4 = vmul.f32 0.35355338, %v252_v3  ;;  %v248_v9 = vmul.f32 0.35355338, %v247_v8  ;;  %v462_v40 = vadd.f32 %v1207_v36, %v1320_v2  ;;  %v1380_v48 = vshrl.u32 %v234_v46, 7  ;;  %s1256_s20 = smov 104  }
  0x12   : > { %v468_v27 = vmul.f32 0.35355338, %v467_v26  ;;  %v1382_v49 = vand.u32 127, %v234_v46  ;;  %v1389_v50 = vld [vmem:[%s229_s22] ss:$0 sm:$0xff]  ;;  %s1257_s21 = smov 80  }
  0x13   : > { %1146 = vmatmul.msk.f32.vlgmr.msra.gmra.mxu0 %vm254_vm0, %v253_v4  ;;  %v463_v41 = vmul.f32 0.35355338, %v462_v40  ;;  %s1263_s19 = smov 24  }
  0x81   : > { %v386_v6 = vpop.permute.xlu0 %385 }
  0x82   : > { %1147 = vmatpush.xpose.msk.msra.mxu1 %vm254_vm0, %v386_v6 }
  0x85   : > { %1148 = vmatmul.msk.f32.vlgmr.msra.gmra.mxu1 %vm254_vm0, %v248_v9 }
  0x90   : > { %v278_v5 = vpop.f32.mrf.mxu0 }
  0x91   : > { %281 = vst.msk [vmem:[#allocation2] sm:$0xff] %vm254_vm0, %v278_v5 }
  0x98   : > { %v380_v10 = vld [vmem:[#allocation2 + $0x7] sm:$0x1]  ;;  %v324_v11 = vld [vmem:[#allocation2 + $0x3] sm:$0x1]  ;;  %v296_v12 = vld [vmem:[#allocation2 + $0x1] sm:$0x1] }
  0x99   : > { %382 = vst.msk [vmem:[#allocation3 + $0x7] sm:$0x1] %vm381_vm1, %v380_v10  ;;  %326 = vrot.lane.b32.xlu2 %v324_v11, %s1237_s6  ;;  %298 = vrot.lane.b32.xlu1 %v296_v12, %s1238_s7  ;;  %v282_v13 = vld [vmem:[#allocation2] sm:$0x1]  ;;  %v338_v14 = vld [vmem:[#allocation2 + $0x4] sm:$0x1] }
  0x9a   : > { %284 = vrot.lane.b32.xlu0 %v282_v13, %s1239_s8  ;;  %v310_v15 = vld [vmem:[#allocation2 + $0x2] sm:$0x1]  ;;  %v352_v16 = vld [vmem:[#allocation2 + $0x5] sm:$0x1]  ;;  %v366_v17 = vld [vmem:[#allocation2 + $0x6] sm:$0x1] }
  0x9b   : > { %v289_v18 = vld [vmem:[#allocation2] sm:$0x1]  ;;  %v303_v19 = vld [vmem:[#allocation2 + $0x1] sm:$0x1]  ;;  %v317_v20 = vld [vmem:[#allocation2 + $0x2] sm:$0x1] }
  0x9c   : > { %v331_v21 = vld [vmem:[#allocation2 + $0x3] sm:$0x1]  ;;  %v345_v22 = vld [vmem:[#allocation2 + $0x4] sm:$0x1]  ;;  %v359_v24 = vld [vmem:[#allocation2 + $0x5] sm:$0x1] }
  0x9d   : > { %v373_v25 = vld [vmem:[#allocation2 + $0x6] sm:$0x1] }
  0xa1   : > { %340 = vrot.lane.b32.xlu2 %v338_v14, %s1240_s9  ;;  %312 = vrot.lane.b32.xlu1 %v310_v15, %s1241_s10 }
  0xa2   : > { %354 = vrot.lane.b32.xlu0 %v352_v16, %s1242_s11 }
  0xa9   : > { %368 = vrot.lane.b32.xlu1 %v366_v17, %s1243_s12  ;;  %291 = vrot.lane.b32.xlu2 %v289_v18, %s1244_s13  ;;  %v1208_v17 = vld [vmem:[%s1577_s3] ss:$0 sm:$0xff] }
  0xaa   : > { %305 = vrot.lane.b32.xlu0 %v303_v19, %s1245_s14  ;;  %v674_v19 = vadd.f32 %v1208_v17, %v1320_v2 }
  0xb1   : > { %319 = vrot.lane.b32.xlu1 %v317_v20, %s1246_s15  ;;  %333 = vrot.lane.b32.xlu2 %v331_v21, %s1247_s16  ;;  %v675_v20 = vmul.f32 0.35355338, %v674_v19 }
  0xb2   : > { %347 = vrot.lane.b32.xlu0 %v345_v22, %s1248_s17 }
  0xb9   : > { %361 = vrot.lane.b32.xlu1 %v359_v24, %s1249_s26  ;;  %375 = vrot.lane.b32.xlu2 %v373_v25, %s1250_s27 }
  0xba   : > { %473 = vrot.lane.b32.xlu0 %v1305_v0, %s1251_s28 }
  0xc1   : > { %470 = vrot.lane.b32.xlu1 %v468_v27, %s1251_s28 }
  0xc2   : > { %426 = vrot.lane.b32.xlu0 %v1320_v2, %s1252_s29  ;;  %s1254_s29 = smov 112  }
  0xc9   : > { %591 = vrot.lane.b32.xlu1 %v1320_v2, %s1253_s30  ;;  %s1255_s30 = smov 56  }
  0xca   : > { %588 = vrot.lane.b32.xlu0 %v463_v41, %s1251_s28 }
  0xf3   : > { %v327_v28 = vpop.permute.xlu2 %326 }
  0xf4   : > { %330 = vst.msk [vmem:[#allocation3 + $0x3] sm:$0x1] %vm329_vm2, %v327_v28 }
  0xfb   : > { %v341_v29 = vpop.permute.xlu2 %340 }
  0xfc   : > { %344 = vst.msk [vmem:[#allocation3 + $0x4] sm:$0x1] %vm343_vm3, %v341_v29  ;;  %v1209_v29 = vld [vmem:[%s1577_s3] ss:$0 sm:$0xff] }
 0x102   : > { %v409_v47 = vpop.f32.mrf.mxu1 }
 0x103   : > { %v292_v30 = vpop.permute.xlu2 %291 }
 0x10b   : > { %v299_v31 = vpop.permute.xlu1 %298  ;;  %v334_v32 = vpop.permute.xlu2 %333 }
 0x10c   : > { %302 = vst.msk [vmem:[#allocation3 + $0x1] sm:$0x1] %vm301_vm4, %v299_v31  ;;  %v285_v33 = vpop.permute.xlu0 %284 }
 0x10d   : > { %337 = vst.msk [vmem:[#allocation3 + $0x3] sm:$0x1] %vm336_vm5, %v334_v32  ;;  %v881_v32 = vadd.f32 %v1209_v29, %v1320_v2 }
 0x10e   : > { %288 = vst.msk [vmem:[#allocation3] sm:$0x1] %vm287_vm6, %v285_v33  ;;  %v1210_v33 = vld [vmem:[%s1576_s2] ss:$0 sm:$0xff] }
 0x10f   : > { %295 = vst.msk [vmem:[#allocation3] sm:$0x1] %vm294_vm7, %v292_v30 }
 0x113   : > { %v313_v34 = vpop.permute.xlu1 %312  ;;  %v376_v38 = vpop.permute.xlu2 %375 }
 0x114   : > { %316 = vst.msk [vmem:[#allocation3 + $0x2] sm:$0x1] %vm315_vm8, %v313_v34  ;;  %v355_v35 = vpop.permute.xlu0 %354  ;;  %v882_v34 = vmul.f32 0.35355338, %v881_v32 }
 0x115   : > { %358 = vst.msk [vmem:[#allocation3 + $0x5] sm:$0x1] %vm357_vm9, %v355_v35  ;;  %v669_v35 = vadd.f32 %v1210_v33, %v1320_v2 }
 0x11b   : > { %v369_v37 = vpop.permute.xlu1 %368 }
 0x11c   : > { %372 = vst.msk [vmem:[#allocation3 + $0x6] sm:$0x1] %vm371_vm10, %v369_v37  ;;  %v306_v39 = vpop.permute.xlu0 %305 }
 0x11d   : > { %379 = vst.msk [vmem:[#allocation3 + $0x6] sm:$0x1] %vm1580_vm11, %v376_v38  ;;  %vm238_vm11 = vcmp.gt.s32.totalorder %v1382_v49, %v1380_v48  ;;  %v670_v38 = vmul.f32 0.35355338, %v669_v35 }
 0x11e   : > { %309 = vst.msk [vmem:[#allocation3 + $0x1] sm:$0x1] %vm308_vm12, %v306_v39 }
 0x123   : > { %v320_v42 = vpop.permute.xlu1 %319 }
 0x124   : > { %323 = vst.msk [vmem:[#allocation3 + $0x2] sm:$0x1] %vm1581_vm13, %v320_v42  ;;  %v348_v43 = vpop.permute.xlu0 %347 }
 0x125   : > { %351 = vst.msk [vmem:[#allocation3 + $0x4] sm:$0x1] %vm1582_vm14, %v348_v43 }
 0x12b   : > { %v362_v44 = vpop.permute.xlu1 %361 }
 0x12c   : > { %365 = vst.msk [vmem:[#allocation3 + $0x5] sm:$0x1] %vm364_vm15, %v362_v44  ;;  %v474_v45 = vpop.permute.xlu0 %473 }
 0x12d   : > { %1150 = vmatpush.xpose.msk.msra.mxu3 %vm254_vm0, %v474_v45 }
 0x133   : > { %v383_v51 = vld [vmem:[#allocation3] sm:$0xff]  ;;  %v471_v52 = vpop.permute.xlu1 %470 }
 0x134   : > { %v410_v53 = vadd.f32 %v409_v47, %v383_v51  ;;  %1151 = vmatmul.msk.f32.vlgmr.msra.gmra.mxu3 %vm254_vm0, %v471_v52  ;;  %v427_v57 = vpop.permute.xlu0 %426 }
 0x135   : > { %447 = vmatpush.msra.mxu2 %v427_v57 }
 0x136   : > { %v415_v54 = vadd.f32 %v1389_v50, %v410_v53  ;;  %v1211_v53 = vld [vmem:[%s1576_s2] ss:$0 sm:$0xff] }
 0x138   : > { %v416_v55 = vsel %vm238_vm11, -1e+30, %v415_v54 }
 0x139   : > { %v417_v56 = vsel %vm254_vm0, %v416_v55, -inf }
 0x13a   : > { %418 = vmax.xlane.f32.xlu2 %v417_v56 }
 0x13b   : > { %v592_v63 = vpop.permute.xlu1 %591 }
 0x13c   : > { %1152 = vmatpush.xpose.msk.msrb.mxu2 %vm254_vm0, %v592_v63  ;;  %v589_v6 = vpop.permute.xlu0 %588 }
 0x1ad   : > { %v419_v58 = vpop.xlane.xlu2 %418 }
 0x1ae   : > { %v420_v59 = vsub.f32 %v416_v55, %v419_v58  ;;  %v876_v55 = vadd.f32 %v1211_v53, %v1320_v2 }
 0x1b0   : > { %v421_v60 = vmul.f32 1.442695, %v420_v59  ;;  %v877_v56 = vmul.f32 0.35355338, %v876_v55 }
 0x1b2   : > { %1212 = vpow2.f32 %v421_v60 }
 0x1b7   : > { %v496_v61 = vpop.f32.mrf.mxu3 }
 0x1b8   : > { %v1399_v62 = vpop.eup %1212  ;;  %499 = vst.msk [vmem:[#allocation2] sm:$0xff] %vm254_vm0, %v496_v61 }
 0x1b9   : > { %1149 = vmatmul.msk.f32.vlgmr.msra.gmra.mxu2 %vm254_vm0, %v1399_v62 }
 0x1bf   : > { %v584_v1 = vld [vmem:[#allocation2 + $0x7] sm:$0x1]  ;;  %v512_v3 = vld [vmem:[#allocation2 + $0x1] sm:$0x1]  ;;  %v500_v4 = vld [vmem:[#allocation2] sm:$0x1] }
 0x1c0   : > { %585 = vst.msk [vmem:[#allocation3 + $0x7] sm:$0x1] %vm381_vm1, %v584_v1  ;;  %514 = vrot.lane.b32.xlu0 %v512_v3, %s1238_s7  ;;  %502 = vrot.lane.b32.xlu1 %v500_v4, %s1239_s8  ;;  %v506_v5 = vld [vmem:[#allocation2] sm:$0x1]  ;;  %v536_v7 = vld [vmem:[#allocation2 + $0x3] sm:$0x1] }
 0x1c1   : > { %508 = vrot.lane.b32.xlu2 %v506_v5, %s1244_s13  ;;  %1153 = vmatmul.msk.f32.vlgmr.msrb.gmra.mxu2 %vm254_vm0, %v589_v6  ;;  %v524_v8 = vld [vmem:[#allocation2 + $0x2] sm:$0x1]  ;;  %v560_v9 = vld [vmem:[#allocation2 + $0x5] sm:$0x1]  ;;  %v548_v10 = vld [vmem:[#allocation2 + $0x4] sm:$0x1] }
 0x1c2   : > { %v518_v11 = vld [vmem:[#allocation2 + $0x1] sm:$0x1]  ;;  %v572_v12 = vld [vmem:[#allocation2 + $0x6] sm:$0x1]  ;;  %v542_v13 = vld [vmem:[#allocation2 + $0x3] sm:$0x1] }
 0x1c3   : > { %v530_v14 = vld [vmem:[#allocation2 + $0x2] sm:$0x1]  ;;  %v566_v15 = vld [vmem:[#allocation2 + $0x5] sm:$0x1]  ;;  %v554_v16 = vld [vmem:[#allocation2 + $0x4] sm:$0x1] }
 0x1c4   : > { %v578_v18 = vld [vmem:[#allocation2 + $0x6] sm:$0x1] }
 0x1c8   : > { %538 = vrot.lane.b32.xlu0 %v536_v7, %s1237_s6  ;;  %526 = vrot.lane.b32.xlu1 %v524_v8, %s1241_s10 }
 0x1d0   : > { %562 = vrot.lane.b32.xlu0 %v560_v9, %s1242_s11  ;;  %550 = vrot.lane.b32.xlu1 %v548_v10, %s1240_s9 }
 0x1d8   : > { %520 = vrot.lane.b32.xlu0 %v518_v11, %s1245_s14  ;;  %574 = vrot.lane.b32.xlu1 %v572_v12, %s1243_s12 }
 0x1e0   : > { %544 = vrot.lane.b32.xlu0 %v542_v13, %s1247_s16  ;;  %532 = vrot.lane.b32.xlu1 %v530_v14, %s1246_s15 }
 0x1e8   : > { %568 = vrot.lane.b32.xlu0 %v566_v15, %s1249_s26  ;;  %556 = vrot.lane.b32.xlu1 %v554_v16, %s1248_s17 }
 0x1f0   : > { %680 = vrot.lane.b32.xlu0 %v1305_v0, %s1254_s29  ;;  %580 = vrot.lane.b32.xlu1 %v578_v18, %s1250_s27 }
 0x1f8   : > { %677 = vrot.lane.b32.xlu0 %v675_v20, %s1254_s29  ;;  %628 = vrot.lane.b32.xlu1 %v1320_v2, %s1255_s30  ;;  %s1258_s30 = smov 72  }
 0x200   : > { %887 = vrot.lane.b32.xlu1 %v1305_v0, %s1256_s20  ;;  %884 = vrot.lane.b32.xlu0 %v882_v34, %s1256_s20 }
 0x208   : > { %798 = vrot.lane.b32.xlu1 %v1320_v2, %s1257_s21  ;;  %795 = vrot.lane.b32.xlu0 %v670_v38, %s1254_s29 }
 0x210   : > { %1005 = vrot.lane.b32.xlu1 %v1320_v2, %s1258_s30  ;;  %1002 = vrot.lane.b32.xlu0 %v877_v56, %s1256_s20 }
 0x21b   : > { %v509_v23 = vpop.permute.xlu2 %508 }
 0x232   : > { %v503_v21 = vpop.permute.xlu1 %502  ;;  %v515_v22 = vpop.permute.xlu0 %514 }
 0x233   : > { %505 = vst.msk [vmem:[#allocation3] sm:$0x1] %vm287_vm6, %v503_v21 }
 0x234   : > { %511 = vst.msk [vmem:[#allocation3] sm:$0x1] %vm294_vm7, %v509_v23 }
 0x235   : > { %517 = vst.msk [vmem:[#allocation3 + $0x1] sm:$0x1] %vm301_vm4, %v515_v22 }
 0x23a   : > { %v527_v24 = vpop.permute.xlu1 %526  ;;  %v539_v25 = vpop.permute.xlu0 %538 }
 0x23b   : > { %529 = vst.msk [vmem:[#allocation3 + $0x2] sm:$0x1] %vm315_vm8, %v527_v24 }
 0x23c   : > { %541 = vst.msk [vmem:[#allocation3 + $0x3] sm:$0x1] %vm329_vm2, %v539_v25  ;;  %v1455_v39 = vpop.f32.mrf.mxu2 }
 0x242   : > { %v551_v26 = vpop.permute.xlu1 %550  ;;  %v563_v0 = vpop.permute.xlu0 %562 }
 0x243   : > { %553 = vst.msk [vmem:[#allocation3 + $0x4] sm:$0x1] %vm343_vm3, %v551_v26 }
 0x244   : > { %565 = vst.msk [vmem:[#allocation3 + $0x5] sm:$0x1] %vm357_vm9, %v563_v0  ;;  %v614_v42 = vpop.f32.mrf.mxu2 }
 0x24a   : > { %v575_v27 = vpop.permute.xlu1 %574  ;;  %v521_v28 = vpop.permute.xlu0 %520 }
 0x24b   : > { %577 = vst.msk [vmem:[#allocation3 + $0x6] sm:$0x1] %vm371_vm10, %v575_v27 }
 0x24c   : > { %523 = vst.msk [vmem:[#allocation3 + $0x1] sm:$0x1] %vm308_vm12, %v521_v28 }
 0x252   : > { %v533_v30 = vpop.permute.xlu1 %532  ;;  %v545_v31 = vpop.permute.xlu0 %544 }
 0x253   : > { %535 = vst.msk [vmem:[#allocation3 + $0x2] sm:$0x1] %vm1581_vm13, %v533_v30  ;;  %vm1583_vm13 = vcmask 57400  }
 0x254   : > { %547 = vst.msk [vmem:[#allocation3 + $0x3] sm:$0x1] %vm336_vm5, %v545_v31 }
 0x25a   : > { %v557_v36 = vpop.permute.xlu1 %556  ;;  %v569_v37 = vpop.permute.xlu0 %568 }
 0x25b   : > { %559 = vst.msk [vmem:[#allocation3 + $0x4] sm:$0x1] %vm1582_vm14, %v557_v36 }
 0x25c   : > { %571 = vst.msk [vmem:[#allocation3 + $0x5] sm:$0x1] %vm364_vm15, %v569_v37 }
 0x262   : > { %v581_v40 = vpop.permute.xlu1 %580  ;;  %v681_v41 = vpop.permute.xlu0 %680 }
 0x263   : > { %583 = vst.msk [vmem:[#allocation3 + $0x6] sm:$0x1] %vm1583_vm13, %v581_v40  ;;  %1155 = vmatpush.xpose.msk.msrb.mxu1 %vm254_vm0, %v681_v41  ;;  %vm1584_vm13 = vcmask 57368  }
 0x26a   : > { %v586_v43 = vld [vmem:[#allocation3] sm:$0xff]  ;;  %v678_v44 = vpop.permute.xlu0 %677  ;;  %v629_v52 = vpop.permute.xlu1 %628 }
 0x26b   : > { %v615_v45 = vadd.f32 %v614_v42, %v586_v43  ;;  %1156 = vmatmul.msk.f32.vlgmr.msrb.gmra.mxu1 %vm254_vm0, %v678_v44  ;;  %649 = vmatpush.msrb.mxu0 %v629_v52 }
 0x26d   : > { %v617_v46 = vadd.f32 %v1389_v50, %v615_v45 }
 0x26f   : > { %v618_v47 = vsel %vm238_vm11, -1e+30, %v617_v46 }
 0x270   : > { %v619_v51 = vsel %vm254_vm0, %v618_v47, -inf }
 0x271   : > { %620 = vmax.xlane.f32.xlu2 %v619_v51 }
 0x272   : > { %v888_v54 = vpop.permute.xlu1 %887  ;;  %v885_v57 = vpop.permute.xlu0 %884 }
 0x273   : > { %1160 = vmatpush.xpose.msk.msra.mxu0 %vm254_vm0, %v888_v54 }
 0x27a   : > { %v799_v63 = vpop.permute.xlu1 %798  ;;  %v796_v1 = vpop.permute.xlu0 %795 }
 0x27b   : > { %1157 = vmatpush.xpose.msk.msrb.mxu3 %vm254_vm0, %v799_v63 }
 0x27e   : > { %1158 = vmatmul.msk.f32.vlgmr.msrb.gmra.mxu3 %vm254_vm0, %v796_v1 }
 0x282   : > { %v1006_v10 = vpop.permute.xlu1 %1005  ;;  %v1003_v20 = vpop.permute.xlu0 %1002 }
 0x283   : > { %1162 = vmatpush.xpose.msk.msra.mxu1 %vm254_vm0, %v1006_v10 }
 0x286   : > { %1163 = vmatmul.msk.f32.vlgmr.msra.gmra.mxu1 %vm254_vm0, %v1003_v20 }
 0x2e4   : > { %v621_v58 = vpop.xlane.xlu2 %620 }
 0x2e5   : > { %v622_v59 = vsub.f32 %v618_v47, %v621_v58 }
 0x2e7   : > { %v623_v60 = vmul.f32 1.442695, %v622_v59 }
 0x2e8   : > { %v703_v61 = vpop.f32.mrf.mxu1 }
 0x2e9   : > { %1214 = vpow2.f32 %v623_v60  ;;  %706 = vst.msk [vmem:[#allocation2] sm:$0xff] %vm254_vm0, %v703_v61 }
 0x2ef   : > { %v1475_v3 = vpop.eup %1214 }
 0x2f0   : > { %v791_v4 = vld [vmem:[#allocation2 + $0x7] sm:$0x1]  ;;  %1154 = vmatmul.msk.f32.vlgmr.msrb.gmra.mxu0 %vm254_vm0, %v1475_v3  ;;  %v707_v5 = vld [vmem:[#allocation2] sm:$0x1]  ;;  %v731_v6 = vld [vmem:[#allocation2 + $0x2] sm:$0x1] }
 0x2f1   : > { %792 = vst.msk [vmem:[#allocation3 + $0x7] sm:$0x1] %vm381_vm1, %v791_v4  ;;  %709 = vrot.lane.b32.xlu1 %v707_v5, %s1239_s8  ;;  %733 = vrot.lane.b32.xlu0 %v731_v6, %s1241_s10  ;;  %v743_v7 = vld [vmem:[#allocation2 + $0x3] sm:$0x1]  ;;  %v755_v8 = vld [vmem:[#allocation2 + $0x4] sm:$0x1] }
 0x2f2   : > { %v719_v9 = vld [vmem:[#allocation2 + $0x1] sm:$0x1]  ;;  %v767_v11 = vld [vmem:[#allocation2 + $0x5] sm:$0x1]  ;;  %v779_v12 = vld [vmem:[#allocation2 + $0x6] sm:$0x1] }
 0x2f3   : > { %721 = vrot.lane.b32.xlu2 %v719_v9, %s1238_s7  ;;  %v725_v13 = vld [vmem:[#allocation2 + $0x1] sm:$0x1]  ;;  %v713_v14 = vld [vmem:[#allocation2] sm:$0x1]  ;;  %v737_v15 = vld [vmem:[#allocation2 + $0x2] sm:$0x1] }
 0x2f4   : > { %v761_v16 = vld [vmem:[#allocation2 + $0x4] sm:$0x1]  ;;  %v749_v17 = vld [vmem:[#allocation2 + $0x3] sm:$0x1]  ;;  %v773_v18 = vld [vmem:[#allocation2 + $0x5] sm:$0x1] }
 0x2f5   : > { %v785_v19 = vld [vmem:[#allocation2 + $0x6] sm:$0x1]  ;;  %v625_v61 = vsel %vm254_vm0, %v1475_v3, 0.0 }
 0x2f8   : > { %1161 = vmatmul.msk.f32.vlgmr.msra.gmra.mxu0 %vm254_vm0, %v885_v57 }
 0x2f9   : > { %745 = vrot.lane.b32.xlu1 %v743_v7, %s1237_s6  ;;  %757 = vrot.lane.b32.xlu0 %v755_v8, %s1240_s9 }
 0x2fb   : > { %727 = vrot.lane.b32.xlu2 %v725_v13, %s1245_s14 }
 0x301   : > { %769 = vrot.lane.b32.xlu1 %v767_v11, %s1242_s11  ;;  %781 = vrot.lane.b32.xlu0 %v779_v12, %s1243_s12  ;;  %v821_v56 = vpop.f32.mrf.mxu3 }
 0x303   : > { %763 = vrot.lane.b32.xlu2 %v761_v16, %s1248_s17 }
 0x309   : > { %715 = vrot.lane.b32.xlu1 %v713_v14, %s1244_s13  ;;  %739 = vrot.lane.b32.xlu0 %v737_v15, %s1246_s15  ;;  %v1028_v14 = vpop.f32.mrf.mxu1 }
 0x311   : > { %751 = vrot.lane.b32.xlu1 %v749_v17, %s1247_s16  ;;  %775 = vrot.lane.b32.xlu0 %v773_v18, %s1249_s26 }
 0x319   : > { %787 = vrot.lane.b32.xlu1 %v785_v19, %s1250_s27 }
 0x34d   : > { %v722_v21 = vpop.permute.xlu2 %721 }
 0x34e   : > { %724 = vst.msk [vmem:[#allocation3 + $0x1] sm:$0x1] %vm301_vm4, %v722_v21 }
 0x355   : > { %v728_v24 = vpop.permute.xlu2 %727 }
 0x356   : > { %730 = vst.msk [vmem:[#allocation3 + $0x1] sm:$0x1] %vm308_vm12, %v728_v24 }
 0x35d   : > { %v764_v0 = vpop.permute.xlu2 %763 }
 0x363   : > { %v710_v22 = vpop.permute.xlu1 %709  ;;  %v734_v23 = vpop.permute.xlu0 %733 }
 0x364   : > { %712 = vst.msk [vmem:[#allocation3] sm:$0x1] %vm287_vm6, %v710_v22 }
 0x365   : > { %736 = vst.msk [vmem:[#allocation3 + $0x2] sm:$0x1] %vm315_vm8, %v734_v23 }
 0x36b   : > { %v746_v25 = vpop.permute.xlu1 %745  ;;  %v758_v26 = vpop.permute.xlu0 %757 }
 0x36c   : > { %748 = vst.msk [vmem:[#allocation3 + $0x3] sm:$0x1] %vm329_vm2, %v746_v25 }
 0x36d   : > { %v1502_v27 = vpop.f32.mrf.mxu0  ;;  %760 = vst.msk [vmem:[#allocation3 + $0x4] sm:$0x1] %vm343_vm3, %v758_v26 }
 0x36e   : > { %766 = vst.msk [vmem:[#allocation3 + $0x4] sm:$0x1] %vm1582_vm14, %v764_v0  ;;  %vm1585_vm14 = vcmask 57400  }
 0x373   : > { %v770_v28 = vpop.permute.xlu1 %769  ;;  %v782_v29 = vpop.permute.xlu0 %781 }
 0x374   : > { %772 = vst.msk [vmem:[#allocation3 + $0x5] sm:$0x1] %vm357_vm9, %v770_v28 }
 0x375   : > { %v910_v30 = vpop.f32.mrf.mxu0  ;;  %784 = vst.msk [vmem:[#allocation3 + $0x6] sm:$0x1] %vm371_vm10, %v782_v29 }
 0x376   : > { %913 = vst.msk [vmem:[#allocation2] sm:$0xff] %vm254_vm0, %v910_v30 }
 0x37b   : > { %v716_v31 = vpop.permute.xlu1 %715  ;;  %v740_v32 = vpop.permute.xlu0 %739 }
 0x37c   : > { %718 = vst.msk [vmem:[#allocation3] sm:$0x1] %vm294_vm7, %v716_v31 }
 0x37d   : > { %v938_v33 = vld [vmem:[#allocation2 + $0x2] sm:$0x1]  ;;  %v926_v34 = vld [vmem:[#allocation2 + $0x1] sm:$0x1]  ;;  %v914_v35 = vld [vmem:[#allocation2] sm:$0x1] }
 0x37e   : > { %940 = vrot.lane.b32.xlu1 %v938_v33, %s1241_s10  ;;  %928 = vrot.lane.b32.xlu0 %v926_v34, %s1238_s7  ;;  %742 = vst.msk [vmem:[#allocation3 + $0x2] sm:$0x1] %vm1584_vm13, %v740_v32  ;;  %v974_v38 = vld [vmem:[#allocation2 + $0x5] sm:$0x1]  ;;  %v962_v40 = vld [vmem:[#allocation2 + $0x4] sm:$0x1] }
 0x37f   : > { %916 = vrot.lane.b32.xlu2 %v914_v35, %s1239_s8  ;;  %v950_v41 = vld [vmem:[#allocation2 + $0x3] sm:$0x1]  ;;  %v932_v43 = vld [vmem:[#allocation2 + $0x1] sm:$0x1]  ;;  %v920_v44 = vld [vmem:[#allocation2] sm:$0x1] }
 0x380   : > { %v986_v45 = vld [vmem:[#allocation2 + $0x6] sm:$0x1]  ;;  %v998_v47 = vld [vmem:[#allocation2 + $0x7] sm:$0x1]  ;;  %v968_v51 = vld [vmem:[#allocation2 + $0x4] sm:$0x1] }
 0x381   : > { %v956_v52 = vld [vmem:[#allocation2 + $0x3] sm:$0x1]  ;;  %v944_v53 = vld [vmem:[#allocation2 + $0x2] sm:$0x1]  ;;  %v992_v54 = vld [vmem:[#allocation2 + $0x6] sm:$0x1] }
 0x382   : > { %v980_v55 = vld [vmem:[#allocation2 + $0x5] sm:$0x1]  ;;  %s1260_s7 = smov 40   ;;  %s1261_s8 = smov 8  }
 0x383   : > { %v752_v36 = vpop.permute.xlu1 %751  ;;  %v776_v37 = vpop.permute.xlu0 %775 }
 0x384   : > { %754 = vst.msk [vmem:[#allocation3 + $0x3] sm:$0x1] %vm336_vm5, %v752_v36 }
 0x385   : > { %778 = vst.msk [vmem:[#allocation3 + $0x5] sm:$0x1] %vm364_vm15, %v776_v37 }
 0x386   : > { %976 = vrot.lane.b32.xlu1 %v974_v38, %s1242_s11  ;;  %964 = vrot.lane.b32.xlu0 %v962_v40, %s1240_s9  ;;  %s233_s11 = scalar_lea.vmem %s1579_s5, %s1143_s24 }
 0x387   : > { %952 = vrot.lane.b32.xlu2 %v950_v41, %s1237_s6  ;;  %s1259_s6 = smov 48  }
 0x38b   : > { %v788_v42 = vpop.permute.xlu1 %787 }
 0x38c   : > { %790 = vst.msk [vmem:[#allocation3 + $0x6] sm:$0x1] %vm1585_vm14, %v788_v42 }
 0x38e   : > { %934 = vrot.lane.b32.xlu1 %v932_v43, %s1245_s14  ;;  %922 = vrot.lane.b32.xlu0 %v920_v44, %s1244_s13 }
 0x38f   : > { %988 = vrot.lane.b32.xlu2 %v986_v45, %s1243_s12  ;;  %s1262_s12 = smov 16  }
 0x393   : > { %v793_v46 = vld [vmem:[#allocation3] sm:$0xff] }
 0x394   : > { %999 = vst.msk [vmem:[#allocation3 + $0x7] sm:$0x1] %vm381_vm1, %v998_v47  ;;  %v822_v57 = vadd.f32 %v821_v56, %v793_v46  ;;  %vm1586_vm1 = vmmov %vm1584_vm13 }
 0x396   : > { %970 = vrot.lane.b32.xlu1 %v968_v51, %s1248_s17  ;;  %958 = vrot.lane.b32.xlu0 %v956_v52, %s1247_s16  ;;  %v824_v58 = vadd.f32 %v1389_v50, %v822_v57 }
 0x397   : > { %946 = vrot.lane.b32.xlu2 %v944_v53, %s1246_s15 }
 0x398   : > { %v825_v59 = vsel %vm238_vm11, -1e+30, %v824_v58 }
 0x399   : > { %v826_v60 = vsel %vm254_vm0, %v825_v59, -inf }
 0x39e   : > { %994 = vrot.lane.b32.xlu0 %v992_v54, %s1250_s27 }
 0x39f   : > { %982 = vrot.lane.b32.xlu2 %v980_v55, %s1249_s26 }
 0x3a6   : > { %835 = vrot.lane.b32.xlu0 %v1320_v2, %s1259_s6 }
 0x3ae   : > { %1042 = vrot.lane.b32.xlu0 %v1320_v2, %s1260_s7 }
 0x3c0   : > { %827 = vmax.xlane.f32.xlu1 %v826_v60 }
 0x3d8   : > { %626 = vadd.xlane.f32.xlu0 %v625_v61 }
 0x3d9   : > { %v917_v63 = vpop.permute.xlu2 %916 }
 0x3da   : > { %919 = vst.msk [vmem:[#allocation3] sm:$0x1] %vm287_vm6, %v917_v63  ;;  %vm1074_vm6 = vcmask 261312  }
 0x3e1   : > { %v953_v1 = vpop.permute.xlu2 %952 }
 0x3e2   : > { %955 = vst.msk [vmem:[#allocation3 + $0x3] sm:$0x1] %vm329_vm2, %v953_v1  ;;  %vm1587_vm2 = vcmask 57384  }
 0x3e9   : > { %v989_v2 = vpop.permute.xlu2 %988 }
 0x3ea   : > { %991 = vst.msk [vmem:[#allocation3 + $0x6] sm:$0x1] %vm371_vm10, %v989_v2 }
 0x3f0   : > { %v941_v4 = vpop.permute.xlu1 %940  ;;  %v929_v5 = vpop.permute.xlu0 %928 }
 0x3f1   : > { %943 = vst.msk [vmem:[#allocation3 + $0x2] sm:$0x1] %vm315_vm8, %v941_v4  ;;  %v947_v6 = vpop.permute.xlu2 %946 }
 0x3f2   : > { %931 = vst.msk [vmem:[#allocation3 + $0x1] sm:$0x1] %vm301_vm4, %v929_v5  ;;  %vm1588_vm4 = vmmov %vm1585_vm14 }
 0x3f3   : > { %949 = vst.msk [vmem:[#allocation3 + $0x2] sm:$0x1] %vm1586_vm1, %v947_v6 }
 0x3f8   : > { %v977_v3 = vpop.permute.xlu1 %976  ;;  %v965_v7 = vpop.permute.xlu0 %964 }
 0x3f9   : > { %979 = vst.msk [vmem:[#allocation3 + $0x5] sm:$0x1] %vm357_vm9, %v977_v3  ;;  %v983_v8 = vpop.permute.xlu2 %982 }
 0x3fa   : > { %967 = vst.msk [vmem:[#allocation3 + $0x4] sm:$0x1] %vm343_vm3, %v965_v7  ;;  %vm660_vm3 = vcmask 130112  }
 0x3fb   : > { %985 = vst.msk [vmem:[#allocation3 + $0x5] sm:$0x1] %vm364_vm15, %v983_v8 }
 0x400   : > { %v935_v9 = vpop.permute.xlu1 %934  ;;  %v923_v10 = vpop.permute.xlu0 %922 }
 0x401   : > { %937 = vst.msk [vmem:[#allocation3 + $0x1] sm:$0x1] %vm308_vm12, %v935_v9 }
 0x402   : > { %925 = vst.msk [vmem:[#allocation3] sm:$0x1] %vm294_vm7, %v923_v10 }
 0x408   : > { %v971_v11 = vpop.permute.xlu1 %970  ;;  %v959_v12 = vpop.permute.xlu0 %958 }
 0x409   : > { %973 = vst.msk [vmem:[#allocation3 + $0x4] sm:$0x1] %vm1587_vm2, %v971_v11 }
 0x40a   : > { %961 = vst.msk [vmem:[#allocation3 + $0x3] sm:$0x1] %vm336_vm5, %v959_v12  ;;  %vm867_vm5 = vcmask 195712  }
 0x410   : > { %v995_v13 = vpop.permute.xlu0 %994 }
 0x411   : > { %997 = vst.msk [vmem:[#allocation3 + $0x6] sm:$0x1] %vm1588_vm4, %v995_v13 }
 0x418   : > { %v1000_v15 = vld [vmem:[#allocation3] sm:$0xff]  ;;  %v836_v16 = vpop.permute.xlu0 %835 }
 0x419   : > { %v1029_v17 = vadd.f32 %v1028_v14, %v1000_v15  ;;  %856 = vmatpush.msra.mxu2 %v836_v16 }
 0x41b   : > { %v1031_v18 = vadd.f32 %v1389_v50, %v1029_v17  ;;  %v423_v50 = vsel %vm254_vm0, %v1399_v62, 0.0 }
 0x41d   : > { %v1032_v19 = vsel %vm238_vm11, -1e+30, %v1031_v18 }
 0x41e   : > { %v1033_v20 = vsel %vm254_vm0, %v1032_v19, -inf }
 0x41f   : > { %1034 = vmax.xlane.f32.xlu2 %v1033_v20 }
 0x420   : > { %v1043_v21 = vpop.permute.xlu0 %1042 }
 0x421   : > { %1063 = vmatpush.msra.mxu3 %v1043_v21 }
 0x433   : > { %v828_v22 = vpop.xlane.xlu1 %827 }
 0x434   : > { %v829_v23 = vsub.f32 %v825_v59, %v828_v22 }
 0x436   : > { %v830_v24 = vmul.f32 1.442695, %v829_v23 }
 0x438   : > { %1216 = vpow2.f32 %v830_v24 }
 0x43e   : > { %v1217_v25 = vpop.eup %1216 }
 0x43f   : > { %1159 = vmatmul.msk.f32.vlgmr.msra.gmra.mxu2 %vm254_vm0, %v1217_v25  ;;  %v832_v26 = vsel %vm254_vm0, %v1217_v25, 0.0 }
 0x440   : > { %833 = vadd.xlane.f32.xlu1 %v832_v26 }
 0x448   : > { %424 = vadd.xlane.f32.xlu1 %v423_v50 }
 0x44b   : > { %v627_v30 = vpop.xlane.xlu0 %626 }
 0x492   : > { %v1035_v48 = vpop.xlane.xlu2 %1034 }
 0x493   : > { %v1036_v49 = vsub.f32 %v1032_v19, %v1035_v48 }
 0x495   : > { %v1037_v0 = vmul.f32 1.442695, %v1036_v49 }
 0x497   : > { %1218 = vpow2.f32 %v1037_v0 }
 0x498   : > { %1220 = vrcp.f32 %v627_v30 }
 0x49d   : > { %v1219_v28 = vpop.eup %1218 }
 0x49e   : > { %1164 = vmatmul.msk.f32.vlgmr.msra.gmra.mxu3 %vm254_vm0, %v1219_v28  ;;  %v1039_v29 = vsel %vm254_vm0, %v1219_v28, 0.0  ;;  %v1221_v31 = vpop.eup %1220 }
 0x49f   : > { %1040 = vadd.xlane.f32.xlu2 %v1039_v29  ;;  %v655_v33 = vmul.f32 %v1221_v31, %v1502_v27 }
 0x4b3   : > { %v834_v32 = vpop.xlane.xlu1 %833 }
 0x4b4   : > { %1222 = vrcp.f32 %v834_v32 }
 0x4b7   : > { %657 = vrot.lane.b32.xlu2 %v655_v33, %s1261_s8 }
 0x4ba   : > { %v1223_v34 = vpop.eup %1222 }
 0x4bb   : > { %v425_v62 = vpop.xlane.xlu1 %424 }
 0x4bc   : > { %1224 = vrcp.f32 %v425_v62 }
 0x4c2   : > { %v1225_v35 = vpop.eup %1224  ;;  %v858_v36 = vpop.f32.mrf.mxu2 }
 0x4c3   : > { %v453_v37 = vmul.f32 %v1225_v35, %v1455_v39  ;;  %v862_v38 = vmul.f32 %v1223_v34, %v858_v36 }
 0x4c5   : > { %864 = vrot.lane.b32.xlu1 %v862_v38, %s1262_s12  ;;  %454 = vst.msk [vmem:[%s233_s11] sm:$0xff] %vm254_vm0, %v453_v37 }
 0x512   : > { %v1041_v27 = vpop.xlane.xlu2 %1040 }
 0x513   : > { %1226 = vrcp.f32 %v1041_v27 }
 0x519   : > { %v1227_v41 = vpop.eup %1226 }
 0x51a   : > { %v658_v40 = vpop.permute.xlu2 %657 }
 0x51b   : > { %661 = vst.msk [vmem:[%s233_s11] sm:$0xff] %vm660_vm3, %v658_v40 }
 0x521   : > { %v1065_v42 = vpop.f32.mrf.mxu3 }
 0x522   : > { %v1069_v43 = vmul.f32 %v1227_v41, %v1065_v42 }
 0x524   : > { %1071 = vrot.lane.b32.xlu0 %v1069_v43, %s1263_s19 }
 0x537   : > { %v865_v44 = vpop.permute.xlu1 %864 }
 0x538   : > { %868 = vst.msk [vmem:[%s233_s11] sm:$0xff] %vm867_vm5, %v865_v44 }
 0x596   : > { %v1072_v39 = vpop.permute.xlu0 %1071 }
 0x597   : > { %1075 = vst.msk [vmem:[%s233_s11] sm:$0xff] %vm1074_vm6, %v1072_v39 }
 0x598 PF: > { %s15_s18 = sadd.s32 1, %s1234_s18  }
 0x599   : > { %p12_p4 = scmp.ge.s32.totalorder %s15_s18, 4  }
 0x59b   :  { %14 = sbr.rel (!%p12_p4) target bundleno = 1 (0x1), region = 73 }

// kernel: transformer_xl_decoder.27
= control target key start
LH: loop header
LB: loop body
LE: loop exit
PB: predicated region body
PF: predicated region fallthrough
CT: control target
= control target key end

     0   :  { %s659_s9 = smov 0   ;;  %s730_s0 = inlined_call_operand.vmem [shape: f32[2,8,32], index: 0, kind: input, shape index: {}]   ;;  %s731_s1 = inlined_call_operand.vmem [shape: f32[2,12,64], index: 1, kind: input, shape index: {}]   ;;  %s732_s2 = inlined_call_operand.vmem [shape: f32[2,8,32], index: 2, kind: output, shape index: {}]  }
   0x1 LB: > { %s560_s10 = sadd.s32 4294967295, %s632_s9   ;;  %p564_p0 = scmp.ge.s32.totalorder %s632_s9, 1  ;;  %s632_s9 = sphi %s659_s9, %s12_s9  }
   0x2   : > { %p121_p1 = scmp.lt.s32.totalorder %s632_s9, 3 }
   0x4   : > { %p122_p2 = pnand %p564_p0, %p121_p1 }
   0x5   : > { %p146_p3 = scmp.lt.s32.totalorder (!%p122_p2), %s560_s10, 1  ;;  %s634_s19 = smov (!%p122_p2), 120  }
   0x6   : > { %125 = sbr.rel (%p122_p2) target bundleno = 788 (0x314), region = 28  ;;  %s635_s20 = smov (!%p122_p2), 96  }
   0x7   : > { %s636_s21 = smov (!%p122_p2), 104   ;;  %s637_s22 = smov (!%p122_p2), 88  }
   0x8   : > { %s638_s23 = smov (!%p122_p2), 112   ;;  %s639_s24 = smov (!%p122_p2), 80  }
   0x9   : > { %s640_s25 = smov (!%p122_p2), 72   ;;  %s641_s26 = smov (!%p122_p2), 8  }
   0xa   : > { %s642_s30 = smov (!%p122_p2), 16   ;;  %s643_s3 = smov (!%p122_p2), 24  }
   0xb   : > { %s734_s10 = smov (!%p146_p3, %s560_s10), 1  ;;  %vm163_vm0 = vcmask 64512   ;;  %vm211_vm1 = vcmask 1043456   ;;  %vm193_vm2 = vcmask 97280   ;;  %vm321_vm3 = vcmask 130112  }
   0xc   : > { %s591_s11 = sshll.u32 %s734_s10, 4  ;;  %s565_s12 = sshll.u32 %s734_s10, 3  ;;  %vm407_vm4 = vcmask 195712   ;;  %vm493_vm5 = vcmask 261312  }
   0xd   : > { %s154_s15 = scalar_lea.vmem %s731_s1, %s591_s11  ;;  %s149_s18 = scalar_lea.vmem %s730_s0, %s565_s12 }
   0xe   : > { %v162_v0 = vld [vmem:[%s154_s15 + $0x8] sm:$0xf]  ;;  %v679_v1 = vld [vmem:[%s154_s15] sm:$0xff]  ;;  %s158_s29 = scalar_lea.vmem %s732_s2, %s565_s12 }
   0xf   : > { %v240_v2 = vld [vmem:[%s154_s15 + $0x8] sm:$0xf]  ;;  %569 = vmatpush.xpose.msk.msra.mxu0 %vm163_vm0, %v162_v0  ;;  %246 = vrot.lane.b32.xlu1 %v679_v1, %s634_s19  ;;  %v159_v3 = vld [vmem:[%s149_s18] sm:$0xff] }
  0x10   : > { %248 = vrot.lane.b32.xlu0 %v240_v2, %s634_s19  ;;  %205 = vrot.lane.b32.xlu2 %v162_v0, %s635_s20  ;;  %v160_v4 = vmul.f32 0.35355338, %v159_v3  ;;  %v687_v5 = vld [vmem:[%s154_s15 + $0x8] sm:$0xf] }
  0x11   : > { %v326_v8 = vld [vmem:[%s154_s15 + $0x8] sm:$0xf] }
  0x13   : > { %570 = vmatpush.xpose.msk.msra.mxu0 %vm163_vm0, %v679_v1 }
  0x16   : > { %571 = vmatmul.msk.f32.vlgmr.msra.gmra.mxu0 %vm163_vm0, %v160_v4 }
  0x17   : > { %242 = vrot.lane.b32.xlu1 %v160_v4, %s634_s19 }
  0x18   : > { %203 = vrot.lane.b32.xlu2 %v679_v1, %s635_s20 }
  0x1f   : > { %334 = vrot.lane.b32.xlu1 %v326_v8, %s638_s23 }
  0x20   : > { %420 = vrot.lane.b32.xlu2 %v687_v5, %s636_s21 }
  0x27   : > { %332 = vrot.lane.b32.xlu1 %v679_v1, %s638_s23 }
  0x28   : > { %418 = vrot.lane.b32.xlu2 %v679_v1, %s636_s21 }
  0x2f   : > { %328 = vrot.lane.b32.xlu1 %v160_v4, %s638_s23 }
  0x30   : > { %414 = vrot.lane.b32.xlu2 %v160_v4, %s636_s21 }
  0x37   : > { %373 = vrot.lane.b32.xlu1 %v326_v8, %s639_s24 }
  0x38   : > { %285 = vrot.lane.b32.xlu2 %v679_v1, %s637_s22 }
  0x6a   : > { %v206_v6 = vpop.permute.xlu2 %205 }
  0x6b   : > { %572 = vmatpush.msk.msra.mxu1 %vm211_vm1, %v206_v6 }
  0x72   : > { %v204_v7 = vpop.permute.xlu2 %203 }
  0x73   : > { %229 = vmatpush.msra.mxu1 %v204_v7 }
  0x7a   : > { %v421_v9 = vpop.permute.xlu2 %420 }
  0x7b   : > { %584 = vmatpush.xpose.msk.msrb.mxu0 %vm163_vm0, %v421_v9 }
  0x81   : > { %v247_v10 = vpop.permute.xlu1 %246 }
  0x82   : > { %v249_v11 = vpop.permute.xlu0 %248  ;;  %v419_v12 = vpop.permute.xlu2 %418 }
  0x83   : > { %574 = vmatpush.xpose.msk.msra.mxu2 %vm163_vm0, %v249_v11  ;;  %585 = vmatpush.xpose.msk.msrb.mxu0 %vm163_vm0, %v419_v12 }
  0x87   : > { %575 = vmatpush.xpose.msk.msra.mxu2 %vm163_vm0, %v247_v10 }
  0x89   : > { %v243_v13 = vpop.permute.xlu1 %242 }
  0x8a   : > { %576 = vmatmul.msk.f32.vlgmr.msra.gmra.mxu2 %vm163_vm0, %v243_v13  ;;  %v415_v14 = vpop.permute.xlu2 %414 }
  0x8b   : > { %586 = vmatmul.msk.f32.vlgmr.msrb.gmra.mxu0 %vm163_vm0, %v415_v14 }
  0x91   : > { %v335_v17 = vpop.permute.xlu1 %334 }
  0x92   : > { %579 = vmatpush.xpose.msk.msrb.mxu1 %vm163_vm0, %v335_v17  ;;  %v286_v29 = vpop.permute.xlu2 %285 }
  0x93   : > { %v190_v15 = vpop.f32.mrf.mxu0 }
  0x94   : > { %v194_v16 = vsel %vm193_vm2, %v190_v15, -inf }
  0x95   : > { %195 = vmax.xlane.f32.xlu0 %v194_v16 }
  0x99   : > { %v333_v18 = vpop.permute.xlu1 %332 }
  0x9a   : > { %580 = vmatpush.xpose.msk.msrb.mxu1 %vm163_vm0, %v333_v18 }
  0xa1   : > { %v329_v27 = vpop.permute.xlu1 %328 }
  0xa9   : > { %287 = vrot.lane.b32.xlu0 %v240_v2, %s637_s22  ;;  %v374_v30 = vpop.permute.xlu1 %373 }
 0x108   : > { %v196_v19 = vpop.xlane.xlu0 %195  ;;  %v445_v20 = vpop.f32.mrf.mxu0 }
 0x109   : > { %v197_v21 = vsub.f32 %v190_v15, %v196_v19  ;;  %v448_v22 = vsel %vm193_vm2, %v445_v20, -inf }
 0x10a   : > { %449 = vmax.xlane.f32.xlu0 %v448_v22 }
 0x10b   : > { %v198_v23 = vmul.f32 1.442695, %v197_v21 }
 0x10d   : > { %610 = vpow2.f32 %v198_v23  ;;  %v273_v24 = vpop.f32.mrf.mxu2 }
 0x10e   : > { %v276_v25 = vsel %vm193_vm2, %v273_v24, -inf }
 0x10f   : > { %277 = vmax.xlane.f32.xlu1 %v276_v25 }
 0x113   : > { %v611_v26 = vpop.eup %610 }
 0x114   : > { %573 = vmatmul.msk.f32.vlgmr.msra.gmra.mxu1 %vm193_vm2, %v611_v26  ;;  %v200_v44 = vsel %vm193_vm2, %v611_v26, 0.0 }
 0x11b   : > { %v288_v28 = vpop.permute.xlu0 %287 }
 0x11c   : > { %581 = vmatmul.msk.f32.vlgmr.msrb.gmra.mxu1 %vm163_vm0, %v329_v27  ;;  %577 = vmatpush.msk.msra.mxu3 %vm211_vm1, %v288_v28 }
 0x11e   : > { %457 = vrot.lane.b32.xlu0 %v679_v1, %s640_s25  ;;  %310 = vmatpush.msra.mxu3 %v286_v29 }
 0x120   : > { %582 = vmatpush.msk.msrb.mxu3 %vm211_vm1, %v374_v30 }
 0x128   : > { %371 = vrot.lane.b32.xlu1 %v679_v1, %s639_s24 }
 0x17d   : > { %v450_v31 = vpop.xlane.xlu0 %449 }
 0x17e   : > { %v451_v32 = vsub.f32 %v445_v20, %v450_v31 }
 0x180   : > { %v452_v33 = vmul.f32 1.442695, %v451_v32 }
 0x182   : > { %v278_v34 = vpop.xlane.xlu1 %277  ;;  %612 = vpow2.f32 %v452_v33 }
 0x183   : > { %v279_v35 = vsub.f32 %v273_v24, %v278_v34 }
 0x185   : > { %v280_v36 = vmul.f32 1.442695, %v279_v35 }
 0x187   : > { %614 = vpow2.f32 %v280_v36 }
 0x188   : > { %v613_v37 = vpop.eup %612 }
 0x189   : > { %v454_v38 = vsel %vm193_vm2, %v613_v37, 0.0 }
 0x18a   : > { %455 = vadd.xlane.f32.xlu0 %v454_v38 }
 0x18d   : > { %v615_v39 = vpop.eup %614 }
 0x18e   : > { %578 = vmatmul.msk.f32.vlgmr.msra.gmra.mxu3 %vm193_vm2, %v615_v39  ;;  %v282_v43 = vsel %vm193_vm2, %v615_v39, 0.0 }
 0x190   : > { %v458_v50 = vpop.permute.xlu0 %457 }
 0x191   : > { %v231_v40 = vpop.f32.mrf.mxu1 }
 0x199   : > { %v359_v41 = vpop.f32.mrf.mxu1 }
 0x19a   : > { %v362_v42 = vsel %vm193_vm2, %v359_v41, -inf  ;;  %v372_v45 = vpop.permute.xlu1 %371 }
 0x19b   : > { %363 = vmax.xlane.f32.xlu2 %v362_v42  ;;  %396 = vmatpush.msrb.mxu3 %v372_v45 }
 0x1b3   : > { %459 = vrot.lane.b32.xlu2 %v687_v5, %s640_s25 }
 0x1dc   : > { %283 = vadd.xlane.f32.xlu2 %v282_v43 }
 0x1e4   : > { %201 = vadd.xlane.f32.xlu2 %v200_v44 }
 0x1fd   : > { %v456_v60 = vpop.xlane.xlu0 %455 }
 0x20e   : > { %v364_v46 = vpop.xlane.xlu2 %363 }
 0x20f   : > { %v365_v47 = vsub.f32 %v359_v41, %v364_v46 }
 0x211   : > { %v366_v48 = vmul.f32 1.442695, %v365_v47  ;;  %v312_v55 = vpop.f32.mrf.mxu3 }
 0x213   : > { %616 = vpow2.f32 %v366_v48 }
 0x216   : > { %v460_v49 = vpop.permute.xlu2 %459 }
 0x217   : > { %587 = vmatpush.msk.msrb.mxu2 %vm211_vm1, %v460_v49 }
 0x219   : > { %v617_v51 = vpop.eup %616  ;;  %482 = vmatpush.msrb.mxu2 %v458_v50 }
 0x21a   : > { %583 = vmatmul.msk.f32.vlgmr.msrb.gmra.mxu3 %vm193_vm2, %v617_v51  ;;  %588 = vmatmul.msk.f32.vlgmr.msrb.gmra.mxu2 %vm193_vm2, %v613_v37  ;;  %v368_v52 = vsel %vm193_vm2, %v617_v51, 0.0 }
 0x21b   : > { %369 = vadd.xlane.f32.xlu1 %v368_v52 }
 0x24f   : > { %v284_v53 = vpop.xlane.xlu2 %283 }
 0x250   : > { %618 = vrcp.f32 %v284_v53 }
 0x256   : > { %v619_v54 = vpop.eup %618 }
 0x257   : > { %v202_v56 = vpop.xlane.xlu2 %201  ;;  %v316_v57 = vmul.f32 %v619_v54, %v312_v55 }
 0x258   : > { %620 = vrcp.f32 %v202_v56 }
 0x259   : > { %318 = vrot.lane.b32.xlu1 %v316_v57, %s641_s26  ;;  %622 = vrcp.f32 %v456_v60 }
 0x25e   : > { %v621_v58 = vpop.eup %620 }
 0x25f   : > { %v235_v59 = vmul.f32 %v621_v58, %v231_v40  ;;  %v623_v62 = vpop.eup %622 }
 0x261   : > { %236 = vst.msk [vmem:[%s158_s29] sm:$0xff] %vm163_vm0, %v235_v59 }
 0x28e   : > { %v370_v61 = vpop.xlane.xlu1 %369 }
 0x28f   : > { %624 = vrcp.f32 %v370_v61 }
 0x295   : > { %v625_v63 = vpop.eup %624 }
 0x29d   : > { %v398_v0 = vpop.f32.mrf.mxu3  ;;  %v484_v1 = vpop.f32.mrf.mxu2 }
 0x29e   : > { %v402_v2 = vmul.f32 %v625_v63, %v398_v0  ;;  %v488_v3 = vmul.f32 %v623_v62, %v484_v1 }
 0x2a0   : > { %404 = vrot.lane.b32.xlu2 %v402_v2, %s642_s30  ;;  %490 = vrot.lane.b32.xlu0 %v488_v3, %s643_s3 }
 0x2cb   : > { %v319_v4 = vpop.permute.xlu1 %318 }
 0x2cc   : > { %322 = vst.msk [vmem:[%s158_s29] sm:$0xff] %vm321_vm3, %v319_v4 }
 0x2fa   : > { %v405_v5 = vpop.permute.xlu2 %404 }
 0x2fb   : > { %408 = vst.msk [vmem:[%s158_s29] sm:$0xff] %vm407_vm4, %v405_v5 }
 0x312   : > { %v491_v6 = vpop.permute.xlu0 %490 }
 0x313   : > { %494 = vst.msk [vmem:[%s158_s29] sm:$0xff] %vm493_vm5, %v491_v6 }
 0x314 PF: > { %s12_s9 = sadd.s32 1, %s632_s9  }
 0x315   : > { %p9_p4 = scmp.ge.s32.totalorder %s12_s9, 4  }
 0x317   :  { %11 = sbr.rel (!%p9_p4) target bundleno = 1 (0x1), region = 61 }

// kernel: transformer_xl_decoder.28
= control target key start
LH: loop header
LB: loop body
LE: loop exit
PB: predicated region body
PF: predicated region fallthrough
CT: control target
= control target key end

     0   :  { %vm27_vm0 = vcmask 261120   ;;  %v173_v2 = vmov 0.0   ;;  %v174_v24 = vmov 32.0   ;;  %s261_s1 = inlined_call_operand.vmem [shape: f32[32,32], index: 1, kind: input, shape index: {}]   ;;  %s262_s0 = inlined_call_operand.vmem [shape: f32[16,32], index: 0, kind: input, shape index: {}]   ;;  %s263_s5 = inlined_call_operand.vmem [shape: f32[1,32], index: 5, kind: input, shape index: {}]   ;;  %s264_s2 = inlined_call_operand.vmem [shape: f32[16,32], index: 2, kind: input, shape index: {}]   ;;  %s265_s3 = inlined_call_operand.vmem [shape: f32[1,32], index: 3, kind: input, shape index: {}]   ;;  %s266_s4 = inlined_call_operand.vmem [shape: f32[1,32], index: 4, kind: input, shape index: {}]   ;;  %s267_s6 = inlined_call_operand.vmem [shape: f32[16,32], index: 6, kind: output, shape index: {}]  }
   0x1   :  { %v37_v0 = vld [vmem:[%s261_s1 + $0x18] sm:$0xff]  ;;  %v36_v1 = vld [vmem:[%s261_s1 + $0x10] sm:$0xff]  ;;  %28 = vst.msk [vmem:[#allocation2] sm:$0xff] %vm27_vm0, %v173_v2  ;;  %v35_v3 = vld [vmem:[%s261_s1 + $0x8] sm:$0xff]  ;;  %167 = vrcp.f32 %v174_v24 }
   0x2   :  { %57 = vmatpush.msra.mxu0 %v37_v0  ;;  %158 = vmatpush.msra.mxu1 %v37_v0  ;;  %29 = vst.msk [vmem:[#allocation2 + $0x8] sm:$0xff] %vm27_vm0, %v173_v2  ;;  %v34_v4 = vld [vmem:[%s261_s1] sm:$0xff]  ;;  %v33_v6 = vld [vmem:[%s262_s0 + $0x8] sm:$0xff] }
   0x3   :  { %v32_v5 = vld [vmem:[%s262_s0] sm:$0xff]  ;;  %v84_v20 = vld [vmem:[%s264_s2 + $0x8] sm:$0xff] }
   0x4   :  { %58 = vmatpush.msra.mxu0 %v36_v1  ;;  %159 = vmatpush.msra.mxu1 %v36_v1  ;;  %v164_v13 = vld [vmem:[%s263_s5] ss:$0 sm:$0xff] }
   0x5   :  { %v83_v15 = vld [vmem:[%s264_s2] sm:$0xff] }
   0x6   :  { %59 = vmatpush.msra.mxu0 %v35_v3  ;;  %160 = vmatpush.msra.mxu1 %v35_v3  ;;  %v165_v55 = vld [vmem:[%s265_s3] ss:$0 sm:$0xff] }
   0x7   :  { %v168_v25 = vpop.eup %167  ;;  %v166_v58 = vld [vmem:[%s266_s4] ss:$0 sm:$0xff] }
   0x8   :  { %60 = vmatpush.msra.mxu0 %v34_v4  ;;  %161 = vmatpush.msra.mxu1 %v34_v4  ;;  %v30_v7 = vld [vmem:[#allocation2] sm:$0xff]  ;;  %v94_v26 = vmul.f32 32.0, %v168_v25  ;;  %vm98_vm1 = vweird.f32 %v168_v25 }
   0x9   :  { %156 = vmatmul.msk.f32.vlgmr.msra.gmra.mxu0 %vm27_vm0, %v32_v5  ;;  %157 = vmatmul.msk.f32.vlgmr.msra.gmra.mxu1 %vm27_vm0, %v33_v6  ;;  %v31_v8 = vld [vmem:[#allocation2 + $0x8] sm:$0xff] }
   0xa   :  { %v95_v27 = vsub.f32 1.0, %v94_v26 }
   0xc   :  { %v96_v28 = vmul.f32 %v168_v25, %v95_v27 }
   0xe   :  { %v97_v29 = vadd.f32 %v168_v25, %v96_v28 }
  0x10   :  { %v99_v30 = vsel %vm98_vm1, %v168_v25, %v97_v29 }
  0x86   :  { %v62_v9 = vpop.f32.mrf.mxu0  ;;  %v65_v10 = vpop.f32.mrf.mxu1 }
  0x87   :  { %v68_v11 = vadd.f32 %v62_v9, %v30_v7  ;;  %v69_v12 = vadd.f32 %v65_v10, %v31_v8 }
  0x89   :  { %70 = vst.msk [vmem:[#allocation2] sm:$0xff] %vm27_vm0, %v68_v11 }
  0x8a   :  { %71 = vst.msk [vmem:[#allocation2 + $0x8] sm:$0xff] %vm27_vm0, %v69_v12 }
  0x90   :  { %v75_v14 = vld [vmem:[#allocation2] sm:$0xff] }
  0x91   :  { %v81_v16 = vadd.f32 %v164_v13, %v75_v14  ;;  %v76_v17 = vld [vmem:[#allocation2 + $0x8] sm:$0xff] }
  0x92   :  { %v82_v19 = vadd.f32 %v164_v13, %v76_v17 }
  0x93   :  { %v85_v18 = vadd.f32 %v83_v15, %v81_v16 }
  0x94   :  { %v86_v22 = vadd.f32 %v84_v20, %v82_v19 }
  0x95   :  { %v87_v21 = vsel %vm27_vm0, %v85_v18, 0.0 }
  0x96   :  { %88 = vadd.xlane.f32.xlu0 %v87_v21  ;;  %v90_v23 = vsel %vm27_vm0, %v86_v22, 0.0 }
  0x9e   :  { %91 = vadd.xlane.f32.xlu0 %v90_v23 }
 0x109   :  { %v89_v31 = vpop.xlane.xlu0 %88 }
 0x10a   :  { %v100_v32 = vmul.f32 %v99_v30, %v89_v31 }
 0x10c   :  { %v102_v33 = vsub.f32 %v85_v18, %v100_v32 }
 0x10e   :  { %v104_v34 = vmul.f32 %v102_v33, %v102_v33 }
 0x110   :  { %v106_v35 = vsel %vm27_vm0, %v104_v34, 0.0 }
 0x111   :  { %107 = vadd.xlane.f32.xlu1 %v106_v35  ;;  %v92_v36 = vpop.xlane.xlu0 %91 }
 0x112   :  { %v101_v37 = vmul.f32 %v99_v30, %v92_v36 }
 0x114   :  { %v103_v38 = vsub.f32 %v86_v22, %v101_v37 }
 0x116   :  { %v105_v39 = vmul.f32 %v103_v38, %v103_v38 }
 0x118   :  { %v109_v40 = vsel %vm27_vm0, %v105_v39, 0.0 }
 0x119   :  { %110 = vadd.xlane.f32.xlu1 %v109_v40 }
 0x184   :  { %v108_v41 = vpop.xlane.xlu1 %107 }
 0x185   :  { %v112_v42 = vmul.f32 %v108_v41, %v99_v30 }
 0x187   :  { %v114_v43 = vadd.f32 1e-05, %v112_v42 }
 0x189   :  { %169 = vrsqrt.f32 %v114_v43  ;;  %vm122_vm3 = vweird.f32 %v114_v43 }
 0x18c   :  { %v111_v44 = vpop.xlane.xlu1 %110 }
 0x18d   :  { %v113_v45 = vmul.f32 %v111_v44, %v99_v30 }
 0x18f   :  { %v170_v46 = vpop.eup %169  ;;  %v115_v47 = vadd.f32 1e-05, %v113_v45 }
 0x190   :  { %v117_v48 = vmul.f32 %v170_v46, %v114_v43  ;;  %vm123_vm2 = vweird.f32 %v170_v46 }
 0x191   :  { %171 = vrsqrt.f32 %v115_v47  ;;  %vm124_vm4 = vmor %vm122_vm3, %vm123_vm2  ;;  %vm132_vm6 = vweird.f32 %v115_v47 }
 0x192   :  { %v118_v49 = vmul.f32 %v170_v46, %v117_v48 }
 0x194   :  { %v119_v50 = vmul.f32 0.5, %v118_v49 }
 0x196   :  { %v120_v51 = vsub.f32 1.5, %v119_v50 }
 0x197   :  { %v172_v52 = vpop.eup %171 }
 0x198   :  { %v121_v53 = vmul.f32 %v170_v46, %v120_v51  ;;  %v127_v54 = vmul.f32 %v172_v52, %v115_v47  ;;  %vm133_vm5 = vweird.f32 %v172_v52 }
 0x199   :  { %vm134_vm7 = vmor %vm132_vm6, %vm133_vm5 }
 0x19a   :  { %v125_v56 = vsel %vm124_vm4, %v170_v46, %v121_v53  ;;  %v128_v57 = vmul.f32 %v172_v52, %v127_v54 }
 0x19b   :  { %v136_v59 = vmul.f32 %v125_v56, %v102_v33 }
 0x19c   :  { %v129_v60 = vmul.f32 0.5, %v128_v57 }
 0x19d   :  { %v142_v61 = vmul.f32 %v165_v55, %v136_v59 }
 0x19e   :  { %v130_v62 = vsub.f32 1.5, %v129_v60 }
 0x19f   :  { %v148_v63 = vadd.f32 %v166_v58, %v142_v61 }
 0x1a0   :  { %v131_v0 = vmul.f32 %v172_v52, %v130_v62 }
 0x1a1   :  { %150 = vst.msk [vmem:[%s267_s6] sm:$0xff] %vm27_vm0, %v148_v63 }
 0x1a2   :  { %v135_v1 = vsel %vm134_vm7, %v172_v52, %v131_v0 }
 0x1a3   :  { %v137_v2 = vmul.f32 %v135_v1, %v103_v38 }
 0x1a5   :  { %v143_v3 = vmul.f32 %v165_v55, %v137_v2 }
 0x1a7   :  { %v149_v4 = vadd.f32 %v166_v58, %v143_v3 }
 0x1a9   :  { %151 = vst.msk [vmem:[%s267_s6 + $0x8] sm:$0xff] %vm27_vm0, %v149_v4 }

// kernel: transformer_xl_decoder.29
= control target key start
LH: loop header
LB: loop body
LE: loop exit
PB: predicated region body
PF: predicated region fallthrough
CT: control target
= control target key end

     0   :  { %vm18_vm0 = vcmask 523264   ;;  %v91_v2 = vmov 0.0   ;;  %vm29_vm1 = vcmask 261120   ;;  %s145_s1 = inlined_call_operand.vmem [shape: f32[32,64], index: 1, kind: input, shape index: {}]   ;;  %s146_s2 = inlined_call_operand.vmem [shape: f32[1,64], index: 2, kind: input, shape index: {}]   ;;  %s147_s0 = inlined_call_operand.vmem [shape: f32[16,32], index: 0, kind: input, shape index: {}]   ;;  %s148_s3 = inlined_call_operand.vmem [shape: f32[16,64], index: 3, kind: output, shape index: {}]  }
   0x1   :  { %v28_v0 = vld [vmem:[%s145_s1 + $0x18] sm:$0xff]  ;;  %v27_v1 = vld [vmem:[%s145_s1 + $0x10] sm:$0xff]  ;;  %19 = vst.msk [vmem:[#allocation2] sm:$0xff] %vm18_vm0, %v91_v2  ;;  %v26_v3 = vld [vmem:[%s145_s1 + $0x8] sm:$0xff] }
   0x2   :  { %48 = vmatpush.msra.mxu0 %v28_v0  ;;  %85 = vmatpush.msra.mxu1 %v28_v0  ;;  %20 = vst.msk [vmem:[#allocation2 + $0x8] sm:$0xff] %vm18_vm0, %v91_v2  ;;  %v25_v4 = vld [vmem:[%s145_s1] sm:$0xff]  ;;  %v24_v6 = vld [vmem:[%s147_s0 + $0x8] sm:$0xff] }
   0x3   :  { %v23_v5 = vld [vmem:[%s147_s0] sm:$0xff] }
   0x4   :  { %49 = vmatpush.msra.mxu0 %v27_v1  ;;  %86 = vmatpush.msra.mxu1 %v27_v1  ;;  %v90_v13 = vld [vmem:[%s146_s2] ss:$0 sm:$0xff] }
   0x6   :  { %50 = vmatpush.msra.mxu0 %v26_v3  ;;  %87 = vmatpush.msra.mxu1 %v26_v3 }
   0x8   :  { %51 = vmatpush.msra.mxu0 %v25_v4  ;;  %88 = vmatpush.msra.mxu1 %v25_v4  ;;  %v21_v7 = vld [vmem:[#allocation2] sm:$0xff] }
   0x9   :  { %83 = vmatmul.msk.f32.vlgmr.msra.gmra.mxu0 %vm29_vm1, %v23_v5  ;;  %84 = vmatmul.msk.f32.vlgmr.msra.gmra.mxu1 %vm29_vm1, %v24_v6  ;;  %v22_v8 = vld [vmem:[#allocation2 + $0x8] sm:$0xff] }
  0x86   :  { %v53_v9 = vpop.f32.mrf.mxu0  ;;  %v56_v10 = vpop.f32.mrf.mxu1 }
  0x87   :  { %v59_v11 = vadd.f32 %v53_v9, %v21_v7  ;;  %v60_v12 = vadd.f32 %v56_v10, %v22_v8 }
  0x89   :  { %62 = vst.msk [vmem:[#allocation2] sm:$0xff] %vm18_vm0, %v59_v11 }
  0x8a   :  { %63 = vst.msk [vmem:[#allocation2 + $0x8] sm:$0xff] %vm18_vm0, %v60_v12 }
  0x90   :  { %v67_v14 = vld [vmem:[#allocation2] sm:$0xff] }
  0x91   :  { %v73_v15 = vadd.f32 %v90_v13, %v67_v14  ;;  %v68_v16 = vld [vmem:[#allocation2 + $0x8] sm:$0xff] }
  0x92   :  { %v74_v17 = vadd.f32 %v90_v13, %v68_v16 }
  0x93   :  { %v75_v18 = vmax.f32 %v73_v15, 0.0 }
  0x94   :  { %v76_v19 = vmax.f32 %v74_v17, 0.0 }
  0x95   :  { %77 = vst.msk [vmem:[%s148_s3] sm:$0xff] %vm18_vm0, %v75_v18 }
  0x96   :  { %78 = vst.msk [vmem:[%s148_s3 + $0x8] sm:$0xff] %vm18_vm0, %v76_v19 }

// kernel: transformer_xl_decoder.31
= control target key start
LH: loop header
LB: loop body
LE: loop exit
PB: predicated region body
PF: predicated region fallthrough
CT: control target
= control target key end

     0   :  { %vm15_vm0 = vcmask 785408   ;;  %v79_v2 = vmov 0.0   ;;  %vm26_vm1 = vcmask 261120   ;;  %s125_s1 = inlined_call_operand.vmem [shape: f32[32,96], index: 1, kind: input, shape index: {}]   ;;  %s126_s0 = inlined_call_operand.vmem [shape: f32[16,32], index: 0, kind: input, shape index: {}]   ;;  %s127_s2 = inlined_call_operand.vmem [shape: f32[16,96], index: 2, kind: output, shape index: {}]  }
   0x1   :  { %v25_v0 = vld [vmem:[%s125_s1 + $0x18] sm:$0xff]  ;;  %v24_v1 = vld [vmem:[%s125_s1 + $0x10] sm:$0xff]  ;;  %16 = vst.msk [vmem:[#allocation2] sm:$0xff] %vm15_vm0, %v79_v2  ;;  %v23_v3 = vld [vmem:[%s125_s1 + $0x8] sm:$0xff] }
   0x2   :  { %45 = vmatpush.msra.mxu0 %v25_v0  ;;  %74 = vmatpush.msra.mxu1 %v25_v0  ;;  %17 = vst.msk [vmem:[#allocation2 + $0x8] sm:$0xff] %vm15_vm0, %v79_v2  ;;  %v22_v4 = vld [vmem:[%s125_s1] sm:$0xff]  ;;  %v21_v6 = vld [vmem:[%s126_s0 + $0x8] sm:$0xff] }
   0x3   :  { %v20_v5 = vld [vmem:[%s126_s0] sm:$0xff] }
   0x4   :  { %46 = vmatpush.msra.mxu0 %v24_v1  ;;  %75 = vmatpush.msra.mxu1 %v24_v1 }
   0x6   :  { %47 = vmatpush.msra.mxu0 %v23_v3  ;;  %76 = vmatpush.msra.mxu1 %v23_v3 }
   0x8   :  { %48 = vmatpush.msra.mxu0 %v22_v4  ;;  %77 = vmatpush.msra.mxu1 %v22_v4  ;;  %v18_v7 = vld [vmem:[#allocation2] sm:$0xff] }
   0x9   :  { %72 = vmatmul.msk.f32.vlgmr.msra.gmra.mxu0 %vm26_vm1, %v20_v5  ;;  %73 = vmatmul.msk.f32.vlgmr.msra.gmra.mxu1 %vm26_vm1, %v21_v6  ;;  %v19_v8 = vld [vmem:[#allocation2 + $0x8] sm:$0xff] }
  0x86   :  { %v50_v9 = vpop.f32.mrf.mxu0  ;;  %v53_v10 = vpop.f32.mrf.mxu1 }
  0x87   :  { %v56_v11 = vadd.f32 %v50_v9, %v18_v7  ;;  %v57_v12 = vadd.f32 %v53_v10, %v19_v8 }
  0x89   :  { %59 = vst.msk [vmem:[#allocation2] sm:$0xff] %vm15_vm0, %v56_v11 }
  0x8a   :  { %60 = vst.msk [vmem:[#allocation2 + $0x8] sm:$0xff] %vm15_vm0, %v57_v12 }
  0x90   :  { %v64_v13 = vld [vmem:[#allocation2] sm:$0xff] }
  0x91   :  { %66 = vst.msk [vmem:[%s127_s2] sm:$0xff] %vm15_vm0, %v64_v13  ;;  %v65_v14 = vld [vmem:[#allocation2 + $0x8] sm:$0xff] }
  0x92   :  { %67 = vst.msk [vmem:[%s127_s2 + $0x8] sm:$0xff] %vm15_vm0, %v65_v14 }

// kernel: transformer_xl_decoder.30
= control target key start
LH: loop header
LB: loop body
LE: loop exit
PB: predicated region body
PF: predicated region fallthrough
CT: control target
= control target key end

     0   :  { %vm27_vm0 = vcmask 261120   ;;  %v182_v2 = vmov 0.0   ;;  %vm42_vm1 = vcmask 523264   ;;  %v183_v28 = vmov 32.0   ;;  %s280_s1 = inlined_call_operand.vmem [shape: f32[64,32], index: 1, kind: input, shape index: {}]   ;;  %s281_s0 = inlined_call_operand.vmem [shape: f32[16,64], index: 0, kind: input, shape index: {}]   ;;  %s282_s5 = inlined_call_operand.vmem [shape: f32[1,32], index: 5, kind: input, shape index: {}]   ;;  %s283_s2 = inlined_call_operand.vmem [shape: f32[16,32], index: 2, kind: input, shape index: {}]   ;;  %s284_s3 = inlined_call_operand.vmem [shape: f32[1,32], index: 3, kind: input, shape index: {}]   ;;  %s285_s4 = inlined_call_operand.vmem [shape: f32[1,32], index: 4, kind: input, shape index: {}]   ;;  %s286_s6 = inlined_call_operand.vmem [shape: f32[16,32], index: 6, kind: output, shape index: {}]  }
   0x1   :  { %v41_v0 = vld [vmem:[%s280_s1 + $0x38] sm:$0xff]  ;;  %v40_v1 = vld [vmem:[%s280_s1 + $0x30] sm:$0xff]  ;;  %28 = vst.msk [vmem:[#allocation2] sm:$0xff] %vm27_vm0, %v182_v2  ;;  %v39_v3 = vld [vmem:[%s280_s1 + $0x28] sm:$0xff]  ;;  %176 = vrcp.f32 %v183_v28 }
   0x2   :  { %57 = vmatpush.msra.mxu0 %v41_v0  ;;  %163 = vmatpush.msra.mxu1 %v41_v0  ;;  %29 = vst.msk [vmem:[#allocation2 + $0x8] sm:$0xff] %vm27_vm0, %v182_v2  ;;  %v38_v4 = vld [vmem:[%s280_s1 + $0x20] sm:$0xff]  ;;  %v37_v5 = vld [vmem:[%s280_s1 + $0x18] sm:$0xff]  ;;  %v36_v6 = vld [vmem:[%s280_s1 + $0x10] sm:$0xff] }
   0x3   :  { %v35_v7 = vld [vmem:[%s280_s1 + $0x8] sm:$0xff]  ;;  %v34_v8 = vld [vmem:[%s280_s1] sm:$0xff] }
   0x4   :  { %58 = vmatpush.msra.mxu0 %v40_v1  ;;  %164 = vmatpush.msra.mxu1 %v40_v1  ;;  %v32_v9 = vld [vmem:[%s281_s0] sm:$0xff]  ;;  %v33_v10 = vld [vmem:[%s281_s0 + $0x8] sm:$0xff] }
   0x5   :  { %v173_v17 = vld [vmem:[%s282_s5] ss:$0 sm:$0xff]  ;;  %v89_v24 = vld [vmem:[%s283_s2 + $0x8] sm:$0xff] }
   0x6   :  { %59 = vmatpush.msra.mxu0 %v39_v3  ;;  %165 = vmatpush.msra.mxu1 %v39_v3  ;;  %v88_v19 = vld [vmem:[%s283_s2] sm:$0xff] }
   0x7   :  { %v177_v29 = vpop.eup %176  ;;  %v174_v59 = vld [vmem:[%s284_s3] ss:$0 sm:$0xff] }
   0x8   :  { %60 = vmatpush.msra.mxu0 %v38_v4  ;;  %166 = vmatpush.msra.mxu1 %v38_v4  ;;  %v30_v11 = vld [vmem:[#allocation2] sm:$0xff]  ;;  %v99_v30 = vmul.f32 32.0, %v177_v29  ;;  %vm103_vm2 = vweird.f32 %v177_v29 }
   0x9   :  { %v31_v12 = vld [vmem:[#allocation2 + $0x8] sm:$0xff]  ;;  %v175_v62 = vld [vmem:[%s285_s4] ss:$0 sm:$0xff] }
   0xa   :  { %61 = vmatpush.msra.mxu0 %v37_v5  ;;  %167 = vmatpush.msra.mxu1 %v37_v5  ;;  %v100_v31 = vsub.f32 1.0, %v99_v30 }
   0xc   :  { %62 = vmatpush.msra.mxu0 %v36_v6  ;;  %168 = vmatpush.msra.mxu1 %v36_v6  ;;  %v101_v32 = vmul.f32 %v177_v29, %v100_v31 }
   0xe   :  { %63 = vmatpush.msra.mxu0 %v35_v7  ;;  %169 = vmatpush.msra.mxu1 %v35_v7  ;;  %v102_v33 = vadd.f32 %v177_v29, %v101_v32 }
  0x10   :  { %64 = vmatpush.msra.mxu0 %v34_v8  ;;  %170 = vmatpush.msra.mxu1 %v34_v8  ;;  %v104_v34 = vsel %vm103_vm2, %v177_v29, %v102_v33 }
  0x11   :  { %161 = vmatmul.msk.f32.vlgmr.msra.gmra.mxu0 %vm42_vm1, %v32_v9  ;;  %162 = vmatmul.msk.f32.vlgmr.msra.gmra.mxu1 %vm42_vm1, %v33_v10 }
  0x8e   :  { %v66_v13 = vpop.f32.mrf.mxu0  ;;  %v69_v14 = vpop.f32.mrf.mxu1 }
  0x8f   :  { %v72_v15 = vadd.f32 %v66_v13, %v30_v11  ;;  %v73_v16 = vadd.f32 %v69_v14, %v31_v12 }
  0x91   :  { %75 = vst.msk [vmem:[#allocation2] sm:$0xff] %vm27_vm0, %v72_v15 }
  0x92   :  { %76 = vst.msk [vmem:[#allocation2 + $0x8] sm:$0xff] %vm27_vm0, %v73_v16 }
  0x98   :  { %v80_v18 = vld [vmem:[#allocation2] sm:$0xff] }
  0x99   :  { %v86_v20 = vadd.f32 %v173_v17, %v80_v18  ;;  %v81_v21 = vld [vmem:[#allocation2 + $0x8] sm:$0xff] }
  0x9a   :  { %v87_v23 = vadd.f32 %v173_v17, %v81_v21 }
  0x9b   :  { %v90_v22 = vadd.f32 %v88_v19, %v86_v20 }
  0x9c   :  { %v91_v26 = vadd.f32 %v89_v24, %v87_v23 }
  0x9d   :  { %v92_v25 = vsel %vm27_vm0, %v90_v22, 0.0 }
  0x9e   :  { %93 = vadd.xlane.f32.xlu0 %v92_v25  ;;  %v95_v27 = vsel %vm27_vm0, %v91_v26, 0.0 }
  0xa6   :  { %96 = vadd.xlane.f32.xlu0 %v95_v27 }
 0x111   :  { %v94_v35 = vpop.xlane.xlu0 %93 }
 0x112   :  { %v105_v36 = vmul.f32 %v104_v34, %v94_v35 }
 0x114   :  { %v107_v37 = vsub.f32 %v90_v22, %v105_v36 }
 0x116   :  { %v109_v38 = vmul.f32 %v107_v37, %v107_v37 }
 0x118   :  { %v111_v39 = vsel %vm27_vm0, %v109_v38, 0.0 }
 0x119   :  { %112 = vadd.xlane.f32.xlu1 %v111_v39  ;;  %v97_v40 = vpop.xlane.xlu0 %96 }
 0x11a   :  { %v106_v41 = vmul.f32 %v104_v34, %v97_v40 }
 0x11c   :  { %v108_v42 = vsub.f32 %v91_v26, %v106_v41 }
 0x11e   :  { %v110_v43 = vmul.f32 %v108_v42, %v108_v42 }
 0x120   :  { %v114_v44 = vsel %vm27_vm0, %v110_v43, 0.0 }
 0x121   :  { %115 = vadd.xlane.f32.xlu1 %v114_v44 }
 0x18c   :  { %v113_v45 = vpop.xlane.xlu1 %112 }
 0x18d   :  { %v117_v46 = vmul.f32 %v113_v45, %v104_v34 }
 0x18f   :  { %v119_v47 = vadd.f32 1e-05, %v117_v46 }
 0x191   :  { %178 = vrsqrt.f32 %v119_v47  ;;  %vm127_vm4 = vweird.f32 %v119_v47 }
 0x194   :  { %v116_v48 = vpop.xlane.xlu1 %115 }
 0x195   :  { %v118_v49 = vmul.f32 %v116_v48, %v104_v34 }
 0x197   :  { %v179_v50 = vpop.eup %178  ;;  %v120_v51 = vadd.f32 1e-05, %v118_v49 }
 0x198   :  { %v122_v52 = vmul.f32 %v179_v50, %v119_v47  ;;  %vm128_vm3 = vweird.f32 %v179_v50 }
 0x199   :  { %180 = vrsqrt.f32 %v120_v51  ;;  %vm129_vm5 = vmor %vm127_vm4, %vm128_vm3  ;;  %vm137_vm7 = vweird.f32 %v120_v51 }
 0x19a   :  { %v123_v53 = vmul.f32 %v179_v50, %v122_v52 }
 0x19c   :  { %v124_v54 = vmul.f32 0.5, %v123_v53 }
 0x19e   :  { %v125_v55 = vsub.f32 1.5, %v124_v54 }
 0x19f   :  { %v181_v56 = vpop.eup %180 }
 0x1a0   :  { %v126_v57 = vmul.f32 %v179_v50, %v125_v55  ;;  %v132_v58 = vmul.f32 %v181_v56, %v120_v51  ;;  %vm138_vm6 = vweird.f32 %v181_v56 }
 0x1a1   :  { %vm139_vm8 = vmor %vm137_vm7, %vm138_vm6 }
 0x1a2   :  { %v130_v60 = vsel %vm129_vm5, %v179_v50, %v126_v57  ;;  %v133_v61 = vmul.f32 %v181_v56, %v132_v58 }
 0x1a3   :  { %v141_v63 = vmul.f32 %v130_v60, %v107_v37 }
 0x1a4   :  { %v134_v0 = vmul.f32 0.5, %v133_v61 }
 0x1a5   :  { %v147_v1 = vmul.f32 %v174_v59, %v141_v63 }
 0x1a6   :  { %v135_v2 = vsub.f32 1.5, %v134_v0 }
 0x1a7   :  { %v153_v3 = vadd.f32 %v175_v62, %v147_v1 }
 0x1a8   :  { %v136_v4 = vmul.f32 %v181_v56, %v135_v2 }
 0x1a9   :  { %155 = vst.msk [vmem:[%s286_s6] sm:$0xff] %vm27_vm0, %v153_v3 }
 0x1aa   :  { %v140_v5 = vsel %vm139_vm8, %v181_v56, %v136_v4 }
 0x1ab   :  { %v142_v6 = vmul.f32 %v140_v5, %v108_v42 }
 0x1ad   :  { %v148_v7 = vmul.f32 %v174_v59, %v142_v6 }
 0x1af   :  { %v154_v8 = vadd.f32 %v175_v62, %v148_v7 }
 0x1b1   :  { %156 = vst.msk [vmem:[%s286_s6 + $0x8] sm:$0xff] %vm27_vm0, %v154_v8 }

// kernel: transformer_xl_decoder.35
= control target key start
LH: loop header
LB: loop body
LE: loop exit
PB: predicated region body
PF: predicated region fallthrough
CT: control target
= control target key end

     0   :  { %vm18_vm0 = vcmask 261120   ;;  %v88_v2 = vmov 0.0   ;;  %s144_s1 = inlined_call_operand.vmem [shape: f32[32,32], index: 1, kind: input, shape index: {}]   ;;  %s145_s2 = inlined_call_operand.vmem [shape: f32[1,32], index: 2, kind: input, shape index: {}]   ;;  %s146_s0 = inlined_call_operand.vmem [shape: f32[16,32], index: 0, kind: input, shape index: {}]   ;;  %s147_s3 = inlined_call_operand.vmem [shape: f32[16,32], index: 3, kind: output, shape index: {}]  }
   0x1   :  { %v28_v0 = vld [vmem:[%s144_s1 + $0x18] sm:$0xff]  ;;  %v27_v1 = vld [vmem:[%s144_s1 + $0x10] sm:$0xff]  ;;  %19 = vst.msk [vmem:[#allocation2] sm:$0xff] %vm18_vm0, %v88_v2  ;;  %v26_v3 = vld [vmem:[%s144_s1 + $0x8] sm:$0xff] }
   0x2   :  { %48 = vmatpush.msra.mxu0 %v28_v0  ;;  %82 = vmatpush.msra.mxu1 %v28_v0  ;;  %20 = vst.msk [vmem:[#allocation2 + $0x8] sm:$0xff] %vm18_vm0, %v88_v2  ;;  %v25_v4 = vld [vmem:[%s144_s1] sm:$0xff]  ;;  %v24_v6 = vld [vmem:[%s146_s0 + $0x8] sm:$0xff] }
   0x3   :  { %v23_v5 = vld [vmem:[%s146_s0] sm:$0xff] }
   0x4   :  { %49 = vmatpush.msra.mxu0 %v27_v1  ;;  %83 = vmatpush.msra.mxu1 %v27_v1  ;;  %v87_v13 = vld [vmem:[%s145_s2] ss:$0 sm:$0xff] }
   0x6   :  { %50 = vmatpush.msra.mxu0 %v26_v3  ;;  %84 = vmatpush.msra.mxu1 %v26_v3 }
   0x8   :  { %51 = vmatpush.msra.mxu0 %v25_v4  ;;  %85 = vmatpush.msra.mxu1 %v25_v4  ;;  %v21_v7 = vld [vmem:[#allocation2] sm:$0xff] }
   0x9   :  { %80 = vmatmul.msk.f32.vlgmr.msra.gmra.mxu0 %vm18_vm0, %v23_v5  ;;  %81 = vmatmul.msk.f32.vlgmr.msra.gmra.mxu1 %vm18_vm0, %v24_v6  ;;  %v22_v8 = vld [vmem:[#allocation2 + $0x8] sm:$0xff] }
  0x86   :  { %v53_v9 = vpop.f32.mrf.mxu0  ;;  %v56_v10 = vpop.f32.mrf.mxu1 }
  0x87   :  { %v59_v11 = vadd.f32 %v53_v9, %v21_v7  ;;  %v60_v12 = vadd.f32 %v56_v10, %v22_v8 }
  0x89   :  { %61 = vst.msk [vmem:[#allocation2] sm:$0xff] %vm18_vm0, %v59_v11 }
  0x8a   :  { %62 = vst.msk [vmem:[#allocation2 + $0x8] sm:$0xff] %vm18_vm0, %v60_v12 }
  0x90   :  { %v66_v14 = vld [vmem:[#allocation2] sm:$0xff] }
  0x91   :  { %v72_v15 = vadd.f32 %v87_v13, %v66_v14  ;;  %v67_v16 = vld [vmem:[#allocation2 + $0x8] sm:$0xff] }
  0x92   :  { %v73_v17 = vadd.f32 %v87_v13, %v67_v16 }
  0x93   :  { %74 = vst.msk [vmem:[%s147_s3] sm:$0xff] %vm18_vm0, %v72_v15 }
  0x94   :  { %75 = vst.msk [vmem:[%s147_s3 + $0x8] sm:$0xff] %vm18_vm0, %v73_v17 }

// kernel: transformer_xl_decoder.34
= control target key start
LH: loop header
LB: loop body
LE: loop exit
PB: predicated region body
PF: predicated region fallthrough
CT: control target
= control target key end

     0   :  { %vm24_vm0 = vcmask 261120   ;;  %v163_v2 = vmov 0.0   ;;  %v164_v21 = vmov 32.0   ;;  %s243_s1 = inlined_call_operand.vmem [shape: f32[32,32], index: 1, kind: input, shape index: {}]   ;;  %s244_s0 = inlined_call_operand.vmem [shape: f32[16,32], index: 0, kind: input, shape index: {}]   ;;  %s245_s2 = inlined_call_operand.vmem [shape: f32[16,32], index: 2, kind: input, shape index: {}]   ;;  %s246_s3 = inlined_call_operand.vmem [shape: f32[1,32], index: 3, kind: input, shape index: {}]   ;;  %s247_s4 = inlined_call_operand.vmem [shape: f32[1,32], index: 4, kind: input, shape index: {}]   ;;  %s248_s5 = inlined_call_operand.vmem [shape: f32[16,32], index: 5, kind: output, shape index: {}]  }
   0x1   :  { %v34_v0 = vld [vmem:[%s243_s1 + $0x18] sm:$0xff]  ;;  %v33_v1 = vld [vmem:[%s243_s1 + $0x10] sm:$0xff]  ;;  %25 = vst.msk [vmem:[#allocation2] sm:$0xff] %vm24_vm0, %v163_v2  ;;  %v32_v3 = vld [vmem:[%s243_s1 + $0x8] sm:$0xff]  ;;  %157 = vrcp.f32 %v164_v21 }
   0x2   :  { %54 = vmatpush.msra.mxu0 %v34_v0  ;;  %149 = vmatpush.msra.mxu1 %v34_v0  ;;  %26 = vst.msk [vmem:[#allocation2 + $0x8] sm:$0xff] %vm24_vm0, %v163_v2  ;;  %v31_v4 = vld [vmem:[%s243_s1] sm:$0xff]  ;;  %v30_v6 = vld [vmem:[%s244_s0 + $0x8] sm:$0xff] }
   0x3   :  { %v29_v5 = vld [vmem:[%s244_s0] sm:$0xff]  ;;  %v75_v17 = vld [vmem:[%s245_s2 + $0x8] sm:$0xff] }
   0x4   :  { %55 = vmatpush.msra.mxu0 %v33_v1  ;;  %150 = vmatpush.msra.mxu1 %v33_v1  ;;  %v74_v13 = vld [vmem:[%s245_s2] sm:$0xff] }
   0x5   :  { %v155_v52 = vld [vmem:[%s246_s3] ss:$0 sm:$0xff] }
   0x6   :  { %56 = vmatpush.msra.mxu0 %v32_v3  ;;  %151 = vmatpush.msra.mxu1 %v32_v3  ;;  %v156_v55 = vld [vmem:[%s247_s4] ss:$0 sm:$0xff] }
   0x7   :  { %v158_v22 = vpop.eup %157 }
   0x8   :  { %57 = vmatpush.msra.mxu0 %v31_v4  ;;  %152 = vmatpush.msra.mxu1 %v31_v4  ;;  %v27_v7 = vld [vmem:[#allocation2] sm:$0xff]  ;;  %v85_v23 = vmul.f32 32.0, %v158_v22  ;;  %vm89_vm1 = vweird.f32 %v158_v22 }
   0x9   :  { %147 = vmatmul.msk.f32.vlgmr.msra.gmra.mxu0 %vm24_vm0, %v29_v5  ;;  %148 = vmatmul.msk.f32.vlgmr.msra.gmra.mxu1 %vm24_vm0, %v30_v6  ;;  %v28_v8 = vld [vmem:[#allocation2 + $0x8] sm:$0xff] }
   0xa   :  { %v86_v24 = vsub.f32 1.0, %v85_v23 }
   0xc   :  { %v87_v25 = vmul.f32 %v158_v22, %v86_v24 }
   0xe   :  { %v88_v26 = vadd.f32 %v158_v22, %v87_v25 }
  0x10   :  { %v90_v27 = vsel %vm89_vm1, %v158_v22, %v88_v26 }
  0x86   :  { %v59_v9 = vpop.f32.mrf.mxu0  ;;  %v62_v10 = vpop.f32.mrf.mxu1 }
  0x87   :  { %v65_v11 = vadd.f32 %v59_v9, %v27_v7  ;;  %v66_v12 = vadd.f32 %v62_v10, %v28_v8 }
  0x89   :  { %67 = vst.msk [vmem:[#allocation2] sm:$0xff] %vm24_vm0, %v65_v11 }
  0x8a   :  { %68 = vst.msk [vmem:[#allocation2 + $0x8] sm:$0xff] %vm24_vm0, %v66_v12 }
  0x90   :  { %v72_v14 = vld [vmem:[#allocation2] sm:$0xff] }
  0x91   :  { %v76_v15 = vadd.f32 %v74_v13, %v72_v14  ;;  %v73_v16 = vld [vmem:[#allocation2 + $0x8] sm:$0xff] }
  0x92   :  { %v77_v19 = vadd.f32 %v75_v17, %v73_v16 }
  0x93   :  { %v78_v18 = vsel %vm24_vm0, %v76_v15, 0.0 }
  0x94   :  { %79 = vadd.xlane.f32.xlu0 %v78_v18  ;;  %v81_v20 = vsel %vm24_vm0, %v77_v19, 0.0 }
  0x9c   :  { %82 = vadd.xlane.f32.xlu0 %v81_v20 }
 0x107   :  { %v80_v28 = vpop.xlane.xlu0 %79 }
 0x108   :  { %v91_v29 = vmul.f32 %v90_v27, %v80_v28 }
 0x10a   :  { %v93_v30 = vsub.f32 %v76_v15, %v91_v29 }
 0x10c   :  { %v95_v31 = vmul.f32 %v93_v30, %v93_v30 }
 0x10e   :  { %v97_v32 = vsel %vm24_vm0, %v95_v31, 0.0 }
 0x10f   :  { %98 = vadd.xlane.f32.xlu1 %v97_v32  ;;  %v83_v33 = vpop.xlane.xlu0 %82 }
 0x110   :  { %v92_v34 = vmul.f32 %v90_v27, %v83_v33 }
 0x112   :  { %v94_v35 = vsub.f32 %v77_v19, %v92_v34 }
 0x114   :  { %v96_v36 = vmul.f32 %v94_v35, %v94_v35 }
 0x116   :  { %v100_v37 = vsel %vm24_vm0, %v96_v36, 0.0 }
 0x117   :  { %101 = vadd.xlane.f32.xlu1 %v100_v37 }
 0x182   :  { %v99_v38 = vpop.xlane.xlu1 %98 }
 0x183   :  { %v103_v39 = vmul.f32 %v99_v38, %v90_v27 }
 0x185   :  { %v105_v40 = vadd.f32 1e-05, %v103_v39 }
 0x187   :  { %159 = vrsqrt.f32 %v105_v40  ;;  %vm113_vm3 = vweird.f32 %v105_v40 }
 0x18a   :  { %v102_v41 = vpop.xlane.xlu1 %101 }
 0x18b   :  { %v104_v42 = vmul.f32 %v102_v41, %v90_v27 }
 0x18d   :  { %v160_v43 = vpop.eup %159  ;;  %v106_v44 = vadd.f32 1e-05, %v104_v42 }
 0x18e   :  { %v108_v45 = vmul.f32 %v160_v43, %v105_v40  ;;  %vm114_vm2 = vweird.f32 %v160_v43 }
 0x18f   :  { %161 = vrsqrt.f32 %v106_v44  ;;  %vm115_vm4 = vmor %vm113_vm3, %vm114_vm2  ;;  %vm123_vm6 = vweird.f32 %v106_v44 }
 0x190   :  { %v109_v46 = vmul.f32 %v160_v43, %v108_v45 }
 0x192   :  { %v110_v47 = vmul.f32 0.5, %v109_v46 }
 0x194   :  { %v111_v48 = vsub.f32 1.5, %v110_v47 }
 0x195   :  { %v162_v49 = vpop.eup %161 }
 0x196   :  { %v112_v50 = vmul.f32 %v160_v43, %v111_v48  ;;  %v118_v51 = vmul.f32 %v162_v49, %v106_v44  ;;  %vm124_vm5 = vweird.f32 %v162_v49 }
 0x197   :  { %vm125_vm7 = vmor %vm123_vm6, %vm124_vm5 }
 0x198   :  { %v116_v53 = vsel %vm115_vm4, %v160_v43, %v112_v50  ;;  %v119_v54 = vmul.f32 %v162_v49, %v118_v51 }
 0x199   :  { %v127_v56 = vmul.f32 %v116_v53, %v93_v30 }
 0x19a   :  { %v120_v57 = vmul.f32 0.5, %v119_v54 }
 0x19b   :  { %v133_v58 = vmul.f32 %v155_v52, %v127_v56 }
 0x19c   :  { %v121_v59 = vsub.f32 1.5, %v120_v57 }
 0x19d   :  { %v139_v60 = vadd.f32 %v156_v55, %v133_v58 }
 0x19e   :  { %v122_v61 = vmul.f32 %v162_v49, %v121_v59 }
 0x19f   :  { %141 = vst.msk [vmem:[%s248_s5] sm:$0xff] %vm24_vm0, %v139_v60 }
 0x1a0   :  { %v126_v62 = vsel %vm125_vm7, %v162_v49, %v122_v61 }
 0x1a1   :  { %v128_v63 = vmul.f32 %v126_v62, %v94_v35 }
 0x1a3   :  { %v134_v0 = vmul.f32 %v155_v52, %v128_v63 }
 0x1a5   :  { %v140_v1 = vadd.f32 %v156_v55, %v134_v0 }
 0x1a7   :  { %142 = vst.msk [vmem:[%s248_s5 + $0x8] sm:$0xff] %vm24_vm0, %v140_v1 }

// kernel: transformer_xl_decoder.36
= control target key start
LH: loop header
LB: loop body
LE: loop exit
PB: predicated region body
PF: predicated region fallthrough
CT: control target
= control target key end

     0   :  { %8 = vsyncpa [#allocation4], 0  ;;  %s154_s15 = smov [#allocation3]   ;;  %s155_s17 = smov 128   ;;  %s211_s0 = inlined_call_operand.vmem [shape: f32[24,32], index: 0, kind: input, shape index: {}]   ;;  %s212_s1 = inlined_call_operand.hbm [shape: f32[32,64], index: 1, kind: input, shape index: {}]   ;;  %s213_s2 = inlined_call_operand.vmem [shape: f32[1,64], index: 2, kind: input, shape index: {}]   ;;  %s214_s3 = inlined_call_operand.vmem [shape: f32[24,64], index: 3, kind: output, shape index: {}]  }
   0x1   :  { %s15_s14 = sshll.u32 %s212_s1, 4  ;;  %s17_s16 = sshll.u32 %s154_s15, 4  ;;  %s16_s14 = int_to_ptr.hbm [resolvable:$true] %s15_s14  ;;  %s18_s16 = int_to_ptr.vmem [resolvable:$true] %s17_s16 }
   0x2   :  { %s156_s18 = smov 8  }
   0x3   :  { %23 = dma.hbm_to_vmem [thread:$0]  %s16_s14, 512, %s18_s16, [#allocation4], %s155_s17, %s155_s17, %s156_s18  }
   0x4   :  { %152 = dma.done.wait [#allocation4], 512  }
   0x5   :  { %153 = vsyncadd [#allocation4], 4294966784  ;;  %vm34_vm0 = vcmask 523264   ;;  %v157_v0 = vmov 0.0   ;;  %v47_v1 = vld [vmem:[#allocation3 + $0x18] sm:$0xff]  ;;  %v46_v2 = vld [vmem:[#allocation3 + $0x10] sm:$0xff] }
   0x6   :  { %35 = vst.msk [vmem:[#allocation2] sm:$0xff] %vm34_vm0, %v157_v0  ;;  %116 = vmatpush.msra.mxu2 %v47_v1  ;;  %70 = vmatpush.msra.mxu0 %v47_v1  ;;  %v45_v3 = vld [vmem:[#allocation3 + $0x8] sm:$0xff]  ;;  %v44_v4 = vld [vmem:[#allocation3] sm:$0xff]  ;;  %v43_v5 = vld [vmem:[%s211_s0 + $0x10] sm:$0xff]  ;;  %vm48_vm1 = vcmask 261120  }
   0x7   :  { %36 = vst.msk [vmem:[#allocation2 + $0x8] sm:$0xff] %vm34_vm0, %v157_v0  ;;  %115 = vmatpush.msra.mxu1 %v47_v1  ;;  %v41_v6 = vld [vmem:[%s211_s0] sm:$0xff]  ;;  %v42_v7 = vld [vmem:[%s211_s0 + $0x8] sm:$0xff] }
   0x8   :  { %37 = vst.msk [vmem:[#allocation2 + $0x10] sm:$0xff] %vm34_vm0, %v157_v0  ;;  %118 = vmatpush.msra.mxu2 %v46_v2  ;;  %71 = vmatpush.msra.mxu0 %v46_v2  ;;  %v127_v17 = vld [vmem:[%s213_s2] ss:$0 sm:$0xff] }
   0x9   :  { %117 = vmatpush.msra.mxu1 %v46_v2 }
   0xa   :  { %120 = vmatpush.msra.mxu2 %v45_v3  ;;  %72 = vmatpush.msra.mxu0 %v45_v3 }
   0xb   :  { %119 = vmatpush.msra.mxu1 %v45_v3 }
   0xc   :  { %122 = vmatpush.msra.mxu2 %v44_v4  ;;  %73 = vmatpush.msra.mxu0 %v44_v4 }
   0xd   :  { %114 = vmatmul.msk.f32.vlgmr.msra.gmra.mxu2 %vm48_vm1, %v43_v5  ;;  %121 = vmatpush.msra.mxu1 %v44_v4  ;;  %v38_v8 = vld [vmem:[#allocation2] sm:$0xff] }
   0xe   :  { %112 = vmatmul.msk.f32.vlgmr.msra.gmra.mxu0 %vm48_vm1, %v41_v6  ;;  %113 = vmatmul.msk.f32.vlgmr.msra.gmra.mxu1 %vm48_vm1, %v42_v7  ;;  %v39_v9 = vld [vmem:[#allocation2 + $0x8] sm:$0xff] }
   0xf   :  { %v40_v14 = vld [vmem:[#allocation2 + $0x10] sm:$0xff] }
  0x8b   :  { %v75_v10 = vpop.f32.mrf.mxu0  ;;  %v78_v11 = vpop.f32.mrf.mxu1 }
  0x8c   :  { %v84_v12 = vadd.f32 %v75_v10, %v38_v8  ;;  %v85_v13 = vadd.f32 %v78_v11, %v39_v9 }
  0x8e   :  { %88 = vst.msk [vmem:[#allocation2] sm:$0xff] %vm34_vm0, %v84_v12 }
  0x8f   :  { %89 = vst.msk [vmem:[#allocation2 + $0x8] sm:$0xff] %vm34_vm0, %v85_v13 }
  0x90   :  { %v81_v15 = vpop.f32.mrf.mxu2 }
  0x91   :  { %v86_v16 = vadd.f32 %v81_v15, %v40_v14 }
  0x93   :  { %90 = vst.msk [vmem:[#allocation2 + $0x10] sm:$0xff] %vm34_vm0, %v86_v16 }
  0x95   :  { %v94_v18 = vld [vmem:[#allocation2] sm:$0xff] }
  0x96   :  { %v101_v19 = vadd.f32 %v127_v17, %v94_v18  ;;  %v95_v20 = vld [vmem:[#allocation2 + $0x8] sm:$0xff] }
  0x97   :  { %v102_v21 = vadd.f32 %v127_v17, %v95_v20 }
  0x98   :  { %104 = vst.msk [vmem:[%s214_s3] sm:$0xff] %vm34_vm0, %v101_v19 }
  0x99   :  { %105 = vst.msk [vmem:[%s214_s3 + $0x8] sm:$0xff] %vm34_vm0, %v102_v21 }
  0x9a   :  { %v96_v22 = vld [vmem:[#allocation2 + $0x10] sm:$0xff] }
  0x9b   :  { %v103_v23 = vadd.f32 %v127_v17, %v96_v22 }
  0x9d   :  { %106 = vst.msk [vmem:[%s214_s3 + $0x10] sm:$0xff] %vm34_vm0, %v103_v23 }
  0x9e   :  { %111 = vsyncpa [#allocation4], 1 }

// kernel: transformer_xl_decoder.39
= control target key start
LH: loop header
LB: loop body
LE: loop exit
PB: predicated region body
PF: predicated region fallthrough
CT: control target
= control target key end

     0   :  { %8 = vsyncpa [#allocation4], 0  ;;  %s137_s15 = smov [#allocation3]   ;;  %s138_s17 = smov 128   ;;  %s185_s0 = inlined_call_operand.vmem [shape: f32[16,32], index: 0, kind: input, shape index: {}]   ;;  %s186_s1 = inlined_call_operand.hbm [shape: f32[32,64], index: 1, kind: input, shape index: {}]   ;;  %s187_s2 = inlined_call_operand.vmem [shape: f32[1,64], index: 2, kind: input, shape index: {}]   ;;  %s188_s3 = inlined_call_operand.vmem [shape: f32[16,64], index: 3, kind: output, shape index: {}]  }
   0x1   :  { %s15_s14 = sshll.u32 %s186_s1, 4  ;;  %s17_s16 = sshll.u32 %s137_s15, 4  ;;  %s16_s14 = int_to_ptr.hbm [resolvable:$true] %s15_s14  ;;  %s18_s16 = int_to_ptr.vmem [resolvable:$true] %s17_s16 }
   0x2   :  { %s139_s18 = smov 8  }
   0x3   :  { %23 = dma.hbm_to_vmem [thread:$0]  %s16_s14, 512, %s18_s16, [#allocation4], %s138_s17, %s138_s17, %s139_s18  }
   0x4   :  { %135 = dma.done.wait [#allocation4], 512  }
   0x5   :  { %136 = vsyncadd [#allocation4], 4294966784  ;;  %vm34_vm0 = vcmask 523264   ;;  %v140_v0 = vmov 0.0   ;;  %v44_v1 = vld [vmem:[#allocation3 + $0x18] sm:$0xff]  ;;  %v43_v2 = vld [vmem:[#allocation3 + $0x10] sm:$0xff] }
   0x6   :  { %35 = vst.msk [vmem:[#allocation2] sm:$0xff] %vm34_vm0, %v140_v0  ;;  %64 = vmatpush.msra.mxu0 %v44_v1  ;;  %102 = vmatpush.msra.mxu1 %v44_v1  ;;  %v42_v3 = vld [vmem:[#allocation3 + $0x8] sm:$0xff]  ;;  %v41_v4 = vld [vmem:[#allocation3] sm:$0xff]  ;;  %v39_v5 = vld [vmem:[%s185_s0] sm:$0xff]  ;;  %vm45_vm1 = vcmask 261120  }
   0x7   :  { %36 = vst.msk [vmem:[#allocation2 + $0x8] sm:$0xff] %vm34_vm0, %v140_v0  ;;  %v40_v6 = vld [vmem:[%s185_s0 + $0x8] sm:$0xff]  ;;  %v110_v13 = vld [vmem:[%s187_s2] ss:$0 sm:$0xff] }
   0x8   :  { %65 = vmatpush.msra.mxu0 %v43_v2  ;;  %103 = vmatpush.msra.mxu1 %v43_v2 }
   0xa   :  { %66 = vmatpush.msra.mxu0 %v42_v3  ;;  %104 = vmatpush.msra.mxu1 %v42_v3 }
   0xc   :  { %67 = vmatpush.msra.mxu0 %v41_v4  ;;  %105 = vmatpush.msra.mxu1 %v41_v4 }
   0xd   :  { %100 = vmatmul.msk.f32.vlgmr.msra.gmra.mxu0 %vm45_vm1, %v39_v5  ;;  %101 = vmatmul.msk.f32.vlgmr.msra.gmra.mxu1 %vm45_vm1, %v40_v6  ;;  %v37_v7 = vld [vmem:[#allocation2] sm:$0xff] }
   0xe   :  { %v38_v8 = vld [vmem:[#allocation2 + $0x8] sm:$0xff] }
  0x8a   :  { %v69_v9 = vpop.f32.mrf.mxu0  ;;  %v72_v10 = vpop.f32.mrf.mxu1 }
  0x8b   :  { %v75_v11 = vadd.f32 %v69_v9, %v37_v7  ;;  %v76_v12 = vadd.f32 %v72_v10, %v38_v8 }
  0x8d   :  { %78 = vst.msk [vmem:[#allocation2] sm:$0xff] %vm34_vm0, %v75_v11 }
  0x8e   :  { %79 = vst.msk [vmem:[#allocation2 + $0x8] sm:$0xff] %vm34_vm0, %v76_v12 }
  0x94   :  { %v83_v14 = vld [vmem:[#allocation2] sm:$0xff] }
  0x95   :  { %v89_v15 = vadd.f32 %v110_v13, %v83_v14  ;;  %v84_v16 = vld [vmem:[#allocation2 + $0x8] sm:$0xff] }
  0x96   :  { %v90_v17 = vadd.f32 %v110_v13, %v84_v16 }
  0x97   :  { %v91_v18 = vmax.f32 %v89_v15, 0.0 }
  0x98   :  { %v92_v19 = vmax.f32 %v90_v17, 0.0 }
  0x99   :  { %93 = vst.msk [vmem:[%s188_s3] sm:$0xff] %vm34_vm0, %v91_v18 }
  0x9a   :  { %94 = vst.msk [vmem:[%s188_s3 + $0x8] sm:$0xff] %vm34_vm0, %v92_v19 }
  0x9b   :  { %99 = vsyncpa [#allocation4], 1 }

// kernel: transformer_xl_decoder.41
= control target key start
LH: loop header
LB: loop body
LE: loop exit
PB: predicated region body
PF: predicated region fallthrough
CT: control target
= control target key end

     0   :  { %vm17_vm0 = vcmask 261120   ;;  %s184_s0 = inlined_call_operand.vmem [shape: f32[16,32], index: 0, kind: input, shape index: {}]   ;;  %s185_s1 = inlined_call_operand.vmem [shape: f32[1,32], index: 1, kind: input, shape index: {}]   ;;  %s186_s2 = inlined_call_operand.vmem [shape: f32[1,32], index: 2, kind: input, shape index: {}]   ;;  %s187_s3 = inlined_call_operand.hbm [shape: f32[16,32], index: 3, kind: output, shape index: {}]  }
   0x1   :  { %v15_v0 = vld [vmem:[%s184_s0] sm:$0xff] }
   0x2   :  { %v18_v1 = vsel %vm17_vm0, %v15_v0, 0.0 }
   0x3   :  { %8 = vsyncpa [#allocation3], 0  ;;  %19 = vadd.xlane.f32.xlu0 %v18_v1  ;;  %v16_v2 = vld [vmem:[%s184_s0 + $0x8] sm:$0xff]  ;;  %v139_v4 = vmov 32.0   ;;  %v105_v35 = vld [vmem:[%s185_s1] ss:$0 sm:$0xff] }
   0x4   :  { %v21_v3 = vsel %vm17_vm0, %v16_v2, 0.0  ;;  %107 = vrcp.f32 %v139_v4  ;;  %v106_v39 = vld [vmem:[%s186_s2] ss:$0 sm:$0xff]  ;;  %s140_s1 = smov [#allocation2]   ;;  %s89_s22 = sshll.u32 %s187_s3, 4  ;;  %s90_s22 = int_to_ptr.hbm [resolvable:$true] %s89_s22 }
   0x5   :  { %s87_s19 = sshll.u32 %s140_s1, 4  ;;  %s141_s2 = smov 128   ;;  %s88_s19 = int_to_ptr.vmem [resolvable:$true] %s87_s19 }
   0x6   :  { %s142_s23 = smov 8  }
   0xa   :  { %v108_v5 = vpop.eup %107 }
   0xb   :  { %22 = vadd.xlane.f32.xlu0 %v21_v3  ;;  %v25_v6 = vmul.f32 32.0, %v108_v5  ;;  %vm29_vm1 = vweird.f32 %v108_v5 }
   0xd   :  { %v26_v7 = vsub.f32 1.0, %v25_v6 }
   0xf   :  { %v27_v8 = vmul.f32 %v108_v5, %v26_v7 }
  0x11   :  { %v28_v9 = vadd.f32 %v108_v5, %v27_v8 }
  0x13   :  { %v30_v10 = vsel %vm29_vm1, %v108_v5, %v28_v9 }
  0x76   :  { %v20_v11 = vpop.xlane.xlu0 %19 }
  0x77   :  { %v31_v12 = vmul.f32 %v30_v10, %v20_v11 }
  0x79   :  { %v33_v13 = vsub.f32 %v15_v0, %v31_v12 }
  0x7b   :  { %v35_v14 = vmul.f32 %v33_v13, %v33_v13 }
  0x7d   :  { %v37_v15 = vsel %vm17_vm0, %v35_v14, 0.0 }
  0x7e   :  { %38 = vadd.xlane.f32.xlu1 %v37_v15  ;;  %v23_v16 = vpop.xlane.xlu0 %22 }
  0x7f   :  { %v32_v17 = vmul.f32 %v30_v10, %v23_v16 }
  0x81   :  { %v34_v18 = vsub.f32 %v16_v2, %v32_v17 }
  0x83   :  { %v36_v19 = vmul.f32 %v34_v18, %v34_v18 }
  0x85   :  { %v40_v20 = vsel %vm17_vm0, %v36_v19, 0.0 }
  0x86   :  { %41 = vadd.xlane.f32.xlu1 %v40_v20 }
  0xf1   :  { %v39_v21 = vpop.xlane.xlu1 %38 }
  0xf2   :  { %v43_v22 = vmul.f32 %v39_v21, %v30_v10 }
  0xf4   :  { %v45_v23 = vadd.f32 1e-05, %v43_v22 }
  0xf6   :  { %109 = vrsqrt.f32 %v45_v23  ;;  %vm53_vm3 = vweird.f32 %v45_v23 }
  0xf9   :  { %v42_v24 = vpop.xlane.xlu1 %41 }
  0xfa   :  { %v44_v25 = vmul.f32 %v42_v24, %v30_v10 }
  0xfc   :  { %v110_v26 = vpop.eup %109  ;;  %v46_v27 = vadd.f32 1e-05, %v44_v25 }
  0xfd   :  { %v48_v28 = vmul.f32 %v110_v26, %v45_v23  ;;  %vm54_vm2 = vweird.f32 %v110_v26 }
  0xfe   :  { %111 = vrsqrt.f32 %v46_v27  ;;  %vm55_vm4 = vmor %vm53_vm3, %vm54_vm2  ;;  %vm63_vm6 = vweird.f32 %v46_v27 }
  0xff   :  { %v49_v29 = vmul.f32 %v110_v26, %v48_v28 }
 0x101   :  { %v50_v30 = vmul.f32 0.5, %v49_v29 }
 0x103   :  { %v51_v31 = vsub.f32 1.5, %v50_v30 }
 0x104   :  { %v112_v32 = vpop.eup %111 }
 0x105   :  { %v52_v33 = vmul.f32 %v110_v26, %v51_v31  ;;  %v58_v34 = vmul.f32 %v112_v32, %v46_v27  ;;  %vm64_vm5 = vweird.f32 %v112_v32 }
 0x106   :  { %vm65_vm7 = vmor %vm63_vm6, %vm64_vm5 }
 0x107   :  { %v56_v36 = vsel %vm55_vm4, %v110_v26, %v52_v33  ;;  %v59_v37 = vmul.f32 %v112_v32, %v58_v34 }
 0x108   :  { %v67_v38 = vmul.f32 %v56_v36, %v33_v13 }
 0x109   :  { %v60_v40 = vmul.f32 0.5, %v59_v37 }
 0x10a   :  { %v73_v41 = vmul.f32 %v105_v35, %v67_v38 }
 0x10b   :  { %v61_v42 = vsub.f32 1.5, %v60_v40 }
 0x10c   :  { %v79_v43 = vadd.f32 %v106_v39, %v73_v41 }
 0x10d   :  { %v62_v44 = vmul.f32 %v112_v32, %v61_v42 }
 0x10e   :  { %81 = vst.msk [vmem:[#allocation2] sm:$0xff] %vm17_vm0, %v79_v43 }
 0x10f   :  { %v66_v45 = vsel %vm65_vm7, %v112_v32, %v62_v44 }
 0x110   :  { %v68_v46 = vmul.f32 %v66_v45, %v34_v18 }
 0x112   :  { %v74_v47 = vmul.f32 %v105_v35, %v68_v46 }
 0x114   :  { %v80_v48 = vadd.f32 %v106_v39, %v74_v47 }
 0x116   :  { %82 = vst.msk [vmem:[#allocation2 + $0x8] sm:$0xff] %vm17_vm0, %v80_v48 }
 0x117   :  { %95 = dma.vmem_to_hbm [thread:$0]  %s88_s19, 256, %s90_s22, [#allocation3], %s141_s2, %s141_s2, %s142_s23  }
 0x118   :  { %137 = dma.done.wait [#allocation3], 256  }
 0x119   :  { %138 = vsyncadd [#allocation3], 4294967040 }
 0x11a   :  { %100 = vsyncpa [#allocation3], 1 }

</bundles_post_ra>
